<compile_context>
chip_gen: v6e
topology: v6e:2x2x1
jax: 0.10.0
libtpu: 0.0.40
codegen_flags: <defaults>
</compile_context>

<pallas_src>
import functools

import jax
import jax.numpy as jnp
from jax import lax
from jax.experimental import pallas as pl
from jax.experimental.pallas import tpu as pltpu


# ---------------------------------------------------------------------------
# Tiling helper
# ---------------------------------------------------------------------------
def _pick_row_tile(total_rows, requested, row_bytes, *, align,
                   target_bytes=2 * 1024 * 1024):
    """Pick a row tile: divisor of total_rows (multiple of `align`, or the full
    extent), as large as possible while the per-tile output fits target_bytes."""
    def ok(t):
        return (0 < t <= total_rows and total_rows % t == 0
                and (t % align == 0 or t == total_rows))

    if requested is not None and ok(requested):
        return requested
    cands = [t for t in range(align, total_rows, align) if ok(t)]
    cands.append(total_rows)
    fitting = [t for t in cands if t * row_bytes <= target_bytes]
    return max(fitting) if fitting else min(cands)


# ---------------------------------------------------------------------------
# with_conv=True: phase-decomposed upsample + 3x3 conv
# ---------------------------------------------------------------------------
def _phase_conv_weights(weight_oihw, dtype):
    """Fold the 3x3 conv (applied after nearest 2x upsampling) into four 2x2
    phase kernels, laid out as (4 phases, 4*C_in, C_out) matmul operands."""
    c_out, c_in, _, _ = weight_oihw.shape
    w_hwio = jnp.transpose(weight_oihw, (2, 3, 1, 0)).astype(jnp.float32)
    # agg[a, r, R] == 1 iff original 3x3 row R collapses onto effective tap row
    # r for output phase a (identical matrix for the column axis).
    agg = jnp.array([[[1., 0., 0.], [0., 1., 1.]],
                     [[1., 1., 0.], [0., 0., 1.]]], jnp.float32)
    w_eff = jnp.einsum('arR,bcK,RKio->abrcio', agg, agg, w_hwio)
    # Flatten (a, b) -> phase p = 2a + b and (r, c, i) -> tap-major K = 4*C_in.
    return w_eff.reshape(4, 4 * c_in, c_out).astype(dtype)


def _upsample_conv_kernel(x_ref, wp_ref, b_ref, o_ref, *, row_tile, W, C):
    """Grid step (n, t): produce output rows [2*t*TH, 2*(t+1)*TH).

    x_ref : (1, H+2, W+2, C)  zero-padded NHWC input, VMEM-resident per image
    wp_ref: (4, 4C, C)        folded phase weights
    b_ref : (1, C)            conv bias (f32)
    o_ref : (1, 2*TH, 2*W, C) output row tile (NHWC)
    """
    TH = row_tile
    row0 = pl.multiple_of(pl.program_id(1) * TH, TH)

    # Nine shifted (TH, W, C) taps of the padded window; shared by the phases.
    shift = [[x_ref[0, pl.ds(row0 + dr, TH), pl.ds(dc, W), :]
              for dc in range(3)] for dr in range(3)]

    bias = b_ref[0].astype(jnp.float32)                      # (C,)

    ys = [[None, None], [None, None]]
    for pa in (0, 1):
        for pb in (0, 1):
            # im2col over the 2x2 effective taps, concatenated along channels
            # (tap-major, matching _phase_conv_weights). One K=4C MXU matmul.
            taps = jnp.concatenate(
                [shift[pa][pb], shift[pa][pb + 1],
                 shift[pa + 1][pb], shift[pa + 1][pb + 1]], axis=-1)
            y = jnp.dot(taps.reshape(TH * W, 4 * C), wp_ref[2 * pa + pb],
                        preferred_element_type=jnp.float32)
            y = y + bias
            ys[pa][pb] = y.reshape(TH, W, C).astype(o_ref.dtype)

    # Interleave the four phases: out[2i+a, 2j+b, :] = ys[a][b][i, j, :].
    # (lane dim C is unchanged throughout, so this lowers to cheap relayouts.)
    za0 = jnp.stack([ys[0][0], ys[0][1]], axis=2)            # (TH, W, 2, C)
    za1 = jnp.stack([ys[1][0], ys[1][1]], axis=2)
    z = jnp.stack([za0, za1], axis=1)                        # (TH, 2, W, 2, C)
    o_ref[0] = z.reshape(2 * TH, 2 * W, C)


def _upsample_with_conv(x_nchw, weight_oihw, bias, row_tile):
    N, C, H, W = x_nchw.shape
    itemsize = int(jnp.dtype(x_nchw.dtype).itemsize)
    TH = _pick_row_tile(H, row_tile, row_bytes=2 * 2 * W * C * itemsize, align=1)
    grid = (N, H // TH)

    # NCHW -> NHWC and zero-pad H/W by 1 (fused by XLA into a single pass).
    x_pad = jnp.pad(jnp.transpose(x_nchw, (0, 2, 3, 1)),
                    ((0, 0), (1, 1), (1, 1), (0, 0)))
    wp = _phase_conv_weights(weight_oihw, x_nchw.dtype)
    b2d = bias.reshape(1, C).astype(jnp.float32)

    kernel = functools.partial(_upsample_conv_kernel, row_tile=TH, W=W, C=C)
    out_nhwc = pl.pallas_call(
        kernel,
        out_shape=jax.ShapeDtypeStruct((N, 2 * H, 2 * W, C), x_nchw.dtype),
        grid_spec=pltpu.PrefetchScalarGridSpec(
            num_scalar_prefetch=0,
            grid=grid,
            in_specs=[
                # Whole padded image: block index ignores the row-tile axis, so
                # it is DMA'd once per image and stays VMEM-resident while the
                # row tiles (which need a 1-row halo) slice it in-kernel.
                # TODO(synk): for very large spatial dims, switch this to a
                # halo'd row-tile (manual DMA) so VMEM use is size-independent.
                pl.BlockSpec((1, H + 2, W + 2, C), lambda n, t: (n, 0, 0, 0)),
                pl.BlockSpec((4, 4 * C, C), lambda n, t: (0, 0, 0)),
                pl.BlockSpec((1, C), lambda n, t: (0, 0)),
            ],
            out_specs=pl.BlockSpec((1, 2 * TH, 2 * W, C),
                                   lambda n, t: (n, t, 0, 0)),
        ),
        compiler_params=pltpu.CompilerParams(
            dimension_semantics=("parallel", "parallel"),
            vmem_limit_bytes=64 * 1024 * 1024),
        cost_estimate=pl.CostEstimate(
            flops=int(2 * 16 * N * H * W * C * C),
            transcendentals=0,
            bytes_accessed=int(itemsize * (N * (H + 2) * (W + 2) * C
                                           + 16 * C * C
                                           + 4 * N * H * W * C) + 4 * C)),
    )(x_pad, wp, b2d)

    # TODO(synk): avoid this extra HBM round trip by writing NCHW directly from
    # the kernel (in-kernel transpose) or keeping the surrounding model NHWC.
    return jnp.transpose(out_nhwc, (0, 3, 1, 2))


# ---------------------------------------------------------------------------
# with_conv=False: NCHW-native nearest 2x upsample, no transposes
# ---------------------------------------------------------------------------
def _upsample_only_kernel(x_ref, o_ref):
    """x_ref: (1, RT, W) slab of the (N, C*H, W) view;
    o_ref: (1, 2*RT, 2*W) slab of the (N, 2*C*H, 2*W) output view."""
    x = x_ref[0]                                             # (RT, W)
    RT, W = x.shape
    # Lane (W) duplication via an exact 0/1 selection matmul on the idle MXU.
    src = lax.broadcasted_iota(jnp.int32, (W, 2 * W), 0)
    dst = lax.broadcasted_iota(jnp.int32, (W, 2 * W), 1)
    sel = (dst // 2 == src).astype(x.dtype)
    y = jnp.dot(x, sel)                                      # (RT, 2W), exact
    # Row (sublane) duplication: broadcast + reshape (lane dim unchanged).
    o_ref[0] = jnp.broadcast_to(y[:, None, :], (RT, 2, 2 * W)).reshape(
        2 * RT, 2 * W).astype(o_ref.dtype)


def _upsample_no_conv(x_nchw, row_tile):
    N, C, H, W = x_nchw.shape
    F = C * H                                   # flattened row axis
    itemsize = int(jnp.dtype(x_nchw.dtype).itemsize)
    RT = _pick_row_tile(F, row_tile, row_bytes=2 * 2 * W * itemsize, align=8)
    grid = (N, F // RT)

    x_flat = x_nchw.reshape(N, F, W)            # free view (row-major)
    out_flat = pl.pallas_call(
        _upsample_only_kernel,
        out_shape=jax.ShapeDtypeStruct((N, 2 * F, 2 * W), x_nchw.dtype),
        grid_spec=pltpu.PrefetchScalarGridSpec(
            num_scalar_prefetch=0,
            grid=grid,
            in_specs=[pl.BlockSpec((1, RT, W), lambda n, r: (n, r, 0))],
            out_specs=pl.BlockSpec((1, 2 * RT, 2 * W), lambda n, r: (n, r, 0)),
        ),
        compiler_params=pltpu.CompilerParams(
            dimension_semantics=("parallel", "parallel"),
            vmem_limit_bytes=64 * 1024 * 1024),
        cost_estimate=pl.CostEstimate(
            flops=int(2 * N * F * W * 2 * W),
            transcendentals=0,
            bytes_accessed=int(5 * N * F * W * itemsize)),
    )(x_flat)
    return out_flat.reshape(N, C, 2 * H, 2 * W)  # free view (row-major)


# ---------------------------------------------------------------------------
# Public entry point (matches taming Upsample.forward: NCHW in, NCHW out)
# ---------------------------------------------------------------------------
def upsample_forward(x_nchw, weight_oihw=None, bias=None, *, with_conv=True,
                     row_tile=None):
    """x_nchw: (N, C, H, W); weight_oihw: (C, C, 3, 3); bias: (C,).

    row_tile: rows per grid step along the tiled axis (H for the conv path,
    C*H for the no-conv path); None picks a size automatically.
    """
    if with_conv:
        if weight_oihw is None or bias is None:
            raise ValueError("with_conv=True requires conv weight and bias")
        return _upsample_with_conv(x_nchw, weight_oihw, bias, row_tile)
    return _upsample_no_conv(x_nchw, row_tile)


# ---------------------------------------------------------------------------
# Pure-JAX reference (PyTorch semantics) and self-test
# ---------------------------------------------------------------------------
def _reference(x_nchw, weight_oihw, bias, with_conv):
    N, C, H, W = x_nchw.shape
    up = jnp.repeat(jnp.repeat(x_nchw, 2, axis=2), 2, axis=3)
    if not with_conv:
        return up
    out = lax.conv_general_dilated(
        up, weight_oihw, window_strides=(1, 1), padding=((1, 1), (1, 1)),
        dimension_numbers=("NCHW", "OIHW", "NCHW"))
    return out + bias.reshape(1, C, 1, 1)


if __name__ == "__main__":
    key = jax.random.PRNGKey(0)
    k_x, k_w, k_b = jax.random.split(key, 3)

    N, C, H, W = 2, 4, 16, 16
    x = jax.random.normal(k_x, (N, C, H, W), dtype=jnp.float32)

    # Deterministic Conv2d-style init (uniform in +/- 1/sqrt(fan_in)).
    fan_in = C * 3 * 3
    bound = 1.0 / (fan_in ** 0.5)
    weight = jax.random.uniform(k_w, (C, C, 3, 3), jnp.float32, -bound, bound)
    bias = jax.random.uniform(k_b, (C,), jnp.float32, -bound, bound)

    # with_conv = True path (row_tile=8 -> 2 row tiles per image).
    out = upsample_forward(x, weight, bias, with_conv=True, row_tile=8)
    out = jax.block_until_ready(out)
    ref = _reference(x, weight, bias, True)
    assert out.shape == (N, C, 2 * H, 2 * W)
    err = float(jnp.max(jnp.abs(out - ref)))
    assert jnp.allclose(out, ref, atol=1e-4, rtol=1e-4), f"max abs err {err}"

    # with_conv = False path (flat row axis C*H = 64, row_tile=32 -> 2 tiles).
    out2 = upsample_forward(x, with_conv=False, row_tile=32)
    out2 = jax.block_until_ready(out2)
    ref2 = _reference(x, weight, bias, False)
    assert out2.shape == (N, C, 2 * H, 2 * W)
    assert jnp.allclose(out2, ref2, atol=1e-6)

    print("KERNEL_OK")
</pallas_src>

<mosaic_0001>
module attributes {stable_mosaic.version = 11 : i64} {
  func.func @_upsample_conv_kernel(%arg0: i32, %arg1: i32, %arg2: memref<1x18x18x4xf32, #tpu.memory_space<vmem>>, %arg3: memref<4x16x4xf32, #tpu.memory_space<vmem>>, %arg4: memref<1x4xf32, #tpu.memory_space<vmem>>, %arg5: memref<1x16x32x4xf32, #tpu.memory_space<vmem>>) attributes {dimension_semantics = [#tpu.dimension_semantics<parallel>, #tpu.dimension_semantics<parallel>], iteration_bounds = array<i64: 2, 2>, scalar_prefetch = 0 : i64, scratch_operands = 0 : i64, tpu.core_type = #tpu.core_type<tc>, window_params = [{transform_indices = @transform_0, window_bounds = array<i64: 1, 18, 18, 4>}, {pipeline_mode = #tpu.pipeline_mode<synchronous>, transform_indices = @transform_1, window_bounds = array<i64: 4, 16, 4>}, {pipeline_mode = #tpu.pipeline_mode<synchronous>, transform_indices = @transform_2, window_bounds = array<i64: 1, 4>}, {transform_indices = @transform_3, window_bounds = array<i64: 1, 16, 32, 4>}]} {
    %c8_i32 = arith.constant 8 : i32
    %0 = arith.muli %arg1, %c8_i32 : i32
    %1 = tpu.assume_multiple %0, 8 : i32
    %c0_i32 = arith.constant 0 : i32
    %2 = arith.addi %1, %c0_i32 : i32
    %c0 = arith.constant 0 : index
    %3 = arith.index_cast %2 : i32 to index
    %c0_0 = arith.constant 0 : index
    %c0_1 = arith.constant 0 : index
    %4 = vector.load %arg2[%c0, %3, %c0_0, %c0_1] : memref<1x18x18x4xf32, #tpu.memory_space<vmem>>, vector<1x8x16x4xf32>
    %5 = vector.shape_cast %4 : vector<1x8x16x4xf32> to vector<8x16x4xf32>
    %c0_i32_2 = arith.constant 0 : i32
    %6 = arith.addi %1, %c0_i32_2 : i32
    %c0_3 = arith.constant 0 : index
    %7 = arith.index_cast %6 : i32 to index
    %c1 = arith.constant 1 : index
    %c0_4 = arith.constant 0 : index
    %8 = vector.load %arg2[%c0_3, %7, %c1, %c0_4] : memref<1x18x18x4xf32, #tpu.memory_space<vmem>>, vector<1x8x16x4xf32>
    %9 = vector.shape_cast %8 : vector<1x8x16x4xf32> to vector<8x16x4xf32>
    %c0_i32_5 = arith.constant 0 : i32
    %10 = arith.addi %1, %c0_i32_5 : i32
    %c0_6 = arith.constant 0 : index
    %11 = arith.index_cast %10 : i32 to index
    %c2 = arith.constant 2 : index
    %c0_7 = arith.constant 0 : index
    %12 = vector.load %arg2[%c0_6, %11, %c2, %c0_7] : memref<1x18x18x4xf32, #tpu.memory_space<vmem>>, vector<1x8x16x4xf32>
    %13 = vector.shape_cast %12 : vector<1x8x16x4xf32> to vector<8x16x4xf32>
    %c1_i32 = arith.constant 1 : i32
    %14 = arith.addi %1, %c1_i32 : i32
    %c0_8 = arith.constant 0 : index
    %15 = arith.index_cast %14 : i32 to index
    %c0_9 = arith.constant 0 : index
    %c0_10 = arith.constant 0 : index
    %16 = vector.load %arg2[%c0_8, %15, %c0_9, %c0_10] : memref<1x18x18x4xf32, #tpu.memory_space<vmem>>, vector<1x8x16x4xf32>
    %17 = vector.shape_cast %16 : vector<1x8x16x4xf32> to vector<8x16x4xf32>
    %c1_i32_11 = arith.constant 1 : i32
    %18 = arith.addi %1, %c1_i32_11 : i32
    %c0_12 = arith.constant 0 : index
    %19 = arith.index_cast %18 : i32 to index
    %c1_13 = arith.constant 1 : index
    %c0_14 = arith.constant 0 : index
    %20 = vector.load %arg2[%c0_12, %19, %c1_13, %c0_14] : memref<1x18x18x4xf32, #tpu.memory_space<vmem>>, vector<1x8x16x4xf32>
    %21 = vector.shape_cast %20 : vector<1x8x16x4xf32> to vector<8x16x4xf32>
    %c1_i32_15 = arith.constant 1 : i32
    %22 = arith.addi %1, %c1_i32_15 : i32
    %c0_16 = arith.constant 0 : index
    %23 = arith.index_cast %22 : i32 to index
    %c2_17 = arith.constant 2 : index
    %c0_18 = arith.constant 0 : index
    %24 = vector.load %arg2[%c0_16, %23, %c2_17, %c0_18] : memref<1x18x18x4xf32, #tpu.memory_space<vmem>>, vector<1x8x16x4xf32>
    %25 = vector.shape_cast %24 : vector<1x8x16x4xf32> to vector<8x16x4xf32>
    %c2_i32 = arith.constant 2 : i32
    %26 = arith.addi %1, %c2_i32 : i32
    %c0_19 = arith.constant 0 : index
    %27 = arith.index_cast %26 : i32 to index
    %c0_20 = arith.constant 0 : index
    %c0_21 = arith.constant 0 : index
    %28 = vector.load %arg2[%c0_19, %27, %c0_20, %c0_21] : memref<1x18x18x4xf32, #tpu.memory_space<vmem>>, vector<1x8x16x4xf32>
    %29 = vector.shape_cast %28 : vector<1x8x16x4xf32> to vector<8x16x4xf32>
    %c2_i32_22 = arith.constant 2 : i32
    %30 = arith.addi %1, %c2_i32_22 : i32
    %c0_23 = arith.constant 0 : index
    %31 = arith.index_cast %30 : i32 to index
    %c1_24 = arith.constant 1 : index
    %c0_25 = arith.constant 0 : index
    %32 = vector.load %arg2[%c0_23, %31, %c1_24, %c0_25] : memref<1x18x18x4xf32, #tpu.memory_space<vmem>>, vector<1x8x16x4xf32>
    %33 = vector.shape_cast %32 : vector<1x8x16x4xf32> to vector<8x16x4xf32>
    %c2_i32_26 = arith.constant 2 : i32
    %34 = arith.addi %1, %c2_i32_26 : i32
    %c0_27 = arith.constant 0 : index
    %35 = arith.index_cast %34 : i32 to index
    %c2_28 = arith.constant 2 : index
    %c0_29 = arith.constant 0 : index
    %36 = vector.load %arg2[%c0_27, %35, %c2_28, %c0_29] : memref<1x18x18x4xf32, #tpu.memory_space<vmem>>, vector<1x8x16x4xf32>
    %37 = vector.shape_cast %36 : vector<1x8x16x4xf32> to vector<8x16x4xf32>
    %c0_30 = arith.constant 0 : index
    %c0_31 = arith.constant 0 : index
    %38 = vector.load %arg4[%c0_30, %c0_31] : memref<1x4xf32, #tpu.memory_space<vmem>>, vector<1x4xf32>
    %39 = vector.shape_cast %38 : vector<1x4xf32> to vector<4xf32>
    %40 = tpu.concatenate %5, %9, %17, %21 in 2 : vector<8x16x4xf32>, vector<8x16x4xf32>, vector<8x16x4xf32>, vector<8x16x4xf32> -> vector<8x16x16xf32>
    %41 = vector.shape_cast %40 : vector<8x16x16xf32> to vector<128x16xf32>
    %c0_32 = arith.constant 0 : index
    %c0_33 = arith.constant 0 : index
    %c0_34 = arith.constant 0 : index
    %42 = vector.load %arg3[%c0_32, %c0_33, %c0_34] : memref<4x16x4xf32, #tpu.memory_space<vmem>>, vector<1x16x4xf32>
    %43 = vector.shape_cast %42 : vector<1x16x4xf32> to vector<16x4xf32>
    %cst = arith.constant dense<0.000000e+00> : vector<128x4xf32>
    %44 = tpu.matmul %41, %43, %cst {dimension_numbers = #tpu.dot_dimension_numbers<[1], [0], [0], [1], [0, 0, 1, 1], [], []>} : vector<128x16xf32>, vector<16x4xf32>, vector<128x4xf32> -> vector<128x4xf32>
    %45 = vector.shape_cast %39 : vector<4xf32> to vector<1x4xf32>
    %46 = vector.broadcast %45 : vector<1x4xf32> to vector<128x4xf32>
    %47 = arith.addf %44, %46 : vector<128x4xf32>
    %48 = vector.shape_cast %47 : vector<128x4xf32> to vector<8x16x4xf32>
    %49 = tpu.concatenate %9, %13, %21, %25 in 2 : vector<8x16x4xf32>, vector<8x16x4xf32>, vector<8x16x4xf32>, vector<8x16x4xf32> -> vector<8x16x16xf32>
    %50 = vector.shape_cast %49 : vector<8x16x16xf32> to vector<128x16xf32>
    %c1_35 = arith.constant 1 : index
    %c0_36 = arith.constant 0 : index
    %c0_37 = arith.constant 0 : index
    %51 = vector.load %arg3[%c1_35, %c0_36, %c0_37] : memref<4x16x4xf32, #tpu.memory_space<vmem>>, vector<1x16x4xf32>
    %52 = vector.shape_cast %51 : vector<1x16x4xf32> to vector<16x4xf32>
    %cst_38 = arith.constant dense<0.000000e+00> : vector<128x4xf32>
    %53 = tpu.matmul %50, %52, %cst_38 {dimension_numbers = #tpu.dot_dimension_numbers<[1], [0], [0], [1], [0, 0, 1, 1], [], []>} : vector<128x16xf32>, vector<16x4xf32>, vector<128x4xf32> -> vector<128x4xf32>
    %54 = vector.shape_cast %39 : vector<4xf32> to vector<1x4xf32>
    %55 = vector.broadcast %54 : vector<1x4xf32> to vector<128x4xf32>
    %56 = arith.addf %53, %55 : vector<128x4xf32>
    %57 = vector.shape_cast %56 : vector<128x4xf32> to vector<8x16x4xf32>
    %58 = tpu.concatenate %17, %21, %29, %33 in 2 : vector<8x16x4xf32>, vector<8x16x4xf32>, vector<8x16x4xf32>, vector<8x16x4xf32> -> vector<8x16x16xf32>
    %59 = vector.shape_cast %58 : vector<8x16x16xf32> to vector<128x16xf32>
    %c2_39 = arith.constant 2 : index
    %c0_40 = arith.constant 0 : index
    %c0_41 = arith.constant 0 : index
    %60 = vector.load %arg3[%c2_39, %c0_40, %c0_41] : memref<4x16x4xf32, #tpu.memory_space<vmem>>, vector<1x16x4xf32>
    %61 = vector.shape_cast %60 : vector<1x16x4xf32> to vector<16x4xf32>
    %cst_42 = arith.constant dense<0.000000e+00> : vector<128x4xf32>
    %62 = tpu.matmul %59, %61, %cst_42 {dimension_numbers = #tpu.dot_dimension_numbers<[1], [0], [0], [1], [0, 0, 1, 1], [], []>} : vector<128x16xf32>, vector<16x4xf32>, vector<128x4xf32> -> vector<128x4xf32>
    %63 = vector.shape_cast %39 : vector<4xf32> to vector<1x4xf32>
    %64 = vector.broadcast %63 : vector<1x4xf32> to vector<128x4xf32>
    %65 = arith.addf %62, %64 : vector<128x4xf32>
    %66 = vector.shape_cast %65 : vector<128x4xf32> to vector<8x16x4xf32>
    %67 = tpu.concatenate %21, %25, %33, %37 in 2 : vector<8x16x4xf32>, vector<8x16x4xf32>, vector<8x16x4xf32>, vector<8x16x4xf32> -> vector<8x16x16xf32>
    %68 = vector.shape_cast %67 : vector<8x16x16xf32> to vector<128x16xf32>
    %c3 = arith.constant 3 : index
    %c0_43 = arith.constant 0 : index
    %c0_44 = arith.constant 0 : index
    %69 = vector.load %arg3[%c3, %c0_43, %c0_44] : memref<4x16x4xf32, #tpu.memory_space<vmem>>, vector<1x16x4xf32>
    %70 = vector.shape_cast %69 : vector<1x16x4xf32> to vector<16x4xf32>
    %cst_45 = arith.constant dense<0.000000e+00> : vector<128x4xf32>
    %71 = tpu.matmul %68, %70, %cst_45 {dimension_numbers = #tpu.dot_dimension_numbers<[1], [0], [0], [1], [0, 0, 1, 1], [], []>} : vector<128x16xf32>, vector<16x4xf32>, vector<128x4xf32> -> vector<128x4xf32>
    %72 = vector.shape_cast %39 : vector<4xf32> to vector<1x4xf32>
    %73 = vector.broadcast %72 : vector<1x4xf32> to vector<128x4xf32>
    %74 = arith.addf %71, %73 : vector<128x4xf32>
    %75 = vector.shape_cast %74 : vector<128x4xf32> to vector<8x16x4xf32>
    %76 = vector.shape_cast %48 : vector<8x16x4xf32> to vector<8x16x1x4xf32>
    %77 = vector.shape_cast %57 : vector<8x16x4xf32> to vector<8x16x1x4xf32>
    %78 = tpu.concatenate %76, %77 in 2 : vector<8x16x1x4xf32>, vector<8x16x1x4xf32> -> vector<8x16x2x4xf32>
    %79 = vector.shape_cast %66 : vector<8x16x4xf32> to vector<8x16x1x4xf32>
    %80 = vector.shape_cast %75 : vector<8x16x4xf32> to vector<8x16x1x4xf32>
    %81 = tpu.concatenate %79, %80 in 2 : vector<8x16x1x4xf32>, vector<8x16x1x4xf32> -> vector<8x16x2x4xf32>
    %82 = vector.shape_cast %78 : vector<8x16x2x4xf32> to vector<8x1x16x2x4xf32>
    %83 = vector.shape_cast %81 : vector<8x16x2x4xf32> to vector<8x1x16x2x4xf32>
    %84 = tpu.concatenate %82, %83 in 1 : vector<8x1x16x2x4xf32>, vector<8x1x16x2x4xf32> -> vector<8x2x16x2x4xf32>
    %85 = vector.shape_cast %84 : vector<8x2x16x2x4xf32> to vector<16x32x4xf32>
    %c0_46 = arith.constant 0 : index
    %c0_47 = arith.constant 0 : index
    %c0_48 = arith.constant 0 : index
    %c0_49 = arith.constant 0 : index
    %86 = vector.load %arg5[%c0_46, %c0_47, %c0_48, %c0_49] : memref<1x16x32x4xf32, #tpu.memory_space<vmem>>, vector<1x16x32x4xf32>
    %87 = vector.shape_cast %86 : vector<1x16x32x4xf32> to vector<16x32x4xf32>
    %88 = vector.shape_cast %85 : vector<16x32x4xf32> to vector<1x16x32x4xf32>
    tpu.vector_store %arg5[%c0_46, %c0_47, %c0_48, %c0_49], %88 {strides = array<i32>} : memref<1x16x32x4xf32, #tpu.memory_space<vmem>>, vector<1x16x32x4xf32>,
    return
  }
  func.func @transform_0(%arg0: i32, %arg1: i32) -> (i32, i32, i32, i32) {
    %c0_i32 = arith.constant 0 : i32
    %c0_i32_0 = arith.constant 0 : i32
    %c0_i32_1 = arith.constant 0 : i32
    %c0_i32_2 = arith.constant 0 : i32
    return %arg0, %c0_i32, %c0_i32_0, %c0_i32_1 : i32, i32, i32, i32
  }
  func.func @transform_1(%arg0: i32, %arg1: i32) -> (i32, i32, i32) {
    %c0_i32 = arith.constant 0 : i32
    %c0_i32_0 = arith.constant 0 : i32
    %c0_i32_1 = arith.constant 0 : i32
    %c0_i32_2 = arith.constant 0 : i32
    return %c0_i32, %c0_i32_0, %c0_i32_1 : i32, i32, i32
  }
  func.func @transform_2(%arg0: i32, %arg1: i32) -> (i32, i32) {
    %c0_i32 = arith.constant 0 : i32
    %c0_i32_0 = arith.constant 0 : i32
    %c0_i32_1 = arith.constant 0 : i32
    return %c0_i32, %c0_i32_0 : i32, i32
  }
  func.func @transform_3(%arg0: i32, %arg1: i32) -> (i32, i32, i32, i32) {
    %c0_i32 = arith.constant 0 : i32
    %c0_i32_0 = arith.constant 0 : i32
    %c0_i32_1 = arith.constant 0 : i32
    return %arg0, %arg1, %c0_i32, %c0_i32_0 : i32, i32, i32, i32
  }
}

</mosaic_0001>

<bundles_post_ra>
// kernel: tpu_custom_call.1
= control target key start
LH: loop header
LB: loop body
LE: loop exit
PB: predicated region body
PF: predicated region fallthrough
CT: control target
= control target key end

     0   :  { %s9112_s12 = smov 0   ;;  %s9114_s13 = smov 0   ;;  %s12201_s0 = inlined_call_operand.vmem [shape: f32[2,18,18,4], index: 0, kind: input, shape index: {}]   ;;  %s12202_s1 = inlined_call_operand.vmem [shape: f32[4,16,4], index: 1, kind: input, shape index: {}]   ;;  %s12203_s2 = inlined_call_operand.vmem [shape: f32[1,4], index: 2, kind: input, shape index: {}]   ;;  %s12204_s3 = inlined_call_operand.vmem [shape: f32[2,32,32,4], index: 3, kind: output, shape index: {}]  }
   0x1   :  { %s9116_s14 = smov 0   ;;  %s9118_s15 = smov 0  }
   0x2   :  { %s9120_s16 = smov 0  }
   0x3 LB: > { %s22_s17 = sadd.s32 1, %s9077_s14  ;;  %s25_s18 = sadd.s32 1, %s9081_s15  ;;  %s9085_s16 = sphi %s9120_s16, %s13_s16   ;;  %s9081_s15 = sphi %s9118_s15, %s12261_s15   ;;  %s9077_s14 = sphi %s9116_s14, %s12260_s14   ;;  %s9073_s13 = sphi %s9114_s13, %s12259_s13   ;;  %s9069_s12 = sphi %s9112_s12, %s12258_s12  }
   0x4   : > { %p23_p0 = scmp.ge.s32.totalorder %s22_s17, 2  ;;  %p8608_p1 = scmp.ge.s32.totalorder %s9085_s16, 1 }
   0x5   : > { %p151_p2 = scmp.lt.s32.totalorder %s9085_s16, 5 }
   0x6   : > { %s12263_s17 = smov (%p23_p0, %s22_s17), 0  ;;  %s12265_s18 = smov (!%p23_p0, %s25_s18), %s9081_s15 }
   0x7   : > { %p152_p3 = pnand %p8608_p1, %p151_p2  ;;  %p27_p4 = scmp.ge.s32.totalorder %s12265_s18, 2 }
   0x9   : > { %s12267_s18 = smov (%p27_p4, %s12265_s18), 0  ;;  %155 = sbr.rel (%p152_p3) target bundleno = 847 (0x34f), region = 32 }
   0xe   : > { %p180_p5 = scmp.lt.s32.totalorder %s9073_s13, 1  ;;  %s8615_s19 = smul.u32 192, %s9069_s12  ;;  %v8734_v22 = vld [vmem:[%s12202_s1 + $0x18] sm:$0xff]  ;;  %v8733_v25 = vld [vmem:[%s12202_s1 + $0x10] sm:$0xff]  ;;  %v594_v26 = vld [vmem:[%s12202_s1 + $0x8] sm:$0xff]  ;;  %vm542_vm0 = vcmask 31744  }
   0xf   : > { %s9087_s25 = smov 4   ;;  %s9088_s26 = smov 8   ;;  %8889 = vmatprep.subr.mxu1 %v8734_v22  ;;  %8861 = vmatprep.subr.mxu0 %v594_v26  ;;  %v593_v28 = vld [vmem:[%s12202_s1] sm:$0xff]  ;;  %vm576_vm1 = vcmask 97280   ;;  %vm559_vm2 = vcmask 64512   ;;  %vm601_vm3 = vcmask 130048  }
  0x10   : > { %s12269_s13 = smov (!%p180_p5, %s9073_s13), 1  ;;  %8890 = vmatpush3.msra.mxu1 %v8734_v22  ;;  %8862 = vmatpush3.msra.mxu0 %v594_v26  ;;  %s9089_s8 = smov 12   ;;  %vm4407_vm4 = vcmask 1040384  }
  0x11   : > { %s8973_s20 = smul.u32 432, %s12269_s13  ;;  %8891 = vmatprep.subr.mxu1 %v8733_v25  ;;  %8863 = vmatprep.subr.mxu0 %v593_v28  ;;  %s8610_s29 = sshll.u32 %s9069_s12, 4 }
  0x12   : > { %8892 = vmatpush3.msra.mxu1 %v8733_v25  ;;  %8864 = vmatpush3.msra.mxu0 %v593_v28  ;;  %p10047_p6 = scmp.lt.s32.totalorder %s8610_s29, 31 }
  0x13   : > { %s184_s23 = scalar_lea.vmem %s12201_s0, %s8973_s20 }
  0x14   : > { %s9151_s24 = scalar_lea.vmem %s184_s23, %s8615_s19  ;;  %s12271_s29 = smov (!%p10047_p6, %s8610_s29), 31 }
  0x15   : > { %v9154_v0 = vld [vmem:[%s9151_s24 + $0x19] sm:$0xff]  ;;  %v9157_v1 = vld [vmem:[%s9151_s24 + $0x1] sm:$0xff]  ;;  %v9167_v3 = vld [vmem:[%s9151_s24 + $0x9] sm:$0xff]  ;;  %s8611_s12 = sshll.u32 %s12271_s29, 2 }
  0x16   : > { %370 = vrot.lane.b32.xlu1 %v9154_v0, %s9087_s25  ;;  %366 = vrot.lane.b32.xlu0 %v9157_v1, %s9087_s25  ;;  %v9164_v2 = vld [vmem:[%s9151_s24 + $0x21] sm:$0xff]  ;;  %v9174_v4 = vld [vmem:[%s9151_s24 + $0x39] sm:$0xff] }
  0x17   : > { %v9177_v5 = vld [vmem:[%s9151_s24 + $0x31] sm:$0xff]  ;;  %v9187_v7 = vld [vmem:[%s9151_s24 + $0x49] sm:$0xff]  ;;  %v9197_v9 = vld [vmem:[%s9151_s24 + $0x61] sm:$0xff] }
  0x18   : > { %v9184_v6 = vld [vmem:[%s9151_s24 + $0x51] sm:$0xff]  ;;  %v9194_v8 = vld [vmem:[%s9151_s24 + $0x69] sm:$0xff]  ;;  %v9204_v10 = vld [vmem:[%s9151_s24 + $0x81] sm:$0xff] }
  0x19   : > { %v9207_v11 = vld [vmem:[%s9151_s24 + $0x79] sm:$0xff]  ;;  %v9217_v13 = vld [vmem:[%s9151_s24 + $0x91] sm:$0xff]  ;;  %v9227_v15 = vld [vmem:[%s9151_s24 + $0xa9] sm:$0xff] }
  0x1a   : > { %372 = vrot.lane.b32.xlu1 %v9164_v2, %s9087_s25  ;;  %368 = vrot.lane.b32.xlu0 %v9167_v3, %s9087_s25  ;;  %v9214_v12 = vld [vmem:[%s9151_s24 + $0x99] sm:$0xff]  ;;  %12228 = vst [vmem:[#allocation3_spill] sm:$0xff] %v9217_v13  ;;  %v9224_v14 = vld [vmem:[%s9151_s24 + $0xb1] sm:$0xff]  ;;  %12229 = vst [vmem:[#allocation4_spill] sm:$0xff] %v9227_v15 }
  0x1b   : > { %12227 = vst [vmem:[#allocation2_spill] sm:$0xff] %v9214_v12  ;;  %v9234_v16 = vld [vmem:[%s9151_s24 + $0x20] sm:$0xff]  ;;  %v9237_v17 = vld [vmem:[%s9151_s24 + $0x18] sm:$0xff]  ;;  %v9247_v19 = vld [vmem:[%s9151_s24 + $0x30] sm:$0xff] }
  0x1c   : > { %v9244_v18 = vld [vmem:[%s9151_s24 + $0x38] sm:$0xff]  ;;  %v9254_v20 = vld [vmem:[%s9151_s24 + $0x50] sm:$0xff]  ;;  %v9257_v21 = vld [vmem:[%s9151_s24 + $0x48] sm:$0xff] }
  0x1d   : > { %v231_v23 = vld [vmem:[%s9151_s24 + $0x2] sm:$0xff]  ;;  %v232_v27 = vld [vmem:[%s9151_s24 + $0xa] sm:$0xff]  ;;  %v9287_v29 = vld [vmem:[%s9151_s24 + $0x1a] sm:$0xff] }
  0x1e   : > { %376 = vrot.lane.b32.xlu1 %v9174_v4, %s9087_s25  ;;  %374 = vrot.lane.b32.xlu0 %v9177_v5, %s9087_s25  ;;  %v9268_v24 = vld [vmem:[%s9151_s24 + $0x60] sm:$0xff]  ;;  %v9309_v31 = vld [vmem:[%s9151_s24 + $0x32] sm:$0xff] }
  0x1f   : > { %v9294_v30 = vld [vmem:[%s9151_s24 + $0x22] sm:$0xff]  ;;  %v9316_v32 = vld [vmem:[%s9151_s24 + $0x3a] sm:$0xff]  ;;  %v9331_v33 = vld [vmem:[%s9151_s24 + $0x4a] sm:$0xff] }
  0x20   : > { %v9338_v34 = vld [vmem:[%s9151_s24 + $0x52] sm:$0xff]  ;;  %v9353_v35 = vld [vmem:[%s9151_s24 + $0x62] sm:$0xff]  ;;  %v9363_v37 = vld [vmem:[%s9151_s24 + $0x6a] sm:$0xff] }
  0x21   : > { %v9360_v36 = vld [vmem:[%s9151_s24 + $0x68] sm:$0xff]  ;;  %v9386_v40 = vld [vmem:[%s9151_s24 + $0x78] sm:$0xff]  ;;  %v9400_v44 = vld [vmem:[%s9151_s24 + $0x80] sm:$0xff] }
  0x22   : > { %380 = vrot.lane.b32.xlu1 %v9184_v6, %s9087_s25  ;;  %378 = vrot.lane.b32.xlu0 %v9187_v7, %s9087_s25  ;;  %v9389_v41 = vld [vmem:[%s9151_s24 + $0x7a] sm:$0xff]  ;;  %v9403_v45 = vld [vmem:[%s9151_s24 + $0x82] sm:$0xff] }
  0x23   : > { %12230 = vst [vmem:[#allocation5_spill] sm:$0xff] %v9403_v45  ;;  %v9438_v54 = vld [vmem:[%s9151_s24 + $0x90] sm:$0xff]  ;;  %v9452_v58 = vld [vmem:[%s9151_s24 + $0x9a] sm:$0xff] }
  0x24   : > { %12231 = vst [vmem:[#allocation6_spill] sm:$0xff] %v9438_v54  ;;  %v9441_v55 = vld [vmem:[%s9151_s24 + $0x92] sm:$0xff]  ;;  %12235 = vst [vmem:[#allocation10_spill] sm:$0xff] %v9452_v58 }
  0x25   : > { %12232 = vst [vmem:[#allocation7_spill] sm:$0xff] %v9441_v55  ;;  %v9459_v61 = vld [vmem:[%s9151_s24 + $0x98] sm:$0xff] }
  0x26   : > { %384 = vrot.lane.b32.xlu1 %v9194_v8, %s9087_s25  ;;  %382 = vrot.lane.b32.xlu0 %v9197_v9, %s9087_s25  ;;  %12238 = vst [vmem:[#allocation13_spill] sm:$0xff] %v9459_v61 }
  0x2a   : > { %388 = vrot.lane.b32.xlu1 %v9204_v10, %s9087_s25  ;;  %386 = vrot.lane.b32.xlu0 %v9207_v11, %s9087_s25 }
  0x2e   : > { %392 = vrot.lane.b32.xlu1 %v9214_v12, %s9087_s25  ;;  %390 = vrot.lane.b32.xlu0 %v9217_v13, %s9087_s25 }
  0x32   : > { %396 = vrot.lane.b32.xlu1 %v9224_v14, %s9087_s25  ;;  %394 = vrot.lane.b32.xlu0 %v9227_v15, %s9087_s25 }
  0x36   : > { %432 = vrot.lane.b32.xlu1 %v9234_v16, %s9088_s26  ;;  %430 = vrot.lane.b32.xlu0 %v9237_v17, %s9088_s26 }
  0x3a   : > { %436 = vrot.lane.b32.xlu1 %v9244_v18, %s9088_s26  ;;  %434 = vrot.lane.b32.xlu0 %v9247_v19, %s9088_s26 }
  0x3e   : > { %440 = vrot.lane.b32.xlu1 %v9254_v20, %s9088_s26  ;;  %438 = vrot.lane.b32.xlu0 %v9257_v21, %s9088_s26 }
  0x42   : > { %811 = vrot.lane.b32.xlu1 %v231_v23, %s9087_s25  ;;  %442 = vrot.lane.b32.xlu0 %v9268_v24, %s9088_s26 }
  0x46   : > { %859 = vrot.lane.b32.xlu1 %v9154_v0, %s9088_s26  ;;  %813 = vrot.lane.b32.xlu0 %v232_v27, %s9087_s25  ;;  %v9486_v27 = vld [vmem:[%s9151_s24 + $0xaa] sm:$0xff] }
  0x47   : > { %12239 = vst [vmem:[#allocation14_spill] sm:$0xff] %v9486_v27 }
  0x4a   : > { %923 = vrot.lane.b32.xlu1 %v9287_v29, %s9089_s8  ;;  %861 = vrot.lane.b32.xlu0 %v9164_v2, %s9088_s26 }
  0x4e   : > { %494 = vrot.lane.b32.xlu1 %v9154_v0, %s9089_s8  ;;  %925 = vrot.lane.b32.xlu0 %v9294_v30, %s9089_s8 }
  0x52   : > { %496 = vrot.lane.b32.xlu1 %v9164_v2, %s9089_s8  ;;  %815 = vrot.lane.b32.xlu0 %v9287_v29, %s9087_s25 }
  0x56   : > { %863 = vrot.lane.b32.xlu1 %v9177_v5, %s9088_s26  ;;  %817 = vrot.lane.b32.xlu0 %v9294_v30, %s9087_s25 }
  0x5a   : > { %927 = vrot.lane.b32.xlu1 %v9309_v31, %s9089_s8  ;;  %865 = vrot.lane.b32.xlu0 %v9174_v4, %s9088_s26 }
  0x5e   : > { %498 = vrot.lane.b32.xlu1 %v9177_v5, %s9089_s8  ;;  %929 = vrot.lane.b32.xlu0 %v9316_v32, %s9089_s8 }
  0x62   : > { %500 = vrot.lane.b32.xlu1 %v9174_v4, %s9089_s8  ;;  %819 = vrot.lane.b32.xlu0 %v9309_v31, %s9087_s25 }
  0x66   : > { %867 = vrot.lane.b32.xlu1 %v9187_v7, %s9088_s26  ;;  %821 = vrot.lane.b32.xlu0 %v9316_v32, %s9087_s25 }
  0x6a   : > { %931 = vrot.lane.b32.xlu1 %v9331_v33, %s9089_s8  ;;  %869 = vrot.lane.b32.xlu0 %v9184_v6, %s9088_s26 }
  0x6e   : > { %502 = vrot.lane.b32.xlu1 %v9187_v7, %s9089_s8  ;;  %933 = vrot.lane.b32.xlu0 %v9338_v34, %s9089_s8 }
  0x72   : > { %504 = vrot.lane.b32.xlu1 %v9184_v6, %s9089_s8  ;;  %823 = vrot.lane.b32.xlu0 %v9331_v33, %s9087_s25 }
  0x76   : > { %871 = vrot.lane.b32.xlu1 %v9197_v9, %s9088_s26  ;;  %825 = vrot.lane.b32.xlu0 %v9338_v34, %s9087_s25 }
  0x7a   : > { %935 = vrot.lane.b32.xlu1 %v9353_v35, %s9089_s8  ;;  %873 = vrot.lane.b32.xlu0 %v9194_v8, %s9088_s26 }
  0x7e   : > { %444 = vrot.lane.b32.xlu1 %v9360_v36, %s9088_s26  ;;  %937 = vrot.lane.b32.xlu0 %v9363_v37, %s9089_s8 }
  0x82   : > { %827 = vrot.lane.b32.xlu1 %v9353_v35, %s9087_s25  ;;  %506 = vrot.lane.b32.xlu0 %v9197_v9, %s9089_s8 }
  0x86   : > { %829 = vrot.lane.b32.xlu1 %v9363_v37, %s9087_s25  ;;  %508 = vrot.lane.b32.xlu0 %v9194_v8, %s9089_s8 }
  0x88   : > { %v9377_v38 = vpop.permute.xlu1 %370  ;;  %v9379_v39 = vpop.permute.xlu0 %366 }
  0x8a   : > { %877 = vrot.lane.b32.xlu1 %v9204_v10, %s9088_s26  ;;  %875 = vrot.lane.b32.xlu0 %v9207_v11, %s9088_s26 }
  0x8c   : > { %v9391_v42 = vpop.permute.xlu1 %372  ;;  %v9393_v43 = vpop.permute.xlu0 %368 }
  0x8e   : > { %446 = vrot.lane.b32.xlu1 %v9386_v40, %s9088_s26  ;;  %939 = vrot.lane.b32.xlu0 %v9389_v41, %s9089_s8 }
  0x90   : > { %v9405_v46 = vpop.permute.xlu1 %376  ;;  %v9407_v47 = vpop.permute.xlu0 %374 }
  0x92   : > { %448 = vrot.lane.b32.xlu1 %v9400_v44, %s9088_s26  ;;  %941 = vrot.lane.b32.xlu0 %v9403_v45, %s9089_s8 }
  0x94   : > { %v9413_v48 = vpop.permute.xlu1 %380  ;;  %v9415_v49 = vpop.permute.xlu0 %378 }
  0x96   : > { %831 = vrot.lane.b32.xlu1 %v9389_v41, %s9087_s25  ;;  %510 = vrot.lane.b32.xlu0 %v9207_v11, %s9089_s8 }
  0x98   : > { %v9421_v50 = vpop.permute.xlu1 %384  ;;  %v9423_v51 = vpop.permute.xlu0 %382 }
  0x9a   : > { %833 = vrot.lane.b32.xlu1 %v9403_v45, %s9087_s25  ;;  %512 = vrot.lane.b32.xlu0 %v9204_v10, %s9089_s8 }
  0x9c   : > { %v9429_v52 = vpop.permute.xlu1 %388  ;;  %v9431_v53 = vpop.permute.xlu0 %386 }
  0x9e   : > { %881 = vrot.lane.b32.xlu1 %v9214_v12, %s9088_s26  ;;  %879 = vrot.lane.b32.xlu0 %v9217_v13, %s9088_s26 }
  0xa0   : > { %v9443_v56 = vpop.permute.xlu1 %392  ;;  %v9445_v57 = vpop.permute.xlu0 %390 }
  0xa1   : > { %12233 = vst [vmem:[#allocation8_spill] sm:$0xff] %v9443_v56  ;;  %12234 = vst [vmem:[#allocation9_spill] sm:$0xff] %v9445_v57  ;;  %v9501_v56 = vld [vmem:[%s9151_s24 + $0xb0] sm:$0xff] }
  0xa2   : > { %450 = vrot.lane.b32.xlu1 %v9438_v54, %s9088_s26  ;;  %943 = vrot.lane.b32.xlu0 %v9441_v55, %s9089_s8  ;;  %12241 = vst [vmem:[#allocation16_spill] sm:$0xff] %v9501_v56  ;;  %v199_v54 = vld [vmem:[%s9151_s24] sm:$0xff] }
  0xa4   : > { %v9454_v59 = vpop.permute.xlu1 %396  ;;  %v9456_v60 = vpop.permute.xlu0 %394 }
  0xa5   : > { %12236 = vst [vmem:[#allocation11_spill] sm:$0xff] %v9454_v59  ;;  %12237 = vst [vmem:[#allocation12_spill] sm:$0xff] %v9456_v60  ;;  %v9498_v60 = vld [vmem:[%s9151_s24 + $0xb2] sm:$0xff] }
  0xa6   : > { %452 = vrot.lane.b32.xlu1 %v9459_v61, %s9088_s26  ;;  %945 = vrot.lane.b32.xlu0 %v9452_v58, %s9089_s8 }
  0xa8   : > { %v433_v62 = vpop.permute.xlu1 %432  ;;  %v431_v63 = vpop.permute.xlu0 %430 }
  0xaa   : > { %835 = vrot.lane.b32.xlu1 %v9441_v55, %s9087_s25  ;;  %514 = vrot.lane.b32.xlu0 %v9217_v13, %s9089_s8 }
  0xac   : > { %v9469_v22 = vpop.permute.xlu1 %436  ;;  %v9471_v23 = vpop.permute.xlu0 %434 }
  0xae   : > { %837 = vrot.lane.b32.xlu1 %v9452_v58, %s9087_s25  ;;  %516 = vrot.lane.b32.xlu0 %v9214_v12, %s9089_s8  ;;  %v9491_v58 = vld [vmem:[%s9151_s24 + $0xa8] sm:$0xff] }
  0xaf   : > { %12240 = vst [vmem:[#allocation15_spill] sm:$0xff] %v9491_v58 }
  0xb0   : > { %v9477_v25 = vpop.permute.xlu1 %440  ;;  %v9479_v26 = vpop.permute.xlu0 %438 }
  0xb2   : > { %885 = vrot.lane.b32.xlu1 %v9224_v14, %s9088_s26  ;;  %883 = vrot.lane.b32.xlu0 %v9227_v15, %s9088_s26 }
  0xb4   : > { %v812_v28 = vpop.permute.xlu1 %811  ;;  %v9488_v59 = vpop.permute.xlu0 %442 }
  0xb6   : > { %454 = vrot.lane.b32.xlu1 %v9491_v58, %s9088_s26  ;;  %947 = vrot.lane.b32.xlu0 %v9486_v27, %s9089_s8  ;;  %v971_v58 = vsel %vm542_vm0, %v9157_v1, %v812_v28 }
  0xb8   : > { %v860_v55 = vpop.permute.xlu1 %859  ;;  %v814_v61 = vpop.permute.xlu0 %813 }
  0xb9   : > { %v987_v57 = vsel %vm559_vm2, %v971_v58, %v860_v55  ;;  %v972_v1 = vsel %vm542_vm0, %v9167_v3, %v814_v61  ;;  %v200_v55 = vld [vmem:[%s9151_s24 + $0x8] sm:$0xff] }
  0xba   : > { %456 = vrot.lane.b32.xlu1 %v9501_v56, %s9088_s26  ;;  %949 = vrot.lane.b32.xlu0 %v9498_v60, %s9089_s8  ;;  %v543_v56 = vsel %vm542_vm0, %v199_v54, %v9379_v39  ;;  %v544_v3 = vsel %vm542_vm0, %v200_v55, %v9393_v43  ;;  %v9551_v43 = vld [vmem:[%s9151_s24 + $0xc2] sm:$0xff]  ;;  %v9563_v55 = vld [vmem:[%s9151_s24 + $0xca] sm:$0xff] }
  0xbb   : > { %v560_v58 = vsel %vm559_vm2, %v543_v56, %v431_v63  ;;  %v561_v39 = vsel %vm559_vm2, %v544_v3, %v433_v62  ;;  %v545_v3 = vsel %vm542_vm0, %v9237_v17, %v9377_v38  ;;  %v546_v38 = vsel %vm542_vm0, %v9234_v16, %v9391_v42 }
  0xbc   : > { %v924_v45 = vpop.permute.xlu1 %923  ;;  %v862_v12 = vpop.permute.xlu0 %861 }
  0xbd   : > { %v1003_v13 = vsel %vm576_vm1, %v987_v57, %v924_v45  ;;  %v988_v45 = vsel %vm559_vm2, %v972_v1, %v862_v12  ;;  %v9535_v12 = vld [vmem:[%s9151_s24 + $0xc9] sm:$0xff] }
  0xbe   : > { %839 = vrot.lane.b32.xlu1 %v9486_v27, %s9087_s25  ;;  %518 = vrot.lane.b32.xlu0 %v9227_v15, %s9089_s8  ;;  %v9560_v1 = vld [vmem:[%s9151_s24 + $0xc8] sm:$0xff] }
  0xbf   : > { %8893 = vmatprep.mubr.msk.f32.mxu1 %vm601_vm3, %v1003_v13  ;;  %v9538_v13 = vld [vmem:[%s9151_s24 + $0xc1] sm:$0xff] }
  0xc0   : > { %v495_v57 = vpop.permute.xlu1 %494  ;;  %v926_v28 = vpop.permute.xlu0 %925 }
  0xc1   : > { %v1004_v27 = vsel %vm576_vm1, %v988_v45, %v926_v28  ;;  %v577_v15 = vsel %vm576_vm1, %v560_v58, %v495_v57 }
  0xc2   : > { %841 = vrot.lane.b32.xlu1 %v9498_v60, %s9087_s25  ;;  %520 = vrot.lane.b32.xlu0 %v9224_v14, %s9089_s8 }
  0xc3   : > { %8865 = vmatprep.mubr.msk.f32.mxu0 %vm601_vm3, %v577_v15  ;;  %8894 = vmatmul.mubr.msk.f32.vlgmr.msra.gmra.mxu1 %vm601_vm3, %v1004_v27  ;;  %v9548_v15 = vld [vmem:[%s9151_s24 + $0xc0] sm:$0xff] }
  0xc4   : > { %v497_v54 = vpop.permute.xlu1 %496  ;;  %v816_v56 = vpop.permute.xlu0 %815 }
  0xc5   : > { %v578_v61 = vsel %vm576_vm1, %v561_v39, %v497_v54  ;;  %v973_v62 = vsel %vm542_vm0, %v9154_v0, %v816_v56  ;;  %v562_v54 = vsel %vm559_vm2, %v545_v3, %v9471_v23  ;;  %v563_v23 = vsel %vm559_vm2, %v546_v38, %v9469_v22  ;;  %v8769_v22 = vld [vmem:[%s12202_s1 + $0x30] sm:$0xff] }
  0xc6   : > { %889 = vrot.lane.b32.xlu1 %v9535_v12, %s9088_s26  ;;  %887 = vrot.lane.b32.xlu0 %v9538_v13, %s9088_s26 }
  0xc7   : > { %8866 = vmatmul.mubr.msk.f32.vlgmr.msra.gmra.mxu0 %vm601_vm3, %v578_v61 }
  0xc8   : > { %v864_v63 = vpop.permute.xlu1 %863  ;;  %v818_v27 = vpop.permute.xlu0 %817 }
  0xc9   : > { %v989_v58 = vsel %vm559_vm2, %v973_v62, %v864_v63  ;;  %v974_v39 = vsel %vm542_vm0, %v9164_v2, %v818_v27 }
  0xca   : > { %458 = vrot.lane.b32.xlu1 %v9548_v15, %s9088_s26  ;;  %951 = vrot.lane.b32.xlu0 %v9551_v43, %s9089_s8 }
  0xcc   : > { %v928_v45 = vpop.permute.xlu1 %927  ;;  %v866_v57 = vpop.permute.xlu0 %865 }
  0xcd   : > { %v1005_v28 = vsel %vm576_vm1, %v989_v58, %v928_v45  ;;  %v990_v56 = vsel %vm559_vm2, %v974_v39, %v866_v57 }
  0xce   : > { %460 = vrot.lane.b32.xlu1 %v9560_v1, %s9088_s26  ;;  %953 = vrot.lane.b32.xlu0 %v9563_v55, %s9089_s8 }
  0xcf   : > { %8896 = vmatprep.mubr.msk.f32.mxu1 %vm601_vm3, %v1005_v28 }
  0xd0   : > { %v499_v61 = vpop.permute.xlu1 %498  ;;  %v930_v63 = vpop.permute.xlu0 %929 }
  0xd1   : > { %v579_v62 = vsel %vm576_vm1, %v562_v54, %v499_v61  ;;  %v1006_v58 = vsel %vm576_vm1, %v990_v56, %v930_v63  ;;  %v8752_v61 = vld [vmem:[%s12202_s1 + $0x28] sm:$0xff]  ;;  %v547_v63 = vsel %vm542_vm0, %v9247_v19, %v9407_v47 }
  0xd2   : > { %1635 = vrot.lane.b32.xlu1 %v9287_v29, %s9087_s25  ;;  %522 = vrot.lane.b32.xlu0 %v9538_v13, %s9089_s8  ;;  %v8770_v29 = vld [vmem:[%s12202_s1 + $0x38] sm:$0xff] }
  0xd3   : > { %8868 = vmatprep.mubr.msk.f32.mxu0 %vm601_vm3, %v579_v62  ;;  %8897 = vmatmul.mubr.msk.f32.gmra.mxu1 %vm601_vm3, %v1006_v58  ;;  %v564_v58 = vsel %vm559_vm2, %v547_v63, %v9479_v26  ;;  %v548_v26 = vsel %vm542_vm0, %v9244_v18, %v9405_v46 }
  0xd4   : > { %v501_v27 = vpop.permute.xlu1 %500  ;;  %v820_v45 = vpop.permute.xlu0 %819  ;;  %8945 = vmatprep.subr.mxu1 %v8770_v29  ;;  %8917 = vmatprep.subr.mxu0 %v8752_v61 }
  0xd5   : > { %v580_v57 = vsel %vm576_vm1, %v563_v23, %v501_v27  ;;  %8946 = vmatpush3.msra.mxu1 %v8770_v29  ;;  %8918 = vmatpush3.msra.mxu0 %v8752_v61  ;;  %v565_v29 = vsel %vm559_vm2, %v548_v26, %v9477_v25 }
  0xd6   : > { %1637 = vrot.lane.b32.xlu1 %v9294_v30, %s9087_s25  ;;  %524 = vrot.lane.b32.xlu0 %v9535_v12, %s9089_s8  ;;  %v975_v30 = vsel %vm542_vm0, %v9177_v5, %v820_v45  ;;  %v8751_v45 = vld [vmem:[%s12202_s1 + $0x20] sm:$0xff] }
  0xd7   : > { %8869 = vmatmul.mubr.msk.f32.gmra.mxu0 %vm601_vm3, %v580_v57  ;;  %8947 = vmatprep.subr.mxu1 %v8769_v22 }
  0xd8   : > { %v868_v42 = vpop.permute.xlu1 %867  ;;  %v822_v28 = vpop.permute.xlu0 %821  ;;  %8948 = vmatpush3.msra.mxu1 %v8769_v22  ;;  %8919 = vmatprep.subr.mxu0 %v8751_v45 }
  0xd9   : > { %v991_v3 = vsel %vm559_vm2, %v975_v30, %v868_v42  ;;  %v976_v62 = vsel %vm542_vm0, %v9174_v4, %v822_v28  ;;  %8920 = vmatpush3.msra.mxu0 %v8751_v45 }
  0xda   : > { %1215 = vrot.lane.b32.xlu1 %v9154_v0, %s9087_s25  ;;  %1683 = vrot.lane.b32.xlu0 %v9177_v5, %s9088_s26 }
  0xdc   : > { %v932_v39 = vpop.permute.xlu1 %931  ;;  %v870_v54 = vpop.permute.xlu0 %869 }
  0xdd   : > { %v1007_v56 = vsel %vm576_vm1, %v991_v3, %v932_v39  ;;  %v992_v38 = vsel %vm559_vm2, %v976_v62, %v870_v54 }
  0xde   : > { %1747 = vrot.lane.b32.xlu1 %v9309_v31, %s9089_s8  ;;  %1685 = vrot.lane.b32.xlu0 %v9174_v4, %s9088_s26 }
  0xdf   : > { %8899 = vmatprep.mubr.msk.f32.mxu1 %vm601_vm3, %v1007_v56 }
  0xe0   : > { %v503_v23 = vpop.permute.xlu1 %502  ;;  %v934_v27 = vpop.permute.xlu0 %933 }
  0xe1   : > { %v581_v47 = vsel %vm576_vm1, %v564_v58, %v503_v23  ;;  %v1008_v57 = vsel %vm576_vm1, %v992_v38, %v934_v27 }
  0xe2   : > { %1279 = vrot.lane.b32.xlu1 %v9247_v19, %s9088_s26  ;;  %1217 = vrot.lane.b32.xlu0 %v9164_v2, %s9087_s25 }
  0xe3   : > { %8871 = vmatprep.mubr.msk.f32.mxu0 %vm601_vm3, %v581_v47  ;;  %8900 = vmatmul.mubr.msk.f32.gmra.mxu1 %vm601_vm3, %v1008_v57  ;;  %v550_v47 = vsel %vm542_vm0, %v9254_v20, %v9413_v48 }
  0xe4   : > { %v505_v42 = vpop.permute.xlu1 %504  ;;  %v824_v28 = vpop.permute.xlu0 %823 }
  0xe5   : > { %v582_v22 = vsel %vm576_vm1, %v565_v29, %v505_v42  ;;  %v977_v25 = vsel %vm542_vm0, %v9187_v7, %v824_v28 }
  0xe6   : > { %1281 = vrot.lane.b32.xlu1 %v9244_v18, %s9088_s26  ;;  %1749 = vrot.lane.b32.xlu0 %v9316_v32, %s9089_s8 }
  0xe7   : > { %8872 = vmatmul.mubr.msk.f32.gmra.mxu0 %vm601_vm3, %v582_v22 }
  0xe8   : > { %v872_v46 = vpop.permute.xlu1 %871  ;;  %v826_v30 = vpop.permute.xlu0 %825 }
  0xe9   : > { %v993_v3 = vsel %vm559_vm2, %v977_v25, %v872_v46 }
  0xea   : > { %1639 = vrot.lane.b32.xlu1 %v9309_v31, %s9087_s25  ;;  %1343 = vrot.lane.b32.xlu0 %v9177_v5, %s9089_s8  ;;  %v978_v31 = vsel %vm542_vm0, %v9184_v6, %v826_v30 }
  0xec   : > { %v936_v39 = vpop.permute.xlu1 %935  ;;  %v874_v54 = vpop.permute.xlu0 %873 }
  0xed   : > { %v1009_v56 = vsel %vm576_vm1, %v993_v3, %v936_v39  ;;  %v994_v61 = vsel %vm559_vm2, %v978_v31, %v874_v54 }
  0xee   : > { %1641 = vrot.lane.b32.xlu1 %v9316_v32, %s9087_s25  ;;  %1345 = vrot.lane.b32.xlu0 %v9174_v4, %s9089_s8  ;;  %v549_v32 = vsel %vm542_vm0, %v9257_v21, %v9415_v49 }
  0xef   : > { %8902 = vmatprep.mubr.msk.f32.mxu1 %vm601_vm3, %v1009_v56  ;;  %v566_v38 = vsel %vm559_vm2, %v549_v32, %v9488_v59 }
  0xf0   : > { %v445_v63 = vpop.permute.xlu1 %444  ;;  %v938_v62 = vpop.permute.xlu0 %937 }
  0xf1   : > { %v1010_v58 = vsel %vm576_vm1, %v994_v61, %v938_v62  ;;  %v567_v49 = vsel %vm559_vm2, %v550_v47, %v445_v63 }
  0xf2   : > { %1219 = vrot.lane.b32.xlu1 %v9177_v5, %s9087_s25  ;;  %1687 = vrot.lane.b32.xlu0 %v9187_v7, %s9088_s26 }
  0xf3   : > { %8903 = vmatmul.mubr.msk.f32.gmra.mxu1 %vm601_vm3, %v1010_v58 }
  0xf4   : > { %v828_v23 = vpop.permute.xlu1 %827  ;;  %v507_v27 = vpop.permute.xlu0 %506 }
  0xf5   : > { %v583_v45 = vsel %vm576_vm1, %v566_v38, %v507_v27  ;;  %v979_v48 = vsel %vm542_vm0, %v9197_v9, %v828_v23 }
  0xf6   : > { %1751 = vrot.lane.b32.xlu1 %v9331_v33, %s9089_s8  ;;  %1689 = vrot.lane.b32.xlu0 %v9184_v6, %s9088_s26 }
  0xf7   : > { %8874 = vmatprep.mubr.msk.f32.mxu0 %vm601_vm3, %v583_v45 }
  0xf8   : > { %v830_v57 = vpop.permute.xlu1 %829  ;;  %v509_v59 = vpop.permute.xlu0 %508 }
  0xf9   : > { %v584_v26 = vsel %vm576_vm1, %v567_v49, %v509_v59 }
  0xfa   : > { %1283 = vrot.lane.b32.xlu1 %v9257_v21, %s9088_s26  ;;  %1221 = vrot.lane.b32.xlu0 %v9174_v4, %s9087_s25  ;;  %v980_v4 = vsel %vm542_vm0, %v9194_v8, %v830_v57 }
  0xfb   : > { %8875 = vmatmul.mubr.msk.f32.gmra.mxu0 %vm601_vm3, %v584_v26 }
  0xfc   : > { %v878_v29 = vpop.permute.xlu1 %877  ;;  %v876_v42 = vpop.permute.xlu0 %875 }
  0xfd   : > { %v995_v28 = vsel %vm559_vm2, %v979_v48, %v876_v42 }
  0xfe   : > { %1285 = vrot.lane.b32.xlu1 %v9254_v20, %s9088_s26  ;;  %1753 = vrot.lane.b32.xlu0 %v9338_v34, %s9089_s8  ;;  %v996_v20 = vsel %vm559_vm2, %v980_v4, %v878_v29 }
 0x100   : > { %v447_v22 = vpop.permute.xlu1 %446  ;;  %v940_v21 = vpop.permute.xlu0 %939 }
 0x101   : > { %v1011_v46 = vsel %vm576_vm1, %v995_v28, %v940_v21 }
 0x102   : > { %1643 = vrot.lane.b32.xlu1 %v9331_v33, %s9087_s25  ;;  %1347 = vrot.lane.b32.xlu0 %v9187_v7, %s9089_s8  ;;  %v551_v33 = vsel %vm542_vm0, %v9268_v24, %v9423_v51 }
 0x103   : > { %8905 = vmatprep.mubr.msk.f32.mxu1 %vm601_vm3, %v1011_v46  ;;  %v568_v39 = vsel %vm559_vm2, %v551_v33, %v447_v22 }
 0x104   : > { %v449_v30 = vpop.permute.xlu1 %448  ;;  %v942_v25 = vpop.permute.xlu0 %941 }
 0x105   : > { %v1012_v3 = vsel %vm576_vm1, %v996_v20, %v942_v25 }
 0x106   : > { %1645 = vrot.lane.b32.xlu1 %v9338_v34, %s9087_s25  ;;  %1349 = vrot.lane.b32.xlu0 %v9184_v6, %s9089_s8  ;;  %v552_v34 = vsel %vm542_vm0, %v9360_v36, %v9421_v50 }
 0x107   : > { %8906 = vmatmul.mubr.msk.f32.gmra.mxu1 %vm601_vm3, %v1012_v3  ;;  %v569_v51 = vsel %vm559_vm2, %v552_v34, %v449_v30  ;;  %v12243_v30 = vld [vmem:[#allocation2_spill] sm:$0xff] }
 0x108   : > { %v832_v54 = vpop.permute.xlu1 %831  ;;  %v511_v56 = vpop.permute.xlu0 %510 }
 0x109   : > { %v585_v31 = vsel %vm576_vm1, %v568_v39, %v511_v56  ;;  %v981_v50 = vsel %vm542_vm0, %v9207_v11, %v832_v54  ;;  %v12244_v56 = vld [vmem:[#allocation5_spill] sm:$0xff] }
 0x10a   : > { %1223 = vrot.lane.b32.xlu1 %v9187_v7, %s9087_s25  ;;  %1691 = vrot.lane.b32.xlu0 %v9197_v9, %s9088_s26 }
 0x10b   : > { %8877 = vmatprep.mubr.msk.f32.mxu0 %vm601_vm3, %v585_v31  ;;  %v12246_v31 = vld [vmem:[#allocation6_spill] sm:$0xff] }
 0x10c   : > { %v834_v61 = vpop.permute.xlu1 %833  ;;  %v513_v63 = vpop.permute.xlu0 %512 }
 0x10d   : > { %v586_v62 = vsel %vm576_vm1, %v569_v51, %v513_v63 }
 0x10e   : > { %1755 = vrot.lane.b32.xlu1 %v9353_v35, %s9089_s8  ;;  %1693 = vrot.lane.b32.xlu0 %v9194_v8, %s9088_s26 }
 0x10f   : > { %8878 = vmatmul.mubr.msk.f32.gmra.mxu0 %vm601_vm3, %v586_v62  ;;  %v12248_v62 = vld [vmem:[#allocation13_spill] sm:$0xff] }
 0x110   : > { %v882_v7 = vpop.permute.xlu1 %881  ;;  %v880_v58 = vpop.permute.xlu0 %879 }
 0x111   : > { %v997_v32 = vsel %vm559_vm2, %v981_v50, %v880_v58 }
 0x112   : > { %1287 = vrot.lane.b32.xlu1 %v9268_v24, %s9088_s26  ;;  %1225 = vrot.lane.b32.xlu0 %v9184_v6, %s9087_s25  ;;  %v982_v24 = vsel %vm542_vm0, %v9204_v10, %v834_v61 }
 0x113   : > { %v998_v6 = vsel %vm559_vm2, %v982_v24, %v882_v7 }
 0x114   : > { %v451_v38 = vpop.permute.xlu1 %450  ;;  %v944_v23 = vpop.permute.xlu0 %943 }
 0x115   : > { %v1013_v27 = vsel %vm576_vm1, %v997_v32, %v944_v23 }
 0x116   : > { %1289 = vrot.lane.b32.xlu1 %v9360_v36, %s9088_s26  ;;  %1757 = vrot.lane.b32.xlu0 %v9363_v37, %s9089_s8  ;;  %v553_v36 = vsel %vm542_vm0, %v9386_v40, %v9431_v53 }
 0x117   : > { %8908 = vmatprep.mubr.msk.f32.mxu1 %vm601_vm3, %v1013_v27  ;;  %v570_v57 = vsel %vm559_vm2, %v553_v36, %v451_v38  ;;  %v12249_v27 = vld [vmem:[#allocation4_spill] sm:$0xff]  ;;  %v12250_v36 = vld [vmem:[#allocation7_spill] sm:$0xff] }
 0x118   : > { %v453_v45 = vpop.permute.xlu1 %452  ;;  %v946_v47 = vpop.permute.xlu0 %945 }
 0x119   : > { %v1014_v49 = vsel %vm576_vm1, %v998_v6, %v946_v47 }
 0x11a   : > { %1647 = vrot.lane.b32.xlu1 %v9353_v35, %s9087_s25  ;;  %1351 = vrot.lane.b32.xlu0 %v9197_v9, %s9089_s8  ;;  %v554_v35 = vsel %vm542_vm0, %v9400_v44, %v9429_v52  ;;  %v12242_v52 = vld [vmem:[#allocation3_spill] sm:$0xff] }
 0x11b   : > { %8909 = vmatmul.mubr.msk.f32.gmra.mxu1 %vm601_vm3, %v1014_v49  ;;  %v571_v53 = vsel %vm559_vm2, %v554_v35, %v453_v45  ;;  %v12251_v35 = vld [vmem:[#allocation12_spill] sm:$0xff] }
 0x11c   : > { %v836_v59 = vpop.permute.xlu1 %835  ;;  %v515_v26 = vpop.permute.xlu0 %514 }
 0x11d   : > { %v587_v29 = vsel %vm576_vm1, %v570_v57, %v515_v26  ;;  %v983_v21 = vsel %vm542_vm0, %v12242_v52, %v836_v59 }
 0x11e   : > { %1649 = vrot.lane.b32.xlu1 %v9363_v37, %s9087_s25  ;;  %1353 = vrot.lane.b32.xlu0 %v9194_v8, %s9089_s8 }
 0x11f   : > { %8880 = vmatprep.mubr.msk.f32.mxu0 %vm601_vm3, %v587_v29 }
 0x120   : > { %v838_v42 = vpop.permute.xlu1 %837  ;;  %v517_v48 = vpop.permute.xlu0 %516 }
 0x121   : > { %v588_v28 = vsel %vm576_vm1, %v571_v53, %v517_v48  ;;  %v984_v25 = vsel %vm542_vm0, %v12243_v30, %v838_v42  ;;  %v12252_v53 = vld [vmem:[#allocation15_spill] sm:$0xff] }
 0x122   : > { %1227 = vrot.lane.b32.xlu1 %v9197_v9, %s9087_s25  ;;  %1695 = vrot.lane.b32.xlu0 %v9207_v11, %s9088_s26  ;;  %v557_v42 = vsel %vm542_vm0, %v12252_v53, %v12251_v35 }
 0x123   : > { %8881 = vmatmul.mubr.msk.f32.gmra.mxu0 %vm601_vm3, %v588_v28 }
 0x124   : > { %v886_v37 = vpop.permute.xlu1 %885  ;;  %v884_v22 = vpop.permute.xlu0 %883 }
 0x125   : > { %v999_v46 = vsel %vm559_vm2, %v983_v21, %v884_v22  ;;  %v1000_v3 = vsel %vm559_vm2, %v984_v25, %v886_v37  ;;  %v12253_v21 = vld [vmem:[#allocation10_spill] sm:$0xff] }
 0x126   : > { %1759 = vrot.lane.b32.xlu1 %v9389_v41, %s9089_s8  ;;  %1697 = vrot.lane.b32.xlu0 %v9204_v10, %s9088_s26 }
 0x128   : > { %v455_v4 = vpop.permute.xlu1 %454  ;;  %v948_v9 = vpop.permute.xlu0 %947 }
 0x129   : > { %v1015_v20 = vsel %vm576_vm1, %v999_v46, %v948_v9  ;;  %v12254_v46 = vld [vmem:[#allocation11_spill] sm:$0xff] }
 0x12a   : > { %1291 = vrot.lane.b32.xlu1 %v9386_v40, %s9088_s26  ;;  %1229 = vrot.lane.b32.xlu0 %v9194_v8, %s9087_s25  ;;  %v12245_v40 = vld [vmem:[#allocation9_spill] sm:$0xff] }
 0x12b   : > { %8911 = vmatprep.mubr.msk.f32.mxu1 %vm601_vm3, %v1015_v20  ;;  %v555_v8 = vsel %vm542_vm0, %v12246_v31, %v12245_v40 }
 0x12c   : > { %v457_v33 = vpop.permute.xlu1 %456  ;;  %v950_v39 = vpop.permute.xlu0 %949  ;;  %v572_v34 = vsel %vm559_vm2, %v555_v8, %v455_v4 }
 0x12d   : > { %v1016_v54 = vsel %vm576_vm1, %v1000_v3, %v950_v39 }
 0x12e   : > { %1293 = vrot.lane.b32.xlu1 %v9400_v44, %s9088_s26  ;;  %1761 = vrot.lane.b32.xlu0 %v12244_v56, %s9089_s8  ;;  %v12247_v44 = vld [vmem:[#allocation8_spill] sm:$0xff] }
 0x12f   : > { %8912 = vmatmul.mubr.msk.f32.gmra.mxu1 %vm601_vm3, %v1016_v54  ;;  %v556_v7 = vsel %vm542_vm0, %v12248_v62, %v12247_v44 }
 0x130   : > { %v840_v51 = vpop.permute.xlu1 %839  ;;  %v519_v61 = vpop.permute.xlu0 %518  ;;  %v573_v58 = vsel %vm559_vm2, %v556_v7, %v457_v33 }
 0x131   : > { %v589_v63 = vsel %vm576_vm1, %v572_v34, %v519_v61  ;;  %v985_v24 = vsel %vm542_vm0, %v12249_v27, %v840_v51  ;;  %v8695_v34 = vld [vmem:[%s9151_s24 + $0xb1] sm:$0xff] }
 0x132   : > { %1651 = vrot.lane.b32.xlu1 %v9389_v41, %s9087_s25  ;;  %1355 = vrot.lane.b32.xlu0 %v9207_v11, %s9089_s8 }
 0x133   : > { %8883 = vmatprep.mubr.msk.f32.mxu0 %vm601_vm3, %v589_v63  ;;  %v12256_v63 = vld [vmem:[#allocation14_spill] sm:$0xff] }
 0x134   : > { %v842_v50 = vpop.permute.xlu1 %841  ;;  %v521_v32 = vpop.permute.xlu0 %520 }
 0x135   : > { %v590_v38 = vsel %vm576_vm1, %v573_v58, %v521_v32 }
 0x136   : > { %1653 = vrot.lane.b32.xlu1 %v12244_v56, %s9087_s25  ;;  %1357 = vrot.lane.b32.xlu0 %v9204_v10, %s9089_s8 }
 0x137   : > { %8884 = vmatmul.mubr.msk.f32.gmra.mxu0 %vm601_vm3, %v590_v38 }
 0x138   : > { %v890_v41 = vpop.permute.xlu1 %889  ;;  %v888_v23 = vpop.permute.xlu0 %887 }
 0x139   : > { %v1001_v6 = vsel %vm559_vm2, %v985_v24, %v888_v23 }
 0x13a   : > { %1231 = vrot.lane.b32.xlu1 %v9207_v11, %s9087_s25  ;;  %1699 = vrot.lane.b32.xlu0 %v12242_v52, %s9088_s26  ;;  %v986_v11 = vsel %vm542_vm0, %v9224_v14, %v842_v50 }
 0x13b   : > { %v1002_v57 = vsel %vm559_vm2, %v986_v11, %v890_v41 }
 0x13c   : > { %v459_v45 = vpop.permute.xlu1 %458  ;;  %v952_v47 = vpop.permute.xlu0 %951 }
 0x13d   : > { %v1017_v49 = vsel %vm576_vm1, %v1001_v6, %v952_v47  ;;  %v574_v48 = vsel %vm559_vm2, %v557_v42, %v459_v45 }
 0x13e   : > { %1763 = vrot.lane.b32.xlu1 %v12250_v36, %s9089_s8  ;;  %1701 = vrot.lane.b32.xlu0 %v12243_v30, %s9088_s26 }
 0x13f   : > { %8914 = vmatprep.mubr.msk.f32.mxu1 %vm601_vm3, %v1017_v49 }
 0x140   : > { %v461_v59 = vpop.permute.xlu1 %460  ;;  %v954_v26 = vpop.permute.xlu0 %953 }
 0x141   : > { %v1018_v29 = vsel %vm576_vm1, %v1002_v57, %v954_v26 }
 0x142   : > { %1295 = vrot.lane.b32.xlu1 %v12246_v31, %s9088_s26  ;;  %1233 = vrot.lane.b32.xlu0 %v9204_v10, %s9087_s25  ;;  %v12255_v10 = vld [vmem:[#allocation16_spill] sm:$0xff] }
 0x143   : > { %8915 = vmatmul.mubr.msk.f32.gmra.mxu1 %vm601_vm3, %v1018_v29  ;;  %v558_v4 = vsel %vm542_vm0, %v12255_v10, %v12254_v46 }
 0x144   : > { %v1636_v28 = vpop.permute.xlu1 %1635  ;;  %v523_v37 = vpop.permute.xlu0 %522  ;;  %v575_v9 = vsel %vm559_vm2, %v558_v4, %v461_v59 }
 0x145   : > { %v591_v22 = vsel %vm576_vm1, %v574_v48, %v523_v37  ;;  %v1795_v54 = vsel %vm542_vm0, %v9154_v0, %v1636_v28 }
 0x146   : > { %1297 = vrot.lane.b32.xlu1 %v12248_v62, %s9088_s26  ;;  %1765 = vrot.lane.b32.xlu0 %v12253_v21, %s9089_s8 }
 0x147   : > { %8886 = vmatprep.mubr.msk.f32.mxu0 %vm601_vm3, %v591_v22 }
 0x148   : > { %v1638_v20 = vpop.permute.xlu1 %1637  ;;  %v525_v25 = vpop.permute.xlu0 %524 }
 0x149   : > { %v592_v3 = vsel %vm576_vm1, %v575_v9, %v525_v25  ;;  %v1796_v0 = vsel %vm542_vm0, %v9164_v2, %v1638_v20 }
 0x14a   : > { %1655 = vrot.lane.b32.xlu1 %v12250_v36, %s9087_s25  ;;  %1359 = vrot.lane.b32.xlu0 %v12242_v52, %s9089_s8 }
 0x14b   : > { %8887 = vmatmul.mubr.msk.f32.gmra.mxu0 %vm601_vm3, %v592_v3  ;;  %v9956_v3 = vld [vmem:[%s9151_s24 + $0xd9] sm:$0xff] }
 0x14c   : > { %v1216_v33 = vpop.permute.xlu1 %1215  ;;  %v1684_v39 = vpop.permute.xlu0 %1683 }
 0x14d   : > { %v1811_v56 = vsel %vm559_vm2, %v1795_v54, %v1684_v39  ;;  %v1391_v58 = vsel %vm542_vm0, %v9237_v17, %v1216_v33  ;;  %v9091_v33 = vmov 1983009808  }
 0x14e   : > { %1657 = vrot.lane.b32.xlu1 %v12253_v21, %s9087_s25  ;;  %1361 = vrot.lane.b32.xlu0 %v12243_v30, %s9089_s8  ;;  %v7291_v39 = vunpack.c.l.s4 %v9091_v33 }
 0x150   : > { %v1748_v40 = vpop.permute.xlu1 %1747  ;;  %v1686_v31 = vpop.permute.xlu0 %1685 }
 0x151   : > { %v1827_v8 = vsel %vm576_vm1, %v1811_v56, %v1748_v40  ;;  %v1812_v44 = vsel %vm559_vm2, %v1796_v0, %v1686_v31  ;;  %v9963_v31 = vld [vmem:[%s12203_s2] ss:$0 sm:$0xff] }
 0x152   : > { %1235 = vrot.lane.b32.xlu1 %v12242_v52, %s9087_s25  ;;  %1703 = vrot.lane.b32.xlu0 %v12249_v27, %s9088_s26 }
 0x153   : > { %8949 = vmatprep.mubr.msk.f32.mxu1 %vm601_vm3, %v1827_v8 }
 0x154   : > { %v1280_v51 = vpop.permute.xlu1 %1279  ;;  %v1218_v61 = vpop.permute.xlu0 %1217 }
 0x155   : > { %v1407_v50 = vsel %vm559_vm2, %v1391_v58, %v1280_v51  ;;  %v8714_v51 = vld [vmem:[%s9151_s24 + $0xda] sm:$0xff] }
 0x156   : > { %1767 = vrot.lane.b32.xlu1 %v12256_v63, %s9089_s8  ;;  %1705 = vrot.lane.b32.xlu0 %v8695_v34, %s9088_s26 }
 0x158   : > { %v1282_v62 = vpop.permute.xlu1 %1281  ;;  %v1750_v52 = vpop.permute.xlu0 %1749 }
 0x159   : > { %v1828_v7 = vsel %vm576_vm1, %v1812_v44, %v1750_v52  ;;  %v9021_v52 = vld [vmem:[%s9151_s24 + $0x51] sm:$0xff] }
 0x15a   : > { %1299 = vrot.lane.b32.xlu1 %v12252_v53, %s9088_s26  ;;  %1237 = vrot.lane.b32.xlu0 %v12243_v30, %s9087_s25  ;;  %v1392_v30 = vsel %vm542_vm0, %v9234_v16, %v1218_v61  ;;  %v9974_v61 = vld [vmem:[%s9151_s24 + $0xe1] sm:$0xff] }
 0x15b   : > { %8950 = vmatmul.mubr.msk.f32.vlgmr.msra.gmra.mxu1 %vm601_vm3, %v1828_v7  ;;  %v1408_v17 = vsel %vm559_vm2, %v1392_v30, %v1282_v62  ;;  %v9022_v7 = vld [vmem:[%s9151_s24 + $0x48] sm:$0xff] }
 0x15c   : > { %v1640_v2 = vpop.permute.xlu1 %1639  ;;  %v1344_v32 = vpop.permute.xlu0 %1343 }
 0x15d   : > { %v1423_v38 = vsel %vm576_vm1, %v1407_v50, %v1344_v32  ;;  %v1797_v16 = vsel %vm542_vm0, %v9177_v5, %v1640_v2  ;;  %v9019_v5 = vld [vmem:[%s9151_s24 + $0x39] sm:$0xff] }
 0x15e   : > { %1301 = vrot.lane.b32.xlu1 %v12255_v10, %s9088_s26  ;;  %1769 = vrot.lane.b32.xlu0 %v9498_v60, %s9089_s8  ;;  %v2059_v10 = vlaneseq }
 0x15f   : > { %8921 = vmatprep.mubr.msk.f32.mxu0 %vm601_vm3, %v1423_v38 }
 0x160   : > { %v1642_v41 = vpop.permute.xlu1 %1641  ;;  %v1346_v23 = vpop.permute.xlu0 %1345  ;;  %v2060_v20 = vshrl.u32 %v2059_v10, 7  ;;  %v8715_v10 = vld [vmem:[%s9151_s24 + $0xe2] sm:$0xff] }
 0x161   : > { %v1424_v24 = vsel %vm576_vm1, %v1408_v17, %v1346_v23  ;;  %v1798_v59 = vsel %vm542_vm0, %v9019_v5, %v1642_v41  ;;  %v9023_v23 = vld [vmem:[%s9151_s24 + $0x50] sm:$0xff] }
 0x162   : > { %1659 = vrot.lane.b32.xlu1 %v12256_v63, %s9087_s25  ;;  %1363 = vrot.lane.b32.xlu0 %v12249_v27, %s9089_s8  ;;  %v7292_v63 = vunpack.c.0.s8 %v7291_v39  ;;  %v9982_v38 = vsub.s32 0, %v2060_v20 }
 0x163   : > { %8922 = vmatmul.mubr.msk.f32.vlgmr.msra.gmra.mxu0 %vm601_vm3, %v1424_v24 }
 0x164   : > { %v1220_v6 = vpop.permute.xlu1 %1219  ;;  %v1688_v45 = vpop.permute.xlu0 %1687 }
 0x165   : > { %v1813_v47 = vsel %vm559_vm2, %v1797_v16, %v1688_v45  ;;  %v1393_v53 = vsel %vm542_vm0, %v9247_v19, %v1220_v6  ;;  %v9994_v45 = vsub.s32 %v7292_v63, %v2060_v20  ;;  %v8682_v16 = vld [vmem:[%s9151_s24 + $0xd8] sm:$0xff] }
 0x166   : > { %1661 = vrot.lane.b32.xlu1 %v9498_v60, %s9087_s25  ;;  %1365 = vrot.lane.b32.xlu0 %v8695_v34, %s9089_s8 }
 0x168   : > { %v1752_v49 = vpop.permute.xlu1 %1751  ;;  %v1690_v36 = vpop.permute.xlu0 %1689 }
 0x169   : > { %v1829_v11 = vsel %vm576_vm1, %v1813_v47, %v1752_v49  ;;  %v1814_v26 = vsel %vm559_vm2, %v1798_v59, %v1690_v36 }
 0x16a   : > { %1239 = vrot.lane.b32.xlu1 %v12249_v27, %s9087_s25  ;;  %1707 = vrot.lane.b32.xlu0 %v9538_v13, %s9088_s26 }
 0x16b   : > { %8952 = vmatprep.mubr.msk.f32.mxu1 %vm601_vm3, %v1829_v11 }
 0x16c   : > { %v1284_v60 = vpop.permute.xlu1 %1283  ;;  %v1222_v57 = vpop.permute.xlu0 %1221 }
 0x16d   : > { %v1409_v42 = vsel %vm559_vm2, %v1393_v53, %v1284_v60 }
 0x16e   : > { %1771 = vrot.lane.b32.xlu1 %v9551_v43, %s9089_s8  ;;  %1709 = vrot.lane.b32.xlu0 %v9535_v12, %s9088_s26 }
 0x170   : > { %v1286_v29 = vpop.permute.xlu1 %1285  ;;  %v1754_v27 = vpop.permute.xlu0 %1753 }
 0x171   : > { %v1830_v35 = vsel %vm576_vm1, %v1814_v26, %v1754_v27 }
 0x172   : > { %1303 = vrot.lane.b32.xlu1 %v9548_v15, %s9088_s26  ;;  %1241 = vrot.lane.b32.xlu0 %v9224_v14, %s9087_s25  ;;  %v1394_v14 = vsel %vm542_vm0, %v9244_v18, %v1222_v57 }
 0x173   : > { %8953 = vmatmul.mubr.msk.f32.gmra.mxu1 %vm601_vm3, %v1830_v35  ;;  %v1410_v19 = vsel %vm559_vm2, %v1394_v14, %v1286_v29 }
 0x174   : > { %v1644_v48 = vpop.permute.xlu1 %1643  ;;  %v1348_v28 = vpop.permute.xlu0 %1347 }
 0x175   : > { %v1425_v37 = vsel %vm576_vm1, %v1409_v42, %v1348_v28 }
 0x176   : > { %1305 = vrot.lane.b32.xlu1 %v9560_v1, %s9088_s26  ;;  %1773 = vrot.lane.b32.xlu0 %v9563_v55, %s9089_s8  ;;  %v9090_v1 = vmov 1966171168  }
 0x177   : > { %8924 = vmatprep.mubr.msk.f32.mxu0 %vm601_vm3, %v1425_v37  ;;  %v2057_v46 = vunpack.c.l.s4 %v9090_v1 }
 0x178   : > { %v1646_v15 = vpop.permute.xlu1 %1645  ;;  %v1350_v22 = vpop.permute.xlu0 %1349 }
 0x179   : > { %v1426_v21 = vsel %vm576_vm1, %v1410_v19, %v1350_v22  ;;  %v2058_v9 = vunpack.c.0.s8 %v2057_v46  ;;  %v8683_v19 = vld [vmem:[%s9151_s24 + $0xe0] sm:$0xff] }
 0x17a   : > { %1663 = vrot.lane.b32.xlu1 %v9551_v43, %s9087_s25  ;;  %1367 = vrot.lane.b32.xlu0 %v9538_v13, %s9089_s8  ;;  %v9020_v43 = vld [vmem:[%s9151_s24 + $0x49] sm:$0xff] }
 0x17b   : > { %8925 = vmatmul.mubr.msk.f32.gmra.mxu0 %vm601_vm3, %v1426_v21  ;;  %v1799_v25 = vsel %vm542_vm0, %v9020_v43, %v1644_v48  ;;  %v9969_v8 = vsub.s32 %v2058_v9, %v2060_v20 }
 0x17c   : > { %v1224_v18 = vpop.permute.xlu1 %1223  ;;  %v1692_v4 = vpop.permute.xlu0 %1691 }
 0x17d   : > { %v1815_v54 = vsel %vm559_vm2, %v1799_v25, %v1692_v4  ;;  %v1395_v58 = vsel %vm542_vm0, %v9022_v7, %v1224_v18 }
 0x17e   : > { %1665 = vrot.lane.b32.xlu1 %v9563_v55, %s9087_s25  ;;  %1369 = vrot.lane.b32.xlu0 %v9535_v12, %s9089_s8 }
 0x180   : > { %v1756_v56 = vpop.permute.xlu1 %1755  ;;  %v1694_v40 = vpop.permute.xlu0 %1693 }
 0x181   : > { %v1831_v55 = vsel %vm576_vm1, %v1815_v54, %v1756_v56 }
 0x182   : > { %1243 = vrot.lane.b32.xlu1 %v9538_v13, %s9087_s25  ;;  %1711 = vrot.lane.b32.xlu0 %v9956_v3, %s9088_s26  ;;  %v1800_v13 = vsel %vm542_vm0, %v9021_v52, %v1646_v15 }
 0x183   : > { %v8895_v34 = vpop.f32.mrf.mxu1  ;;  %8955 = vmatprep.mubr.msk.f32.mxu1 %vm601_vm3, %v1831_v55  ;;  %v1816_v17 = vsel %vm559_vm2, %v1800_v13, %v1694_v40 }
 0x184   : > { %v1142_v0 = vadd.f32 %v8895_v34, %v9963_v31  ;;  %v1288_v44 = vpop.permute.xlu1 %1287  ;;  %v1226_v62 = vpop.permute.xlu0 %1225 }
 0x185   : > { %v1136_v50 = vpop.f32.mrf.mxu1  ;;  %v9990_v41 = vsel %vm559_vm2, %v1395_v58, %v1288_v44  ;;  %v1396_v24 = vsel %vm542_vm0, %v9023_v23, %v1226_v62 }
 0x186   : > { %v3032_v2 = vcombine.high %v1142_v0, %v1142_v0  ;;  %v3039_v32 = vrot.slane %v1142_v0, %v9969_v8  ;;  %v1137_v30 = vadd.f32 %v9963_v31, %v1136_v50  ;;  %1775 = vrot.lane.b32.xlu1 %v8714_v51, %s9089_s8  ;;  %1713 = vrot.lane.b32.xlu0 %v9974_v61, %s9088_s26 }
 0x187   : > { %v8867_v6 = vpop.f32.mrf.mxu0 }
 0x188   : > { %v3046_v47 = vrot.slane %v3032_v2, %v9969_v8  ;;  %v3047_v49 = vcombine.high %v3039_v32, %v3039_v32  ;;  %v9999_v36 = vrot.slane %v3039_v32, %v9969_v8  ;;  %v2983_v11 = vcombine.high %v1137_v30, %v1137_v30  ;;  %v1290_v60 = vpop.permute.xlu1 %1289  ;;  %v1758_v57 = vpop.permute.xlu0 %1757 }
 0x189   : > { %v2990_v5 = vrot.slane %v1137_v30, %v9969_v8  ;;  %v722_v59 = vadd.f32 %v8867_v6, %v9963_v31  ;;  %v10004_v26 = vsel %vm559_vm2, %v1396_v24, %v1290_v60  ;;  %v1832_v29 = vsel %vm576_vm1, %v1816_v17, %v1758_v57  ;;  %v716_v0 = vpop.f32.mrf.mxu0  ;;  %v9024_v6 = vld [vmem:[%s9151_s24 + $0x61] sm:$0xff] }
 0x18a   : > { %v3048_v27 = vcombine.high %v3046_v47, %v3046_v47  ;;  %v10008_v35 = vrot.slane %v3046_v47, %v9969_v8  ;;  %v10011_v53 = vrot.slane %v3047_v49, %v9969_v8  ;;  %v3077_v42 = vcombine.high %v9999_v36, %v9999_v36  ;;  %1307 = vrot.lane.b32.xlu1 %v8682_v16, %s9088_s26 }
 0x18b   : > { %v3802_v48 = vrot.slane %v9999_v36, %v9982_v38  ;;  %v2997_v28 = vrot.slane %v2983_v11, %v9969_v8  ;;  %v2998_v37 = vcombine.high %v2990_v5, %v2990_v5  ;;  %v10021_v14 = vrot.slane %v2990_v5, %v9969_v8  ;;  %1245 = vrot.lane.b32.xlu0 %v9535_v12, %s9087_s25 }
 0x18c   : > { %v10027_v15 = vrot.slane %v3048_v27, %v9969_v8  ;;  %v3078_v22 = vcombine.high %v10008_v35, %v10008_v35  ;;  %v3079_v21 = vcombine.high %v10011_v53, %v10011_v53  ;;  %v3806_v1 = vrot.slane %v10011_v53, %v9982_v38  ;;  %8956 = vmatmul.mubr.msk.f32.gmra.mxu1 %vm601_vm3, %v1832_v29  ;;  %v1648_v46 = vpop.permute.xlu1 %1647  ;;  %v1352_v44 = vpop.permute.xlu0 %1351 }
 0x18d   : > { %v10038_v12 = vrot.slane %v3077_v42, %v9982_v38  ;;  %v3818_v18 = vrot.slane %v10008_v35, %v9982_v38  ;;  %v2999_v4 = vcombine.high %v2997_v28, %v2997_v28  ;;  %v10043_v9 = vrot.slane %v2997_v28, %v9969_v8 }
 0x18e   : > { %v3080_v20 = vcombine.high %v10027_v15, %v10027_v15  ;;  %v10054_v43 = vrot.slane %v3079_v21, %v9982_v38  ;;  %v3822_v25 = vrot.slane %v10027_v15, %v9982_v38  ;;  %v3826_v33 = vrot.slane %v3078_v22, %v9982_v38  ;;  %1309 = vrot.lane.b32.xlu1 %v8683_v19, %s9088_s26  ;;  %s8612_s26 = sshll.u32 %s12269_s13, 7 }
 0x18f   : > { %v10061_v39 = vrot.slane %v2998_v37, %v9969_v8  ;;  %v10064_v54 = vrot.slane %v2999_v4, %v9969_v8  ;;  %v3028_v56 = vcombine.high %v10021_v14, %v10021_v14  ;;  %v3029_v40 = vcombine.high %v10043_v9, %v10043_v9  ;;  %1777 = vrot.lane.b32.xlu0 %v8715_v10, %s9089_s8  ;;  %s10133_s13 = sadd.s32 %s8612_s26, %s8611_s12 }
 0x190   : > { %v3830_v55 = vrot.slane %v3080_v20, %v9982_v38  ;;  %v3770_v34 = vrot.slane %v10021_v14, %v9982_v38  ;;  %v3786_v51 = vrot.slane %v10043_v9, %v9982_v38  ;;  %v2104_v63 = vcombine.high %v722_v59, %v722_v59  ;;  %v1650_v30 = vpop.permute.xlu1 %1649  ;;  %v1354_v28 = vpop.permute.xlu0 %1353  ;;  %s8613_s30 = sshll.u32 %s10133_s13, 3 }
 0x191   : > { %v3030_v62 = vcombine.high %v10061_v39, %v10061_v39  ;;  %v3031_v52 = vcombine.high %v10064_v54, %v10064_v54  ;;  %v3774_v13 = vrot.slane %v10061_v39, %v9982_v38  ;;  %v10083_v7 = vrot.slane %v3028_v56, %v9982_v38  ;;  %s10162_s6 = scalar_lea.vmem %s12204_s3, %s8613_s30 }
 0x192   : > { %v3790_v58 = vrot.slane %v10064_v54, %v9982_v38  ;;  %v10094_v50 = vrot.slane %v3029_v40, %v9982_v38  ;;  %v2111_v2 = vrot.slane %v722_v59, %v9969_v8  ;;  %v2118_v32 = vrot.slane %v2104_v63, %v9969_v8  ;;  %1373 = vrot.lane.b32.xlu1 %v9974_v61, %s9089_s8  ;;  %v9025_v59 = vld [vmem:[%s9151_s24 + $0x69] sm:$0xff] }
 0x193   : > { %v10101_v17 = vrot.slane %v3030_v62, %v9982_v38  ;;  %v10104_v23 = vrot.slane %v3031_v52, %v9982_v38  ;;  %v717_v24 = vadd.f32 %v9963_v31, %v716_v0  ;;  %v10109_v16 = vsel %vm542_vm0, %v9024_v6, %v1648_v46  ;;  %1371 = vrot.lane.b32.xlu0 %v9956_v3, %s9089_s8  ;;  %v8898_v52 = vpop.f32.mrf.mxu1 }
 0x194   : > { %v2119_v47 = vcombine.high %v2111_v2, %v2111_v2  ;;  %v2120_v49 = vcombine.high %v2118_v32, %v2118_v32  ;;  %v2127_v61 = vrot.slane %v2111_v2, %v9969_v8  ;;  %v2134_v11 = vrot.slane %v2118_v32, %v9969_v8  ;;  %v1228_v53 = vpop.permute.xlu1 %1227 }
 0x195   : > { %v2055_v60 = vcombine.high %v717_v24, %v717_v24  ;;  %v2062_v57 = vrot.slane %v717_v24, %v9969_v8  ;;  %v1427_v5 = vsel %vm576_vm1, %v9990_v41, %v1352_v44  ;;  %v10122_v29 = vsel %vm542_vm0, %v9025_v59, %v1650_v30 }
 0x196   : > { %v2141_v3 = vrot.slane %v2119_v47, %v9969_v8  ;;  %v2148_v27 = vrot.slane %v2120_v49, %v9969_v8  ;;  %v2149_v35 = vcombine.high %v2127_v61, %v2127_v61  ;;  %v2150_v42 = vcombine.high %v2134_v11, %v2134_v11  ;;  %8927 = vmatprep.mubr.msk.f32.mxu0 %vm601_vm3, %v1427_v5  ;;  %v1146_v5 = vpop.f32.mrf.mxu1 }
 0x197   : > { %v4416_v37 = vsel %vm4407_vm4, %v2127_v61, %v3802_v48  ;;  %v4420_v41 = vsel %vm4407_vm4, %v2134_v11, %v3818_v18  ;;  %v2069_v19 = vrot.slane %v2055_v60, %v9969_v8  ;;  %v2070_v15 = vcombine.high %v2062_v57, %v2062_v57  ;;  %v8870_v59 = vpop.f32.mrf.mxu0 }
 0x198   : > { %v2151_v22 = vcombine.high %v2141_v3, %v2141_v3  ;;  %v2152_v21 = vcombine.high %v2148_v27, %v2148_v27  ;;  %v4417_v46 = vsel %vm4407_vm4, %v2141_v3, %v3806_v1  ;;  %v4418_v36 = vsel %vm4407_vm4, %v2149_v35, %v10038_v12  ;;  %v1760_v9 = vpop.permute.xlu1 %1759 }
 0x199   : > { %v4421_v48 = vsel %vm4407_vm4, %v2148_v27, %v3822_v25  ;;  %v4422_v10 = vsel %vm4407_vm4, %v2150_v42, %v3826_v33  ;;  %v7322_v18 = vcombine.low %v4416_v37, %v4417_v46  ;;  %v2071_v4 = vcombine.high %v2069_v19, %v2069_v19 }
 0x19a   : > { %v4419_v20 = vsel %vm4407_vm4, %v2151_v22, %v10054_v43  ;;  %v4423_v56 = vsel %vm4407_vm4, %v2152_v21, %v3830_v55  ;;  %v7339_v40 = vcombine.low %v4420_v41, %v4421_v48  ;;  %v2078_v63 = vrot.slane %v2062_v57, %v9969_v8  ;;  %v1696_v55 = vpop.permute.xlu0 %1695 }
 0x19b   : > { %v7323_v1 = vcombine.low %v4418_v36, %v4419_v20  ;;  %v7330_v0 = vrot.slane %v7322_v18, %v9994_v45  ;;  %v7340_v12 = vcombine.low %v4422_v10, %v4423_v56  ;;  %v2085_v25 = vrot.slane %v2069_v19, %v9969_v8 }
 0x19c   : > { %v7347_v33 = vrot.slane %v7339_v40, %v9994_v45  ;;  %v2092_v44 = vrot.slane %v2070_v15, %v9969_v8  ;;  %v2099_v62 = vrot.slane %v2071_v4, %v9969_v8  ;;  %v2100_v43 = vcombine.high %v2078_v63, %v2078_v63  ;;  %v1292_v56 = vpop.permute.xlu1 %1291 }
 0x19d   : > { %v7337_v2 = vrot.slane %v7323_v1, %v9994_v45  ;;  %v7354_v32 = vrot.slane %v7340_v12, %v9994_v45  ;;  %v2101_v30 = vcombine.high %v2085_v25, %v2085_v25  ;;  %v4408_v24 = vsel %vm4407_vm4, %v2078_v63, %v3770_v34 }
 0x19e   : > { %v2102_v6 = vcombine.high %v2092_v44, %v2092_v44  ;;  %v2103_v47 = vcombine.high %v2099_v62, %v2099_v62  ;;  %v4409_v49 = vsel %vm4407_vm4, %v2092_v44, %v3774_v13  ;;  %v4410_v61 = vsel %vm4407_vm4, %v2100_v43, %v10083_v7  ;;  %v10199_v42 = vpop.permute.xlu0 %1697 }
 0x19f   : > { %v7338_v14 = vcombine.low %v7330_v0, %v7337_v2  ;;  %v7355_v11 = vcombine.low %v7347_v33, %v7354_v32  ;;  %v4412_v34 = vsel %vm4407_vm4, %v2085_v25, %v3786_v51  ;;  %v4413_v60 = vsel %vm4407_vm4, %v2099_v62, %v3790_v58 }
 0x1a0   : > { %v4411_v39 = vsel %vm4407_vm4, %v2102_v6, %v10101_v17  ;;  %v4414_v13 = vsel %vm4407_vm4, %v2101_v30, %v10094_v50  ;;  %v4415_v7 = vsel %vm4407_vm4, %v2103_v47, %v10104_v23  ;;  %v7288_v57 = vcombine.low %v4408_v24, %v4409_v49  ;;  %v9026_v23 = vld [vmem:[%s9151_s24 + $0x60] sm:$0xff] }
 0x1a1   : > { %8442 = vst.msk [vmem:[%s10162_s6 + $0x10] sm:$0xff] %vm542_vm0, %v7338_v14  ;;  %8443 = vst.msk [vmem:[%s10162_s6 + $0x18] sm:$0xff] %vm542_vm0, %v7355_v11  ;;  %v7289_v54 = vcombine.low %v4410_v61, %v4411_v39  ;;  %v7305_v51 = vcombine.low %v4412_v34, %v4413_v60  ;;  %v7306_v58 = vcombine.low %v4414_v13, %v4415_v7  ;;  %v1294_v39 = vpop.permute.xlu1 %1293 }
 0x1a2   : > { %v1428_v17 = vsel %vm576_vm1, %v10004_v26, %v1354_v28  ;;  %v7296_v3 = vrot.slane %v7288_v57, %v9994_v45  ;;  %v1152_v50 = vadd.f32 %v8898_v52, %v9963_v31  ;;  %v10195_v27 = vsel %vm542_vm0, %v9026_v23, %v1228_v53  ;;  %v1230_v44 = vpop.permute.xlu0 %1229 }
 0x1a3   : > { %8928 = vmatmul.mubr.msk.f32.gmra.mxu0 %vm601_vm3, %v1428_v17  ;;  %v1817_v35 = vsel %vm559_vm2, %v10109_v16, %v1696_v55  ;;  %v7303_v37 = vrot.slane %v7289_v54, %v9994_v45  ;;  %v7313_v26 = vrot.slane %v7305_v51, %v9994_v45  ;;  %v7320_v28 = vrot.slane %v7306_v58, %v9994_v45  ;;  %v726_v17 = vpop.f32.mrf.mxu0 }
 0x1a4   : > { %v1147_v41 = vadd.f32 %v9963_v31, %v1146_v5  ;;  %v3130_v19 = vcombine.high %v1152_v50, %v1152_v50  ;;  %v3137_v15 = vrot.slane %v1152_v50, %v9969_v8  ;;  %v732_v22 = vadd.f32 %v8870_v59, %v9963_v31 }
 0x1a5   : > { %v1833_v21 = vsel %vm576_vm1, %v1817_v35, %v1760_v9  ;;  %v7304_v16 = vcombine.low %v7296_v3, %v7303_v37  ;;  %v7321_v46 = vcombine.low %v7313_v26, %v7320_v28 }
 0x1a6   : > { %v3081_v36 = vcombine.high %v1147_v41, %v1147_v41  ;;  %v3088_v48 = vrot.slane %v1147_v41, %v9969_v8  ;;  %8958 = vmatprep.mubr.msk.f32.mxu1 %vm601_vm3, %v1833_v21  ;;  %v3144_v10 = vrot.slane %v3130_v19, %v9969_v8  ;;  %v3145_v18 = vcombine.high %v3137_v15, %v3137_v15  ;;  %v1762_v59 = vpop.permute.xlu0 %1761 }
 0x1a7   : > { %v3153_v4 = vrot.slane %v3137_v15, %v9969_v8  ;;  %v2202_v20 = vcombine.high %v732_v22, %v732_v22  ;;  %8440 = vst.msk [vmem:[%s10162_s6] sm:$0xff] %vm542_vm0, %v7304_v16  ;;  %8441 = vst.msk [vmem:[%s10162_s6 + $0x8] sm:$0xff] %vm542_vm0, %v7321_v46  ;;  %v2209_v1 = vrot.slane %v732_v22, %v9969_v8  ;;  %v9027_v22 = vld [vmem:[%s9151_s24 + $0x68] sm:$0xff] }
 0x1a8   : > { %v3095_v40 = vrot.slane %v3081_v36, %v9969_v8  ;;  %v3096_v63 = vcombine.high %v3088_v48, %v3088_v48  ;;  %v10218_v53 = vrot.slane %v3088_v48, %v9969_v8  ;;  %v3146_v0 = vcombine.high %v3144_v10, %v3144_v10 }
 0x1a9   : > { %v3160_v12 = vrot.slane %v3144_v10, %v9969_v8  ;;  %v3167_v25 = vrot.slane %v3145_v18, %v9969_v8  ;;  %v3175_v33 = vcombine.high %v3153_v4, %v3153_v4  ;;  %v3866_v62 = vrot.slane %v3153_v4, %v9982_v38 }
 0x1aa   : > { %v3097_v43 = vcombine.high %v3095_v40, %v3095_v40  ;;  %v10225_v52 = vrot.slane %v3095_v40, %v9969_v8  ;;  %v10228_v55 = vrot.slane %v3096_v63, %v9969_v8  ;;  %v3174_v2 = vrot.slane %v3146_v0, %v9969_v8 }
 0x1ab   : > { %v3176_v32 = vcombine.high %v3160_v12, %v3160_v12  ;;  %v3177_v30 = vcombine.high %v3167_v25, %v3167_v25  ;;  %v3870_v24 = vrot.slane %v3167_v25, %v9982_v38  ;;  %v3874_v6 = vrot.slane %v3175_v33, %v9982_v38 }
 0x1ac   : > { %v3882_v47 = vrot.slane %v3160_v12, %v9982_v38  ;;  %v10235_v49 = vrot.slane %v3097_v43, %v9969_v8  ;;  %v3126_v61 = vcombine.high %v10218_v53, %v10218_v53  ;;  %v3178_v14 = vcombine.high %v3174_v2, %v3174_v2 }
 0x1ad   : > { %v3878_v11 = vrot.slane %v3177_v30, %v9982_v38  ;;  %v3886_v34 = vrot.slane %v3174_v2, %v9982_v38  ;;  %v3890_v60 = vrot.slane %v3176_v32, %v9982_v38  ;;  %v3127_v13 = vcombine.high %v10225_v52, %v10225_v52 }
 0x1ae   : > { %v3128_v7 = vcombine.high %v10228_v55, %v10228_v55  ;;  %v3129_v57 = vcombine.high %v10235_v49, %v10235_v49  ;;  %v3834_v5 = vrot.slane %v10218_v53, %v9982_v38  ;;  %v3894_v9 = vrot.slane %v3178_v14, %v9982_v38 }
 0x1af   : > { %v3838_v54 = vrot.slane %v10228_v55, %v9982_v38  ;;  %v10254_v51 = vrot.slane %v3126_v61, %v9982_v38  ;;  %v3850_v58 = vrot.slane %v10225_v52, %v9982_v38  ;;  %v3854_v50 = vrot.slane %v10235_v49, %v9982_v38  ;;  %v1356_v61 = vpop.permute.xlu0 %1355 }
 0x1b0   : > { %v10259_v3 = vrot.slane %v3128_v7, %v9982_v38  ;;  %v10264_v23 = vrot.slane %v3127_v13, %v9982_v38  ;;  %v10267_v35 = vrot.slane %v3129_v57, %v9982_v38  ;;  %v2216_v37 = vrot.slane %v2202_v20, %v9969_v8  ;;  %v8901_v13 = vpop.f32.mrf.mxu1 }
 0x1b1   : > { %v2217_v26 = vcombine.high %v2209_v1, %v2209_v1  ;;  %v2225_v28 = vrot.slane %v2209_v1, %v9969_v8  ;;  %v1818_v41 = vsel %vm559_vm2, %v10122_v29, %v10199_v42  ;;  %v727_v19 = vadd.f32 %v9963_v31, %v726_v17  ;;  %v1652_v29 = vpop.permute.xlu1 %1651 }
 0x1b2   : > { %v10277_v15 = vsel %vm559_vm2, %v10195_v27, %v1292_v56  ;;  %v1398_v21 = vsel %vm542_vm0, %v9027_v22, %v1230_v44  ;;  %v1834_v16 = vsel %vm576_vm1, %v1818_v41, %v1762_v59  ;;  %v2218_v46 = vcombine.high %v2216_v37, %v2216_v37 }
 0x1b3   : > { %v2232_v36 = vrot.slane %v2216_v37, %v9969_v8  ;;  %v2239_v48 = vrot.slane %v2217_v26, %v9969_v8  ;;  %v2247_v10 = vcombine.high %v2225_v28, %v2225_v28  ;;  %8959 = vmatmul.mubr.msk.f32.gmra.mxu1 %vm601_vm3, %v1834_v16  ;;  %v4432_v42 = vsel %vm4407_vm4, %v2225_v28, %v3866_v62 }
 0x1b4   : > { %v2153_v18 = vcombine.high %v727_v19, %v727_v19  ;;  %v2160_v27 = vrot.slane %v727_v19, %v9969_v8  ;;  %v10288_v4 = vsel %vm559_vm2, %v1398_v21, %v1294_v39  ;;  %v2246_v20 = vrot.slane %v2218_v46, %v9969_v8  ;;  %v8873_v46 = vpop.f32.mrf.mxu0 }
 0x1b5   : > { %v2248_v56 = vcombine.high %v2232_v36, %v2232_v36  ;;  %v2249_v40 = vcombine.high %v2239_v48, %v2239_v48  ;;  %v4433_v63 = vsel %vm4407_vm4, %v2239_v48, %v3870_v24  ;;  %v4434_v53 = vsel %vm4407_vm4, %v2247_v10, %v3874_v6  ;;  %v1654_v14 = vpop.permute.xlu1 %1653  ;;  %v10328_v48 = vpop.permute.xlu0 %1357 }
 0x1b6   : > { %v4436_v1 = vsel %vm4407_vm4, %v2232_v36, %v3882_v47  ;;  %v7458_v0 = vcombine.low %v4432_v42, %v4433_v63  ;;  %v2167_v12 = vrot.slane %v2153_v18, %v9969_v8  ;;  %v2250_v25 = vcombine.high %v2246_v20, %v2246_v20  ;;  %v9028_v42 = vld [vmem:[%s9151_s24 + $0x79] sm:$0xff] }
 0x1b7   : > { %v4435_v33 = vsel %vm4407_vm4, %v2249_v40, %v3878_v11  ;;  %v4437_v44 = vsel %vm4407_vm4, %v2246_v20, %v3886_v34  ;;  %v4438_v62 = vsel %vm4407_vm4, %v2248_v56, %v3890_v60  ;;  %v2168_v30 = vcombine.high %v2160_v27, %v2160_v27 }
 0x1b8   : > { %v7459_v43 = vcombine.low %v4434_v53, %v4435_v33  ;;  %v7466_v2 = vrot.slane %v7458_v0, %v9994_v45  ;;  %v7475_v32 = vcombine.low %v4436_v1, %v4437_v44  ;;  %v4439_v24 = vsel %vm4407_vm4, %v2250_v25, %v3894_v9  ;;  %v9029_v1 = vld [vmem:[%s9151_s24 + $0x81] sm:$0xff] }
 0x1b9   : > { %v2169_v6 = vcombine.high %v2167_v12, %v2167_v12  ;;  %v2176_v47 = vrot.slane %v2160_v27, %v9969_v8  ;;  %v2183_v49 = vrot.slane %v2167_v12, %v9969_v8  ;;  %v7476_v39 = vcombine.low %v4438_v62, %v4439_v24  ;;  %v10330_v10 = vpop.permute.xlu1 %1231 }
 0x1ba   : > { %v7473_v11 = vrot.slane %v7459_v43, %v9994_v45  ;;  %v7483_v34 = vrot.slane %v7475_v32, %v9994_v45  ;;  %v2190_v60 = vrot.slane %v2168_v30, %v9969_v8  ;;  %v10337_v18 = vsel %vm542_vm0, %v9028_v42, %v1652_v29 }
 0x1bb   : > { %v2197_v7 = vrot.slane %v2169_v6, %v9969_v8  ;;  %v2198_v57 = vcombine.high %v2176_v47, %v2176_v47  ;;  %v2199_v9 = vcombine.high %v2183_v49, %v2183_v49  ;;  %v4424_v17 = vsel %vm4407_vm4, %v2176_v47, %v3834_v5  ;;  %v1700_v47 = vpop.permute.xlu0 %1699 }
 0x1bc   : > { %v7474_v59 = vcombine.low %v7466_v2, %v7473_v11  ;;  %v7490_v37 = vrot.slane %v7476_v39, %v9994_v45  ;;  %v2200_v26 = vcombine.high %v2190_v60, %v2190_v60  ;;  %v4425_v28 = vsel %vm4407_vm4, %v2190_v60, %v3838_v54 }
 0x1bd   : > { %v2201_v41 = vcombine.high %v2197_v7, %v2197_v7  ;;  %v4426_v19 = vsel %vm4407_vm4, %v2198_v57, %v10254_v51  ;;  %v4428_v22 = vsel %vm4407_vm4, %v2183_v49, %v3850_v58  ;;  %v4429_v5 = vsel %vm4407_vm4, %v2197_v7, %v3854_v50  ;;  %v1156_v51 = vpop.f32.mrf.mxu1  ;;  %v10361_v49 = vpop.permute.xlu1 %1763 }
 0x1be   : > { %v7491_v21 = vcombine.low %v7483_v34, %v7490_v37  ;;  %8450 = vst.msk [vmem:[%s10162_s6 + $0x50] sm:$0xff] %vm542_vm0, %v7474_v59  ;;  %v4427_v55 = vsel %vm4407_vm4, %v2200_v26, %v10259_v3  ;;  %v4430_v54 = vsel %vm4407_vm4, %v2199_v9, %v10264_v23  ;;  %v7424_v16 = vcombine.low %v4424_v17, %v4425_v28 }
 0x1bf   : > { %v4431_v52 = vsel %vm4407_vm4, %v2201_v41, %v10267_v35  ;;  %v7425_v36 = vcombine.low %v4426_v19, %v4427_v55  ;;  %v7441_v58 = vcombine.low %v4428_v22, %v4429_v5  ;;  %v1162_v50 = vadd.f32 %v8901_v13, %v9963_v31 }
 0x1c0   : > { %8451 = vst.msk [vmem:[%s10162_s6 + $0x58] sm:$0xff] %vm542_vm0, %v7491_v21  ;;  %v7432_v3 = vrot.slane %v7424_v16, %v9994_v45  ;;  %v7442_v23 = vcombine.low %v4430_v54, %v4431_v52  ;;  %v1429_v35 = vsel %vm576_vm1, %v10277_v15, %v1356_v61  ;;  %v1157_v53 = vadd.f32 %v9963_v31, %v1156_v51 }
 0x1c1   : > { %v7439_v27 = vrot.slane %v7425_v36, %v9994_v45  ;;  %v7449_v20 = vrot.slane %v7441_v58, %v9994_v45  ;;  %v3228_v56 = vcombine.high %v1162_v50, %v1162_v50  ;;  %v3235_v40 = vrot.slane %v1162_v50, %v9969_v8  ;;  %8930 = vmatprep.mubr.msk.f32.mxu0 %vm601_vm3, %v1429_v35  ;;  %v1296_v52 = vpop.permute.xlu1 %1295 }
 0x1c2   : > { %v7456_v63 = vrot.slane %v7442_v23, %v9994_v45  ;;  %v742_v29 = vadd.f32 %v8873_v46, %v9963_v31  ;;  %v10350_v0 = vsel %vm542_vm0, %v9029_v1, %v1654_v14  ;;  %v3179_v62 = vcombine.high %v1157_v53, %v1157_v53  ;;  %v1702_v46 = vpop.permute.xlu0 %1701  ;;  %v736_v23 = vpop.f32.mrf.mxu0 }
 0x1c3   : > { %v7440_v15 = vcombine.low %v7432_v3, %v7439_v27  ;;  %v3242_v12 = vrot.slane %v3228_v56, %v9969_v8  ;;  %v3243_v25 = vcombine.high %v3235_v40, %v3235_v40  ;;  %v3251_v33 = vrot.slane %v3235_v40, %v9969_v8 }
 0x1c4   : > { %v7457_v44 = vcombine.low %v7449_v20, %v7456_v63  ;;  %v3186_v43 = vrot.slane %v1157_v53, %v9969_v8  ;;  %v2300_v2 = vcombine.high %v742_v29, %v742_v29  ;;  %v3193_v14 = vrot.slane %v3179_v62, %v9969_v8 }
 0x1c5   : > { %8448 = vst.msk [vmem:[%s10162_s6 + $0x40] sm:$0xff] %vm542_vm0, %v7440_v15  ;;  %v3244_v32 = vcombine.high %v3242_v12, %v3242_v12  ;;  %v10358_v30 = vrot.slane %v3242_v12, %v9969_v8  ;;  %v3265_v24 = vrot.slane %v3243_v25, %v9969_v8  ;;  %v3273_v6 = vcombine.high %v3251_v33, %v3251_v33 }
 0x1c6   : > { %8449 = vst.msk [vmem:[%s10162_s6 + $0x48] sm:$0xff] %vm542_vm0, %v7457_v44  ;;  %v3930_v61 = vrot.slane %v3251_v33, %v9982_v38  ;;  %v3194_v11 = vcombine.high %v3186_v43, %v3186_v43  ;;  %v10368_v39 = vrot.slane %v3186_v43, %v9969_v8  ;;  %v3195_v17 = vcombine.high %v3193_v14, %v3193_v14  ;;  %v9030_v44 = vld [vmem:[%s9151_s24 + $0x78] sm:$0xff] }
 0x1c7   : > { %v3272_v34 = vrot.slane %v3244_v32, %v9969_v8  ;;  %v3274_v60 = vcombine.high %v10358_v30, %v10358_v30  ;;  %v3275_v13 = vcombine.high %v3265_v24, %v3265_v24  ;;  %v3934_v7 = vrot.slane %v3265_v24, %v9982_v38  ;;  %v10436_v24 = vpop.permute.xlu1 %1297 }
 0x1c8   : > { %v3938_v57 = vrot.slane %v3273_v6, %v9982_v38  ;;  %v3946_v9 = vrot.slane %v10358_v30, %v9982_v38  ;;  %v10378_v59 = vrot.slane %v3193_v14, %v9969_v8  ;;  %v10384_v19 = vrot.slane %v3194_v11, %v9969_v8  ;;  %v1234_v30 = vpop.permute.xlu0 %1233 }
 0x1c9   : > { %v3276_v37 = vcombine.high %v3272_v34, %v3272_v34  ;;  %v3942_v26 = vrot.slane %v3275_v13, %v9982_v38  ;;  %v3950_v28 = vrot.slane %v3272_v34, %v9982_v38  ;;  %v3954_v41 = vrot.slane %v3274_v60, %v9982_v38 }
 0x1ca   : > { %v10387_v22 = vrot.slane %v3195_v17, %v9969_v8  ;;  %v3224_v5 = vcombine.high %v10368_v39, %v10368_v39  ;;  %v3225_v21 = vcombine.high %v10378_v59, %v10378_v59  ;;  %v3898_v54 = vrot.slane %v10368_v39, %v9982_v38 }
 0x1cb   : > { %v3958_v55 = vrot.slane %v3276_v37, %v9982_v38  ;;  %v3914_v16 = vrot.slane %v10378_v59, %v9982_v38  ;;  %v2307_v51 = vrot.slane %v742_v29, %v9969_v8  ;;  %v3226_v36 = vcombine.high %v10384_v19, %v10384_v19  ;;  %v8904_v37 = vpop.f32.mrf.mxu1 }
 0x1cc   : > { %v3227_v58 = vcombine.high %v10387_v22, %v10387_v22  ;;  %v3902_v50 = vrot.slane %v10384_v19, %v9982_v38  ;;  %v10406_v3 = vrot.slane %v3224_v5, %v9982_v38  ;;  %v3918_v42 = vrot.slane %v10387_v22, %v9982_v38 }
 0x1cd   : > { %v10411_v35 = vrot.slane %v3225_v21, %v9982_v38  ;;  %v2314_v27 = vrot.slane %v2300_v2, %v9969_v8  ;;  %v2315_v20 = vcombine.high %v2307_v51, %v2307_v51  ;;  %v10415_v56 = vrot.slane %v3226_v36, %v9982_v38 }
 0x1ce   : > { %v10418_v40 = vrot.slane %v3227_v58, %v9982_v38  ;;  %v2323_v63 = vrot.slane %v2307_v51, %v9969_v8  ;;  %v1430_v53 = vsel %vm576_vm1, %v10288_v4, %v10328_v48  ;;  %v737_v12 = vadd.f32 %v9963_v31, %v736_v23  ;;  %v10459_v23 = vpop.permute.xlu0 %1765 }
 0x1cf   : > { %v2316_v29 = vcombine.high %v2314_v27, %v2314_v27  ;;  %v2330_v1 = vrot.slane %v2314_v27, %v9969_v8  ;;  %v2337_v15 = vrot.slane %v2315_v20, %v9969_v8  ;;  %8931 = vmatmul.mubr.msk.f32.gmra.mxu0 %vm601_vm3, %v1430_v53  ;;  %v1399_v62 = vsel %vm542_vm0, %v9030_v44, %v10330_v10 }
 0x1d0   : > { %v2345_v25 = vcombine.high %v2323_v63, %v2323_v63  ;;  %v4448_v33 = vsel %vm4407_vm4, %v2323_v63, %v3930_v61  ;;  %v1819_v43 = vsel %vm559_vm2, %v10337_v18, %v1700_v47  ;;  %v2251_v11 = vcombine.high %v737_v12, %v737_v12 }
 0x1d1   : > { %v2344_v4 = vrot.slane %v2316_v29, %v9969_v8  ;;  %v2346_v48 = vcombine.high %v2330_v1, %v2330_v1  ;;  %v2347_v2 = vcombine.high %v2337_v15, %v2337_v15  ;;  %v4449_v32 = vsel %vm4407_vm4, %v2337_v15, %v3934_v7 }
 0x1d2   : > { %v4450_v6 = vsel %vm4407_vm4, %v2345_v25, %v3938_v57  ;;  %v4452_v61 = vsel %vm4407_vm4, %v2330_v1, %v3946_v9  ;;  %v7594_v14 = vcombine.low %v4448_v33, %v4449_v32  ;;  %v2258_v17 = vrot.slane %v737_v12, %v9969_v8 }
 0x1d3   : > { %v2348_v34 = vcombine.high %v2344_v4, %v2344_v4  ;;  %v4451_v10 = vsel %vm4407_vm4, %v2347_v2, %v3942_v26  ;;  %v4453_v18 = vsel %vm4407_vm4, %v2344_v4, %v3950_v28  ;;  %v4454_v47 = vsel %vm4407_vm4, %v2346_v48, %v3954_v41  ;;  %v9031_v48 = vld [vmem:[%s9151_s24 + $0x80] sm:$0xff]  ;;  %v1360_v2 = vpop.permute.xlu0 %1359 }
 0x1d4   : > { %v7595_v60 = vcombine.low %v4450_v6, %v4451_v10  ;;  %v7602_v13 = vrot.slane %v7594_v14, %v9994_v45  ;;  %v7611_v7 = vcombine.low %v4452_v61, %v4453_v18  ;;  %v2265_v9 = vrot.slane %v2251_v11, %v9969_v8 }
 0x1d5   : > { %v4455_v57 = vsel %vm4407_vm4, %v2348_v34, %v3958_v55  ;;  %v1835_v5 = vsel %vm576_vm1, %v1819_v43, %v10361_v49  ;;  %v10451_v26 = vsel %vm559_vm2, %v10350_v0, %v1702_v46  ;;  %v2266_v51 = vcombine.high %v2258_v17, %v2258_v17  ;;  %v10461_v0 = vpop.permute.xlu1 %1655  ;;  %v1166_v43 = vpop.f32.mrf.mxu1 }
 0x1d6   : > { %v7609_v28 = vrot.slane %v7595_v60, %v9994_v45  ;;  %v7612_v41 = vcombine.low %v4454_v47, %v4455_v57  ;;  %v7619_v21 = vrot.slane %v7611_v7, %v9994_v45  ;;  %8961 = vmatprep.mubr.msk.f32.mxu1 %vm601_vm3, %v1835_v5  ;;  %v2267_v36 = vcombine.high %v2265_v9, %v2265_v9  ;;  %v8876_v5 = vpop.f32.mrf.mxu0 }
 0x1d7   : > { %v2274_v55 = vrot.slane %v2258_v17, %v9969_v8  ;;  %v2281_v58 = vrot.slane %v2265_v9, %v9969_v8  ;;  %v1172_v49 = vadd.f32 %v8904_v37, %v9963_v31  ;;  %v2288_v20 = vrot.slane %v2266_v51, %v9969_v8 }
 0x1d8   : > { %v7610_v46 = vcombine.low %v7602_v13, %v7609_v28  ;;  %v7626_v27 = vrot.slane %v7612_v41, %v9994_v45  ;;  %v10466_v63 = vsel %vm559_vm2, %v1399_v62, %v1296_v52  ;;  %v2295_v53 = vrot.slane %v2267_v36, %v9969_v8  ;;  %v10541_v36 = vpop.permute.xlu0 %1361 }
 0x1d9   : > { %v2296_v29 = vcombine.high %v2274_v55, %v2274_v55  ;;  %v2297_v1 = vcombine.high %v2281_v58, %v2281_v58  ;;  %v4440_v15 = vsel %vm4407_vm4, %v2274_v55, %v3898_v54  ;;  %v2298_v25 = vcombine.high %v2288_v20, %v2288_v20 }
 0x1da   : > { %v7627_v12 = vcombine.low %v7619_v21, %v7626_v27  ;;  %8458 = vst.msk [vmem:[%s10162_s6 + $0x90] sm:$0xff] %vm542_vm0, %v7610_v46  ;;  %v4441_v52 = vsel %vm4407_vm4, %v2288_v20, %v3902_v50  ;;  %v4444_v33 = vsel %vm4407_vm4, %v2281_v58, %v3914_v16  ;;  %v2299_v44 = vcombine.high %v2295_v53, %v2295_v53 }
 0x1db   : > { %v4442_v39 = vsel %vm4407_vm4, %v2296_v29, %v10406_v3  ;;  %v4445_v54 = vsel %vm4407_vm4, %v2295_v53, %v3918_v42  ;;  %v4446_v19 = vsel %vm4407_vm4, %v2297_v1, %v10411_v35  ;;  %v4443_v50 = vsel %vm4407_vm4, %v2298_v25, %v10415_v56  ;;  %v10500_v35 = vpop.permute.xlu1 %1657 }
 0x1dc   : > { %8459 = vst.msk [vmem:[%s10162_s6 + $0x98] sm:$0xff] %vm542_vm0, %v7627_v12  ;;  %v7560_v59 = vcombine.low %v4440_v15, %v4441_v52  ;;  %v7577_v62 = vcombine.low %v4444_v33, %v4445_v54  ;;  %v3326_v16 = vcombine.high %v1172_v49, %v1172_v49  ;;  %v4447_v3 = vsel %vm4407_vm4, %v2299_v44, %v10418_v40  ;;  %v9032_v52 = vld [vmem:[%s9151_s24 + $0x91] sm:$0xff] }
 0x1dd   : > { %v7561_v4 = vcombine.low %v4442_v39, %v4443_v50  ;;  %v3333_v22 = vrot.slane %v1172_v49, %v9969_v8  ;;  %v1400_v42 = vsel %vm542_vm0, %v9031_v48, %v1234_v30  ;;  %v7578_v6 = vcombine.low %v4446_v19, %v4447_v3 }
 0x1de   : > { %v7568_v32 = vrot.slane %v7560_v59, %v9994_v45  ;;  %v7585_v56 = vrot.slane %v7577_v62, %v9994_v45  ;;  %v3340_v61 = vrot.slane %v3326_v16, %v9969_v8  ;;  %v1167_v34 = vadd.f32 %v9963_v31, %v1166_v43  ;;  %v1704_v43 = vpop.permute.xlu0 %1703 }
 0x1df   : > { %v7575_v14 = vrot.slane %v7561_v4, %v9994_v45  ;;  %v3341_v11 = vcombine.high %v3333_v22, %v3333_v22  ;;  %v10507_v40 = vrot.slane %v3333_v22, %v9969_v8  ;;  %v7592_v30 = vrot.slane %v7578_v6, %v9994_v45  ;;  %v10543_v55 = vpop.permute.xlu1 %1235 }
 0x1e0   : > { %v3342_v10 = vcombine.high %v3340_v61, %v3340_v61  ;;  %v10512_v18 = vrot.slane %v3340_v61, %v9969_v8  ;;  %v10516_v47 = vsel %vm559_vm2, %v1400_v42, %v10436_v24  ;;  %v3277_v51 = vcombine.high %v1167_v34, %v1167_v34  ;;  %v746_v42 = vpop.f32.mrf.mxu0 }
 0x1e1   : > { %v7576_v60 = vcombine.low %v7568_v32, %v7575_v14  ;;  %v10519_v13 = vrot.slane %v3341_v11, %v9969_v8  ;;  %v3371_v7 = vcombine.high %v10507_v40, %v10507_v40  ;;  %v3994_v17 = vrot.slane %v10507_v40, %v9982_v38 }
 0x1e2   : > { %v7593_v37 = vcombine.low %v7585_v56, %v7592_v30  ;;  %v10526_v57 = vrot.slane %v3342_v10, %v9969_v8  ;;  %v3372_v9 = vcombine.high %v10512_v18, %v10512_v18  ;;  %v4010_v24 = vrot.slane %v10512_v18, %v9982_v38 }
 0x1e3   : > { %8456 = vst.msk [vmem:[%s10162_s6 + $0x80] sm:$0xff] %vm542_vm0, %v7576_v60  ;;  %v3373_v28 = vcombine.high %v10519_v13, %v10519_v13  ;;  %v3998_v41 = vrot.slane %v10519_v13, %v9982_v38  ;;  %v10539_v21 = vrot.slane %v3371_v7, %v9982_v38  ;;  %v3284_v27 = vrot.slane %v1167_v34, %v9969_v8  ;;  %v10591_v3 = vpop.permute.xlu1 %1767  ;;  %v10620_v60 = vld [vmem:[%s12203_s2] ss:$0 sm:$0xff] }
 0x1e4   : > { %8457 = vst.msk [vmem:[%s10162_s6 + $0x88] sm:$0xff] %vm542_vm0, %v7593_v37  ;;  %v3374_v58 = vcombine.high %v10526_v57, %v10526_v57  ;;  %v4014_v49 = vrot.slane %v10526_v57, %v9982_v38  ;;  %v4018_v46 = vrot.slane %v3372_v9, %v9982_v38  ;;  %v3291_v53 = vrot.slane %v3277_v51, %v9969_v8  ;;  %v9034_v7 = vld [vmem:[%s9151_s24 + $0x99] sm:$0xff] }
 0x1e5   : > { %v4006_v20 = vrot.slane %v3373_v28, %v9982_v38  ;;  %v1836_v29 = vsel %vm576_vm1, %v10451_v26, %v10459_v23  ;;  %v752_v1 = vadd.f32 %v8876_v5, %v9963_v31  ;;  %v3292_v12 = vcombine.high %v3284_v27, %v3284_v27 }
 0x1e6   : > { %v4022_v15 = vrot.slane %v3374_v58, %v9982_v38  ;;  %v10561_v25 = vrot.slane %v3284_v27, %v9969_v8  ;;  %8962 = vmatmul.mubr.msk.f32.gmra.mxu1 %vm601_vm3, %v1836_v29  ;;  %v10567_v33 = vsel %vm542_vm0, %v9032_v52, %v10461_v0  ;;  %v3293_v44 = vcombine.high %v3291_v53, %v3291_v53 }
 0x1e7   : > { %v10570_v39 = vrot.slane %v3291_v53, %v9969_v8  ;;  %v2398_v26 = vcombine.high %v752_v1, %v752_v1  ;;  %v2405_v31 = vrot.slane %v752_v1, %v9969_v8  ;;  %v10574_v23 = vrot.slane %v3292_v12, %v9969_v8  ;;  %v10640_v29 = vpop.permute.xlu1 %1299 }
 0x1e8   : > { %v3322_v54 = vcombine.high %v10561_v25, %v10561_v25  ;;  %v3962_v19 = vrot.slane %v10561_v25, %v9982_v38  ;;  %v1431_v0 = vsel %vm576_vm1, %v10466_v63, %v1360_v2  ;;  %v10583_v50 = vrot.slane %v3293_v44, %v9969_v8 }
 0x1e9   : > { %v3323_v59 = vcombine.high %v10570_v39, %v10570_v39  ;;  %v3978_v62 = vrot.slane %v10570_v39, %v9982_v38  ;;  %v2412_v16 = vrot.slane %v2398_v26, %v9969_v8  ;;  %8933 = vmatprep.mubr.msk.f32.mxu0 %vm601_vm3, %v1431_v0  ;;  %v3324_v4 = vcombine.high %v10574_v23, %v10574_v23 }
 0x1ea   : > { %v3966_v63 = vrot.slane %v10574_v23, %v9982_v38  ;;  %v10598_v22 = vrot.slane %v3322_v54, %v9982_v38  ;;  %v2413_v48 = vcombine.high %v2405_v31, %v2405_v31  ;;  %v3325_v2 = vcombine.high %v10583_v50, %v10583_v50 }
 0x1eb   : > { %v3982_v32 = vrot.slane %v10583_v50, %v9982_v38  ;;  %v10605_v6 = vrot.slane %v3323_v59, %v9982_v38  ;;  %v2414_v56 = vcombine.high %v2412_v16, %v2412_v16  ;;  %v10608_v61 = vrot.slane %v3324_v4, %v9982_v38 }
 0x1ec   : > { %v2421_v14 = vrot.slane %v2405_v31, %v9969_v8  ;;  %v2428_v11 = vrot.slane %v2412_v16, %v9969_v8  ;;  %v2435_v34 = vrot.slane %v2413_v48, %v9969_v8  ;;  %v10614_v30 = vrot.slane %v3325_v2, %v9982_v38  ;;  %v8907_v31 = vpop.f32.mrf.mxu1 }
 0x1ed   : > { %v2442_v10 = vrot.slane %v2414_v56, %v9969_v8  ;;  %v747_v13 = vadd.f32 %v10620_v60, %v746_v42  ;;  %v10626_v37 = vsel %vm542_vm0, %v9034_v7, %v10500_v35  ;;  %v10638_v35 = vpop.permute.xlu0 %1705  ;;  %v1182_v2 = vadd.f32 %v10620_v60, %v8907_v31 }
 0x1ee   : > { %v2443_v57 = vcombine.high %v2421_v14, %v2421_v14  ;;  %v2444_v9 = vcombine.high %v2428_v11, %v2428_v11  ;;  %v2445_v5 = vcombine.high %v2435_v34, %v2435_v34  ;;  %v4464_v28 = vsel %vm4407_vm4, %v2421_v14, %v3994_v17  ;;  %v10669_v14 = vpop.permute.xlu1 %1301 }
 0x1ef   : > { %v2446_v51 = vcombine.high %v2442_v10, %v2442_v10  ;;  %v4465_v58 = vsel %vm4407_vm4, %v2435_v34, %v3998_v41  ;;  %v4468_v27 = vsel %vm4407_vm4, %v2428_v11, %v4010_v24  ;;  %v4469_v53 = vsel %vm4407_vm4, %v2442_v10, %v4014_v49 }
 0x1f0   : > { %v4466_v1 = vsel %vm4407_vm4, %v2443_v57, %v10539_v21  ;;  %v4467_v40 = vsel %vm4407_vm4, %v2445_v5, %v4006_v20  ;;  %v4470_v17 = vsel %vm4407_vm4, %v2444_v9, %v4018_v46  ;;  %v7730_v41 = vcombine.low %v4464_v28, %v4465_v58 }
 0x1f1   : > { %v4471_v12 = vsel %vm4407_vm4, %v2446_v51, %v4022_v15  ;;  %v7731_v18 = vcombine.low %v4466_v1, %v4467_v40  ;;  %v7747_v52 = vcombine.low %v4468_v27, %v4469_v53  ;;  %v2349_v24 = vcombine.high %v747_v13, %v747_v13  ;;  %v9035_v15 = vld [vmem:[%s9151_s24 + $0x90] sm:$0xff]  ;;  %v10667_v56 = vpop.permute.xlu0 %1237 }
 0x1f2   : > { %v7738_v49 = vrot.slane %v7730_v41, %v9994_v45  ;;  %v7748_v44 = vcombine.low %v4470_v17, %v4471_v12  ;;  %v2356_v26 = vrot.slane %v747_v13, %v9969_v8  ;;  %v1432_v21 = vsel %vm576_vm1, %v10516_v47, %v10541_v36  ;;  %v1660_v1 = vpop.permute.xlu1 %1659  ;;  %v8879_v41 = vpop.f32.mrf.mxu0 }
 0x1f3   : > { %v7745_v20 = vrot.slane %v7731_v18, %v9994_v45  ;;  %v7755_v46 = vrot.slane %v7747_v52, %v9994_v45  ;;  %v2363_v54 = vrot.slane %v2349_v24, %v9969_v8  ;;  %8934 = vmatmul.mubr.msk.f32.gmra.mxu0 %vm601_vm3, %v1432_v21  ;;  %v10659_v0 = vsel %vm542_vm0, %v9035_v15, %v10543_v55  ;;  %v1176_v21 = vpop.f32.mrf.mxu1 }
 0x1f4   : > { %v7762_v59 = vrot.slane %v7748_v44, %v9994_v45  ;;  %v2364_v16 = vcombine.high %v2356_v26, %v2356_v26  ;;  %v2372_v47 = vrot.slane %v2356_v26, %v9969_v8  ;;  %v1821_v36 = vsel %vm559_vm2, %v10567_v33, %v1704_v43 }
 0x1f5   : > { %v7746_v4 = vcombine.low %v7738_v49, %v7745_v20  ;;  %v2365_v48 = vcombine.high %v2363_v54, %v2363_v54  ;;  %v2379_v42 = vrot.slane %v2363_v54, %v9969_v8  ;;  %v3424_v7 = vcombine.high %v1182_v2, %v1182_v2 }
 0x1f6   : > { %v7763_v55 = vcombine.low %v7755_v46, %v7762_v59  ;;  %v2386_v11 = vrot.slane %v2364_v16, %v9969_v8  ;;  %v2394_v34 = vcombine.high %v2372_v47, %v2372_v47  ;;  %v4456_v33 = vsel %vm4407_vm4, %v2372_v47, %v3962_v19 }
 0x1f7   : > { %8466 = vst.msk [vmem:[%s10162_s6 + $0xd0] sm:$0xff] %vm542_vm0, %v7746_v4  ;;  %v2393_v43 = vrot.slane %v2365_v48, %v9969_v8  ;;  %v2395_v10 = vcombine.high %v2379_v42, %v2379_v42  ;;  %v4460_v13 = vsel %vm4407_vm4, %v2379_v42, %v3978_v62  ;;  %v3431_v9 = vrot.slane %v1182_v2, %v9969_v8  ;;  %v756_v4 = vpop.f32.mrf.mxu0 }
 0x1f8   : > { %8467 = vst.msk [vmem:[%s10162_s6 + $0xd8] sm:$0xff] %vm542_vm0, %v7763_v55  ;;  %v2396_v57 = vcombine.high %v2386_v11, %v2386_v11  ;;  %v4457_v25 = vsel %vm4407_vm4, %v2386_v11, %v3966_v63  ;;  %v4458_v19 = vsel %vm4407_vm4, %v2394_v34, %v10598_v22  ;;  %v3438_v63 = vrot.slane %v3424_v7, %v9969_v8  ;;  %v10752_v34 = vpop.permute.xlu1 %1661 }
 0x1f9   : > { %v2397_v5 = vcombine.high %v2393_v43, %v2393_v43  ;;  %v4461_v39 = vsel %vm4407_vm4, %v2393_v43, %v3982_v32  ;;  %v4462_v62 = vsel %vm4407_vm4, %v2395_v10, %v10605_v6  ;;  %v7696_v28 = vcombine.low %v4456_v33, %v4457_v25  ;;  %v1770_v32 = vpop.permute.xlu0 %1769 }
 0x1fa   : > { %v4459_v23 = vsel %vm4407_vm4, %v2396_v57, %v10608_v61  ;;  %v7713_v51 = vcombine.low %v4460_v13, %v4461_v39  ;;  %v3439_v58 = vcombine.high %v3431_v9, %v3431_v9  ;;  %v10705_v50 = vrot.slane %v3431_v9, %v9969_v8 }
 0x1fb   : > { %v4463_v22 = vsel %vm4407_vm4, %v2397_v5, %v10614_v30  ;;  %v7697_v27 = vcombine.low %v4458_v19, %v4459_v23  ;;  %v7704_v53 = vrot.slane %v7696_v28, %v9994_v45  ;;  %v3440_v17 = vcombine.high %v3438_v63, %v3438_v63 }
 0x1fc   : > { %v7714_v6 = vcombine.low %v4462_v62, %v4463_v22  ;;  %v7721_v40 = vrot.slane %v7713_v51, %v9994_v45  ;;  %v10709_v61 = vrot.slane %v3438_v63, %v9969_v8  ;;  %v10713_v30 = vrot.slane %v3439_v58, %v9969_v8 }
 0x1fd   : > { %v7711_v12 = vrot.slane %v7697_v27, %v9994_v45  ;;  %v3469_v18 = vcombine.high %v10705_v50, %v10705_v50  ;;  %v4058_v52 = vrot.slane %v10705_v50, %v9982_v38  ;;  %v10721_v49 = vrot.slane %v3440_v17, %v9969_v8  ;;  %v1364_v11 = vpop.permute.xlu0 %1363 }
 0x1fe   : > { %v7728_v24 = vrot.slane %v7714_v6, %v9994_v45  ;;  %v3470_v44 = vcombine.high %v10709_v61, %v10709_v61  ;;  %v4074_v26 = vrot.slane %v10709_v61, %v9982_v38  ;;  %v3471_v20 = vcombine.high %v10713_v30, %v10713_v30 }
 0x1ff   : > { %v7712_v31 = vcombine.low %v7704_v53, %v7711_v12  ;;  %v4062_v46 = vrot.slane %v10713_v30, %v9982_v38  ;;  %v10732_v54 = vrot.slane %v3469_v18, %v9982_v38  ;;  %v3472_v59 = vcombine.high %v10721_v49, %v10721_v49  ;;  %v1240_v53 = vpop.permute.xlu1 %1239 }
 0x200   : > { %v7729_v15 = vcombine.low %v7721_v40, %v7728_v24  ;;  %v4078_v16 = vrot.slane %v10721_v49, %v9982_v38  ;;  %v10739_v47 = vrot.slane %v3470_v44, %v9982_v38  ;;  %v10744_v48 = vrot.slane %v3471_v20, %v9982_v38 }
 0x201   : > { %8464 = vst.msk [vmem:[%s10162_s6 + $0xc0] sm:$0xff] %vm542_vm0, %v7712_v31  ;;  %v1837_v42 = vsel %vm576_vm1, %v1821_v36, %v10591_v3  ;;  %v1822_v2 = vsel %vm559_vm2, %v10626_v37, %v10638_v35  ;;  %v1177_v55 = vadd.f32 %v10620_v60, %v1176_v21  ;;  %v4086_v33 = vrot.slane %v3472_v59, %v9982_v38  ;;  %v9036_v36 = vld [vmem:[%s9151_s24 + $0x98] sm:$0xff]  ;;  %v1366_v27 = vpop.permute.xlu0 %1365 }
 0x202   : > { %8465 = vst.msk [vmem:[%s10162_s6 + $0xc8] sm:$0xff] %vm542_vm0, %v7729_v15  ;;  %8964 = vmatprep.mubr.msk.f32.mxu1 %vm601_vm3, %v1837_v42  ;;  %v1417_v3 = vsel %vm559_vm2, %v10659_v0, %v10640_v29  ;;  %v1402_v37 = vsel %vm542_vm0, %v9036_v36, %v10667_v56  ;;  %v762_v35 = vadd.f32 %v10620_v60, %v8879_v41  ;;  %v9037_v29 = vld [vmem:[%s9151_s24 + $0xa9] sm:$0xff] }
 0x203   : > { %v3375_v43 = vcombine.high %v1177_v55, %v1177_v55  ;;  %v3382_v10 = vrot.slane %v1177_v55, %v9969_v8  ;;  %v1418_v13 = vsel %vm559_vm2, %v1402_v37, %v10669_v14  ;;  %v1838_v7 = vsel %vm576_vm1, %v1822_v2, %v1770_v32  ;;  %v10832_v50 = vpop.permute.xlu1 %1771 }
 0x204   : > { %v2496_v57 = vcombine.high %v762_v35, %v762_v35  ;;  %v2503_v25 = vrot.slane %v762_v35, %v9969_v8  ;;  %v757_v19 = vadd.f32 %v10620_v60, %v756_v4  ;;  %8965 = vmatmul.mubr.msk.f32.gmra.mxu1 %vm601_vm3, %v1838_v7  ;;  %v10774_v0 = vsel %vm542_vm0, %v9037_v29, %v1660_v1  ;;  %v9038_v29 = vld [vmem:[%s9151_s24 + $0xb1] sm:$0xff] }
 0x205   : > { %v3389_v56 = vrot.slane %v3375_v43, %v9969_v8  ;;  %v3390_v9 = vcombine.high %v3382_v10, %v3382_v10  ;;  %v10778_v5 = vrot.slane %v3382_v10, %v9969_v8  ;;  %v1433_v14 = vsel %vm576_vm1, %v1417_v3, %v1364_v11  ;;  %v10830_v43 = vpop.permute.xlu0 %1707 }
 0x206   : > { %v2510_v39 = vrot.slane %v2496_v57, %v9969_v8  ;;  %v2511_v62 = vcombine.high %v2503_v25, %v2503_v25  ;;  %v2519_v28 = vrot.slane %v2503_v25, %v9969_v8  ;;  %v2447_v23 = vcombine.high %v757_v19, %v757_v19  ;;  %8936 = vmatprep.mubr.msk.f32.mxu0 %vm601_vm3, %v1433_v14 }
 0x207   : > { %v3391_v51 = vcombine.high %v3389_v56, %v3389_v56  ;;  %v10785_v63 = vrot.slane %v3389_v56, %v9969_v8  ;;  %v10788_v58 = vrot.slane %v3390_v9, %v9969_v8  ;;  %v3420_v22 = vcombine.high %v10778_v5, %v10778_v5 }
 0x208   : > { %v4026_v32 = vrot.slane %v10778_v5, %v9982_v38  ;;  %v2512_v1 = vcombine.high %v2510_v39, %v2510_v39  ;;  %v2526_v6 = vrot.slane %v2510_v39, %v9969_v8  ;;  %v2533_v40 = vrot.slane %v2511_v62, %v9969_v8 }
 0x209   : > { %v10797_v17 = vrot.slane %v3391_v51, %v9969_v8  ;;  %v3421_v41 = vcombine.high %v10785_v63, %v10785_v63  ;;  %v3422_v12 = vcombine.high %v10788_v58, %v10788_v58  ;;  %v4030_v18 = vrot.slane %v10788_v58, %v9982_v38  ;;  %v10863_v58 = vpop.permute.xlu1 %1303 }
 0x20a   : > { %v4034_v24 = vrot.slane %v3420_v22, %v9982_v38  ;;  %v4042_v44 = vrot.slane %v10785_v63, %v9982_v38  ;;  %v2540_v21 = vrot.slane %v2512_v1, %v9969_v8  ;;  %v2541_v31 = vcombine.high %v2519_v28, %v2519_v28  ;;  %v1710_v63 = vpop.permute.xlu0 %1709 }
 0x20b   : > { %v3423_v20 = vcombine.high %v10797_v17, %v10797_v17  ;;  %v4038_v15 = vrot.slane %v3422_v12, %v9982_v38  ;;  %v4046_v59 = vrot.slane %v10797_v17, %v9982_v38  ;;  %v4050_v4 = vrot.slane %v3421_v41, %v9982_v38 }
 0x20c   : > { %v2542_v42 = vcombine.high %v2526_v6, %v2526_v6  ;;  %v2543_v2 = vcombine.high %v2533_v40, %v2533_v40  ;;  %v2544_v55 = vcombine.high %v2540_v21, %v2540_v21  ;;  %v4480_v11 = vsel %vm4407_vm4, %v2519_v28, %v4058_v52 }
 0x20d   : > { %v4054_v3 = vrot.slane %v3423_v20, %v9982_v38  ;;  %v4481_v36 = vsel %vm4407_vm4, %v2533_v40, %v4062_v46  ;;  %v4482_v37 = vsel %vm4407_vm4, %v2541_v31, %v10732_v54  ;;  %v4484_v35 = vsel %vm4407_vm4, %v2526_v6, %v4074_v26 }
 0x20e   : > { %v4483_v52 = vsel %vm4407_vm4, %v2543_v2, %v10744_v48  ;;  %v4485_v30 = vsel %vm4407_vm4, %v2540_v21, %v4078_v16  ;;  %v4486_v46 = vsel %vm4407_vm4, %v2542_v42, %v10739_v47  ;;  %v4487_v54 = vsel %vm4407_vm4, %v2544_v55, %v4086_v33  ;;  %v8910_v48 = vpop.f32.mrf.mxu1 }
 0x20f   : > { %v7866_v61 = vcombine.low %v4480_v11, %v4481_v36  ;;  %v7867_v10 = vcombine.low %v4482_v37, %v4483_v52  ;;  %v7883_v26 = vcombine.low %v4484_v35, %v4485_v30  ;;  %v7884_v7 = vcombine.low %v4486_v46, %v4487_v54  ;;  %v1242_v30 = vpop.permute.xlu0 %1241 }
 0x210   : > { %v2454_v57 = vrot.slane %v757_v19, %v9969_v8  ;;  %v2461_v25 = vrot.slane %v2447_v23, %v9969_v8  ;;  %v10848_v49 = vsel %vm542_vm0, %v9038_v29, %v10752_v34  ;;  %v1434_v16 = vsel %vm576_vm1, %v1418_v13, %v1366_v27  ;;  %v9039_v23 = vld [vmem:[%s9151_s24 + $0xa8] sm:$0xff] }
 0x211   : > { %v7874_v47 = vrot.slane %v7866_v61, %v9994_v45  ;;  %v7881_v33 = vrot.slane %v7867_v10, %v9994_v45  ;;  %v7891_v56 = vrot.slane %v7883_v26, %v9994_v45  ;;  %v7898_v9 = vrot.slane %v7884_v7, %v9994_v45  ;;  %8937 = vmatmul.mubr.msk.f32.gmra.mxu0 %vm601_vm3, %v1434_v16  ;;  %v1186_v16 = vpop.f32.mrf.mxu1 }
 0x212   : > { %v2462_v19 = vcombine.high %v2454_v57, %v2454_v57  ;;  %v2463_v14 = vcombine.high %v2461_v25, %v2461_v25  ;;  %v2470_v34 = vrot.slane %v2454_v57, %v9969_v8  ;;  %v2477_v39 = vrot.slane %v2461_v25, %v9969_v8 }
 0x213   : > { %v7882_v13 = vcombine.low %v7874_v47, %v7881_v33  ;;  %v7899_v62 = vcombine.low %v7891_v56, %v7898_v9  ;;  %v1192_v28 = vadd.f32 %v10620_v60, %v8910_v48  ;;  %v10861_v51 = vsel %vm542_vm0, %v9039_v23, %v1240_v53 }
 0x214   : > { %v2484_v22 = vrot.slane %v2462_v19, %v9969_v8  ;;  %v2491_v27 = vrot.slane %v2463_v14, %v9969_v8  ;;  %v2492_v1 = vcombine.high %v2470_v34, %v2470_v34  ;;  %v2493_v6 = vcombine.high %v2477_v39, %v2477_v39 }
 0x215   : > { %8474 = vst.msk [vmem:[%s10162_s6 + $0x110] sm:$0xff] %vm542_vm0, %v7882_v13  ;;  %8475 = vst.msk [vmem:[%s10162_s6 + $0x118] sm:$0xff] %vm542_vm0, %v7899_v62  ;;  %v4472_v40 = vsel %vm4407_vm4, %v2470_v34, %v4026_v32  ;;  %v4476_v53 = vsel %vm4407_vm4, %v2477_v39, %v4042_v44  ;;  %v3522_v17 = vcombine.high %v1192_v28, %v1192_v28 }
 0x216   : > { %v3529_v41 = vrot.slane %v1192_v28, %v9969_v8  ;;  %v2494_v12 = vcombine.high %v2484_v22, %v2484_v22  ;;  %v2495_v21 = vcombine.high %v2491_v27, %v2491_v27  ;;  %v4473_v31 = vsel %vm4407_vm4, %v2484_v22, %v4030_v18  ;;  %v1774_v28 = vpop.permute.xlu0 %1773 }
 0x217   : > { %v4474_v20 = vsel %vm4407_vm4, %v2492_v1, %v4034_v24  ;;  %v4477_v42 = vsel %vm4407_vm4, %v2491_v27, %v4046_v59  ;;  %v4478_v2 = vsel %vm4407_vm4, %v2493_v6, %v4050_v4  ;;  %v7832_v55 = vcombine.low %v4472_v40, %v4473_v31  ;;  %v1306_v24 = vpop.permute.xlu1 %1305  ;;  %v9040_v6 = vld [vmem:[%s9151_s24 + $0xb0] sm:$0xff] }
 0x218   : > { %v3536_v5 = vrot.slane %v3522_v17, %v9969_v8  ;;  %v4475_v32 = vsel %vm4407_vm4, %v2494_v12, %v4038_v15  ;;  %v4479_v44 = vsel %vm4407_vm4, %v2495_v21, %v4054_v3  ;;  %v7849_v11 = vcombine.low %v4476_v53, %v4477_v42  ;;  %v8882_v3 = vpop.f32.mrf.mxu0  ;;  %v9041_v21 = vld [vmem:[%s9151_s24 + $0xc1] sm:$0xff] }
 0x219   : > { %v3537_v36 = vcombine.high %v3529_v41, %v3529_v41  ;;  %v7833_v37 = vcombine.low %v4474_v20, %v4475_v32  ;;  %v7840_v35 = vrot.slane %v7832_v55, %v9994_v45  ;;  %v7850_v52 = vcombine.low %v4478_v2, %v4479_v44 }
 0x21a   : > { %v3538_v18 = vcombine.high %v3536_v5, %v3536_v5  ;;  %v7857_v59 = vrot.slane %v7849_v11, %v9994_v45  ;;  %v10887_v4 = vrot.slane %v3529_v41, %v9969_v8  ;;  %v10890_v46 = vrot.slane %v3536_v5, %v9969_v8  ;;  %v766_v14 = vpop.f32.mrf.mxu0 }
 0x21b   : > { %v10893_v15 = vrot.slane %v3537_v36, %v9969_v8  ;;  %v7847_v54 = vrot.slane %v7833_v37, %v9994_v45  ;;  %v7864_v61 = vrot.slane %v7850_v52, %v9994_v45  ;;  %v1823_v26 = vsel %vm559_vm2, %v10774_v0, %v10830_v43  ;;  %v1664_v23 = vpop.permute.xlu1 %1663 }
 0x21c   : > { %v10898_v10 = vrot.slane %v3538_v18, %v9969_v8  ;;  %v3567_v7 = vcombine.high %v10887_v4, %v10887_v4  ;;  %v3568_v57 = vcombine.high %v10890_v46, %v10890_v46  ;;  %v4122_v29 = vrot.slane %v10887_v4, %v9982_v38 }
 0x21d   : > { %v3569_v25 = vcombine.high %v10893_v15, %v10893_v15  ;;  %v7848_v48 = vcombine.low %v7840_v35, %v7847_v54  ;;  %v7865_v47 = vcombine.low %v7857_v59, %v7864_v61  ;;  %v4126_v0 = vrot.slane %v10893_v15, %v9982_v38  ;;  %v1368_v35 = vpop.permute.xlu0 %1367 }
 0x21e   : > { %v3570_v33 = vcombine.high %v10898_v10, %v10898_v10  ;;  %v10916_v43 = vrot.slane %v3567_v7, %v9982_v38  ;;  %v4138_v9 = vrot.slane %v10890_v46, %v9982_v38  ;;  %v4142_v19 = vrot.slane %v10898_v10, %v9982_v38 }
 0x21f   : > { %v10919_v56 = vrot.slane %v3569_v25, %v9982_v38  ;;  %8472 = vst.msk [vmem:[%s10162_s6 + $0x100] sm:$0xff] %vm542_vm0, %v7848_v48  ;;  %8473 = vst.msk [vmem:[%s10162_s6 + $0x108] sm:$0xff] %vm542_vm0, %v7865_v47  ;;  %v10930_v34 = vrot.slane %v3568_v57, %v9982_v38  ;;  %v1187_v13 = vadd.f32 %v10620_v60, %v1186_v16 }
 0x220   : > { %v10933_v39 = vrot.slane %v3570_v33, %v9982_v38  ;;  %v1839_v62 = vsel %vm576_vm1, %v1823_v26, %v10832_v50  ;;  %v1824_v22 = vsel %vm559_vm2, %v10848_v49, %v1710_v63  ;;  %v772_v27 = vadd.f32 %v10620_v60, %v8882_v3 }
 0x221   : > { %8967 = vmatprep.mubr.msk.f32.mxu1 %vm601_vm3, %v1839_v62  ;;  %v10945_v1 = vsel %vm559_vm2, %v10861_v51, %v10863_v58  ;;  %v1404_v40 = vsel %vm542_vm0, %v9040_v6, %v1242_v30  ;;  %v3473_v53 = vcombine.high %v1187_v13, %v1187_v13  ;;  %v3480_v50 = vrot.slane %v1187_v13, %v9969_v8 }
 0x222   : > { %v767_v17 = vadd.f32 %v10620_v60, %v766_v14  ;;  %v10952_v41 = vsel %vm559_vm2, %v1404_v40, %v1306_v24  ;;  %v2594_v49 = vcombine.high %v772_v27, %v772_v27  ;;  %v2601_v63 = vrot.slane %v772_v27, %v9969_v8  ;;  %v1666_v40 = vpop.permute.xlu1 %1665 }
 0x223   : > { %v1840_v12 = vsel %vm576_vm1, %v1824_v22, %v1774_v28  ;;  %v10958_v51 = vsel %vm542_vm0, %v9041_v21, %v1664_v23  ;;  %v3487_v58 = vrot.slane %v3473_v53, %v9969_v8  ;;  %v3488_v31 = vcombine.high %v3480_v50, %v3480_v50  ;;  %v1370_v53 = vpop.permute.xlu0 %1369 }
 0x224   : > { %v10962_v20 = vrot.slane %v3480_v50, %v9969_v8  ;;  %v2545_v42 = vcombine.high %v767_v17, %v767_v17  ;;  %8968 = vmatmul.mubr.msk.f32.gmra.mxu1 %vm601_vm3, %v1840_v12  ;;  %v2608_v2 = vrot.slane %v2594_v49, %v9969_v8  ;;  %v2609_v55 = vcombine.high %v2601_v63, %v2601_v63 }
 0x225   : > { %v2617_v5 = vrot.slane %v2601_v63, %v9969_v8  ;;  %v2552_v32 = vrot.slane %v767_v17, %v9969_v8  ;;  %v3489_v44 = vcombine.high %v3487_v58, %v3487_v58  ;;  %v10969_v11 = vrot.slane %v3487_v58, %v9969_v8  ;;  %v8913_v63 = vpop.f32.mrf.mxu1 }
 0x226   : > { %v3510_v36 = vrot.slane %v3488_v31, %v9969_v8  ;;  %v3518_v37 = vcombine.high %v10962_v20, %v10962_v20  ;;  %v4090_v52 = vrot.slane %v10962_v20, %v9982_v38  ;;  %v2610_v18 = vcombine.high %v2608_v2, %v2608_v2 }
 0x227   : > { %v2624_v30 = vrot.slane %v2608_v2, %v9969_v8  ;;  %v2631_v24 = vrot.slane %v2609_v55, %v9969_v8  ;;  %v10979_v59 = vrot.slane %v3489_v44, %v9969_v8  ;;  %v3519_v3 = vcombine.high %v10969_v11, %v10969_v11 }
 0x228   : > { %v3520_v54 = vcombine.high %v3510_v36, %v3510_v36  ;;  %v4094_v61 = vrot.slane %v3510_v36, %v9982_v38  ;;  %v4098_v26 = vrot.slane %v3518_v37, %v9982_v38  ;;  %v4106_v7 = vrot.slane %v10969_v11, %v9982_v38 }
 0x229   : > { %v2638_v57 = vrot.slane %v2610_v18, %v9969_v8  ;;  %v2639_v25 = vcombine.high %v2617_v5, %v2617_v5  ;;  %v3521_v16 = vcombine.high %v10979_v59, %v10979_v59  ;;  %v4110_v47 = vrot.slane %v10979_v59, %v9982_v38 }
 0x22a   : > { %v4102_v48 = vrot.slane %v3520_v54, %v9982_v38  ;;  %v4114_v33 = vrot.slane %v3519_v3, %v9982_v38  ;;  %v2640_v14 = vcombine.high %v2624_v30, %v2624_v30  ;;  %v2641_v13 = vcombine.high %v2631_v24, %v2631_v24 }
 0x22b   : > { %v2642_v62 = vcombine.high %v2638_v57, %v2638_v57  ;;  %v4496_v28 = vsel %vm4407_vm4, %v2617_v5, %v4122_v29  ;;  %v4118_v23 = vrot.slane %v3521_v16, %v9982_v38  ;;  %v4497_v22 = vsel %vm4407_vm4, %v2631_v24, %v4126_v0  ;;  %v1244_v5 = vpop.permute.xlu1 %1243 }
 0x22c   : > { %v4498_v27 = vsel %vm4407_vm4, %v2639_v25, %v10916_v43  ;;  %v4500_v6 = vsel %vm4407_vm4, %v2624_v30, %v4138_v9  ;;  %v4499_v4 = vsel %vm4407_vm4, %v2641_v13, %v10919_v56  ;;  %v4501_v15 = vsel %vm4407_vm4, %v2638_v57, %v4142_v19  ;;  %v9042_v13 = vld [vmem:[%s9151_s24 + $0xc9] sm:$0xff] }
 0x22d   : > { %v4502_v29 = vsel %vm4407_vm4, %v2640_v14, %v10930_v34  ;;  %v4503_v0 = vsel %vm4407_vm4, %v2642_v62, %v10933_v39  ;;  %v8002_v43 = vcombine.low %v4496_v28, %v4497_v22  ;;  %v8003_v46 = vcombine.low %v4498_v27, %v4499_v4  ;;  %v1196_v14 = vpop.f32.mrf.mxu1 }
 0x22e   : > { %v8019_v50 = vcombine.low %v4500_v6, %v4501_v15  ;;  %v8020_v9 = vcombine.low %v4502_v29, %v4503_v0  ;;  %v2559_v17 = vrot.slane %v2545_v42, %v9969_v8  ;;  %v2560_v49 = vcombine.high %v2552_v32, %v2552_v32 }
 0x22f   : > { %v2568_v56 = vrot.slane %v2552_v32, %v9969_v8  ;;  %v1435_v10 = vsel %vm576_vm1, %v10945_v1, %v1368_v35  ;;  %v8010_v19 = vrot.slane %v8002_v43, %v9994_v45  ;;  %v8017_v34 = vrot.slane %v8003_v46, %v9994_v45  ;;  %v1712_v32 = vpop.permute.xlu0 %1711  ;;  %v1776_v27 = vpop.permute.xlu1 %1775  ;;  %v9043_v43 = vld [vmem:[%s9151_s24 + $0xc0] sm:$0xff] }
 0x230   : > { %v8027_v12 = vrot.slane %v8019_v50, %v9994_v45  ;;  %v8034_v39 = vrot.slane %v8020_v9, %v9994_v45  ;;  %8939 = vmatprep.mubr.msk.f32.mxu0 %vm601_vm3, %v1435_v10  ;;  %v2561_v21 = vcombine.high %v2559_v17, %v2559_v17  ;;  %v2575_v58 = vrot.slane %v2559_v17, %v9969_v8 }
 0x231   : > { %v2582_v31 = vrot.slane %v2560_v49, %v9969_v8  ;;  %v2590_v20 = vcombine.high %v2568_v56, %v2568_v56  ;;  %v8018_v1 = vcombine.low %v8010_v19, %v8017_v34  ;;  %v4488_v2 = vsel %vm4407_vm4, %v2568_v56, %v4090_v52 }
 0x232   : > { %v8035_v42 = vcombine.low %v8027_v12, %v8034_v39  ;;  %v1202_v55 = vadd.f32 %v10620_v60, %v8913_v63  ;;  %v2589_v44 = vrot.slane %v2561_v21, %v9969_v8  ;;  %v2591_v11 = vcombine.high %v2575_v58, %v2575_v58 }
 0x233   : > { %v2592_v36 = vcombine.high %v2582_v31, %v2582_v31  ;;  %v4489_v37 = vsel %vm4407_vm4, %v2582_v31, %v4094_v61  ;;  %8482 = vst.msk [vmem:[%s10162_s6 + $0x150] sm:$0xff] %vm542_vm0, %v8018_v1  ;;  %v4490_v35 = vsel %vm4407_vm4, %v2590_v20, %v4098_v26  ;;  %v4492_v18 = vsel %vm4407_vm4, %v2575_v58, %v4106_v7  ;;  %v1714_v6 = vpop.permute.xlu0 %1713 }
 0x234   : > { %8483 = vst.msk [vmem:[%s10162_s6 + $0x158] sm:$0xff] %vm542_vm0, %v8035_v42  ;;  %v7968_v52 = vcombine.low %v4488_v2, %v4489_v37  ;;  %v3620_v30 = vcombine.high %v1202_v55, %v1202_v55  ;;  %v2593_v24 = vcombine.high %v2589_v44, %v2589_v44  ;;  %v4493_v3 = vsel %vm4407_vm4, %v2589_v44, %v4110_v47  ;;  %v1308_v2 = vpop.permute.xlu1 %1307 }
 0x235   : > { %v4491_v59 = vsel %vm4407_vm4, %v2592_v36, %v4102_v48  ;;  %v4494_v54 = vsel %vm4407_vm4, %v2591_v11, %v4114_v33  ;;  %v7985_v25 = vcombine.low %v4492_v18, %v4493_v3  ;;  %v3627_v16 = vrot.slane %v1202_v55, %v9969_v8 }
 0x236   : > { %v7969_v57 = vcombine.low %v4490_v35, %v4491_v59  ;;  %v7976_v61 = vrot.slane %v7968_v52, %v9994_v45  ;;  %v4495_v26 = vsel %vm4407_vm4, %v2593_v24, %v4118_v23  ;;  %v3634_v7 = vrot.slane %v3620_v30, %v9969_v8  ;;  %v9044_v24 = vld [vmem:[%s9151_s24 + $0xc8] sm:$0xff] }
 0x237   : > { %v1810_v62 = vsel %vm542_vm0, %v9042_v13, %v1666_v40  ;;  %v1436_v48 = vsel %vm576_vm1, %v10952_v41, %v1370_v53  ;;  %v7986_v33 = vcombine.low %v4494_v54, %v4495_v26  ;;  %v7993_v28 = vrot.slane %v7985_v25, %v9994_v45  ;;  %v8885_v53 = vpop.f32.mrf.mxu0  ;;  %v1246_v55 = vpop.permute.xlu0 %1245 }
 0x238   : > { %v7983_v47 = vrot.slane %v7969_v57, %v9994_v45  ;;  %v3635_v22 = vcombine.high %v3627_v16, %v3627_v16  ;;  %8940 = vmatmul.mubr.msk.f32.gmra.mxu0 %vm601_vm3, %v1436_v48  ;;  %v3636_v23 = vcombine.high %v3634_v7, %v3634_v7  ;;  %v11055_v4 = vrot.slane %v3627_v16, %v9969_v8 }
 0x239   : > { %v11058_v40 = vrot.slane %v3634_v7, %v9969_v8  ;;  %v1197_v41 = vadd.f32 %v10620_v60, %v1196_v14  ;;  %v8000_v29 = vrot.slane %v7986_v33, %v9994_v45  ;;  %v1405_v46 = vsel %vm542_vm0, %v9043_v43, %v1244_v5  ;;  %v776_v58 = vpop.f32.mrf.mxu0 }
 0x23a   : > { %v7984_v15 = vcombine.low %v7976_v61, %v7983_v47  ;;  %v11063_v0 = vrot.slane %v3635_v22, %v9969_v8  ;;  %v11068_v50 = vrot.slane %v3636_v23, %v9969_v8  ;;  %v3665_v9 = vcombine.high %v11055_v4, %v11055_v4 }
 0x23b   : > { %v3666_v17 = vcombine.high %v11058_v40, %v11058_v40  ;;  %v4186_v49 = vrot.slane %v11055_v4, %v9982_v38  ;;  %v8001_v56 = vcombine.low %v7993_v28, %v8000_v29  ;;  %v4202_v19 = vrot.slane %v11058_v40, %v9982_v38 }
 0x23c   : > { %8480 = vst.msk [vmem:[%s10162_s6 + $0x140] sm:$0xff] %vm542_vm0, %v7984_v15  ;;  %v3667_v10 = vcombine.high %v11063_v0, %v11063_v0  ;;  %v4190_v63 = vrot.slane %v11063_v0, %v9982_v38  ;;  %v3668_v34 = vcombine.high %v11068_v50, %v11068_v50  ;;  %v4194_v12 = vrot.slane %v3665_v9, %v9982_v38 }
 0x23d   : > { %v4206_v39 = vrot.slane %v11068_v50, %v9982_v38  ;;  %v4210_v21 = vrot.slane %v3666_v17, %v9982_v38  ;;  %8481 = vst.msk [vmem:[%s10162_s6 + $0x148] sm:$0xff] %vm542_vm0, %v8001_v56  ;;  %v3571_v20 = vcombine.high %v1197_v41, %v1197_v41  ;;  %v3578_v1 = vrot.slane %v1197_v41, %v9969_v8 }
 0x23e   : > { %v4198_v31 = vrot.slane %v3667_v10, %v9982_v38  ;;  %v1825_v42 = vsel %vm559_vm2, %v10958_v51, %v1712_v32  ;;  %v4214_v5 = vrot.slane %v3668_v34, %v9982_v38  ;;  %v782_v44 = vadd.f32 %v10620_v60, %v8885_v53 }
 0x23f   : > { %v1841_v11 = vsel %vm576_vm1, %v1825_v42, %v1776_v27  ;;  %v11100_v36 = vsel %vm559_vm2, %v1810_v62, %v1714_v6  ;;  %v3585_v37 = vrot.slane %v3571_v20, %v9969_v8  ;;  %v3586_v35 = vcombine.high %v3578_v1, %v3578_v1 }
 0x240   : > { %v11104_v18 = vrot.slane %v3578_v1, %v9969_v8  ;;  %v777_v52 = vadd.f32 %v10620_v60, %v776_v58  ;;  %8970 = vmatprep.mubr.msk.f32.mxu1 %vm601_vm3, %v1841_v11  ;;  %v2692_v51 = vcombine.high %v782_v44, %v782_v44  ;;  %v2699_v32 = vrot.slane %v782_v44, %v9969_v8  ;;  %v1778_v11 = vpop.permute.xlu0 %1777 }
 0x241   : > { %v11110_v30 = vsel %vm559_vm2, %v1405_v46, %v1308_v2  ;;  %v1406_v59 = vsel %vm542_vm0, %v9044_v24, %v1246_v55  ;;  %v3587_v3 = vcombine.high %v3585_v37, %v3585_v37  ;;  %v11115_v54 = vrot.slane %v3585_v37, %v9969_v8  ;;  %v1310_v2 = vpop.permute.xlu1 %1309 }
 0x242   : > { %v11118_v57 = vrot.slane %v3586_v35, %v9969_v8  ;;  %v3616_v61 = vcombine.high %v11104_v18, %v11104_v18  ;;  %v4154_v25 = vrot.slane %v11104_v18, %v9982_v38  ;;  %v2706_v16 = vrot.slane %v2692_v51, %v9969_v8 }
 0x243   : > { %v2707_v14 = vcombine.high %v2699_v32, %v2699_v32  ;;  %v2715_v26 = vrot.slane %v2699_v32, %v9969_v8  ;;  %v3615_v7 = vrot.slane %v3587_v3, %v9969_v8  ;;  %v3617_v13 = vcombine.high %v11115_v54, %v11115_v54 }
 0x244   : > { %v3618_v62 = vcombine.high %v11118_v57, %v11118_v57  ;;  %v4158_v48 = vrot.slane %v11118_v57, %v9982_v38  ;;  %v4162_v47 = vrot.slane %v3616_v61, %v9982_v38  ;;  %v4170_v33 = vrot.slane %v11115_v54, %v9982_v38  ;;  %v8916_v54 = vpop.f32.mrf.mxu1  ;;  %v8888_v57 = vpop.f32.mrf.mxu0 }
 0x245   : > { %v2708_v28 = vcombine.high %v2706_v16, %v2706_v16  ;;  %v2722_v22 = vrot.slane %v2706_v16, %v9969_v8  ;;  %v3619_v27 = vcombine.high %v3615_v7, %v3615_v7  ;;  %v4174_v23 = vrot.slane %v3615_v7, %v9982_v38 }
 0x246   : > { %v4166_v6 = vrot.slane %v3618_v62, %v9982_v38  ;;  %v4178_v4 = vrot.slane %v3617_v13, %v9982_v38  ;;  %v2729_v40 = vrot.slane %v2707_v14, %v9969_v8  ;;  %v2737_v53 = vcombine.high %v2715_v26, %v2715_v26 }
 0x247   : > { %v2736_v41 = vrot.slane %v2708_v28, %v9969_v8  ;;  %v2738_v15 = vcombine.high %v2722_v22, %v2722_v22  ;;  %v4182_v29 = vrot.slane %v3619_v27, %v9982_v38  ;;  %v4512_v0 = vsel %vm4407_vm4, %v2715_v26, %v4186_v49  ;;  %v1374_v28 = vpop.permute.xlu1 %1373 }
 0x248   : > { %v4516_v43 = vsel %vm4407_vm4, %v2722_v22, %v4202_v19  ;;  %v2643_v46 = vcombine.high %v777_v52, %v777_v52  ;;  %v2739_v50 = vcombine.high %v2729_v40, %v2729_v40  ;;  %v4513_v17 = vsel %vm4407_vm4, %v2729_v40, %v4190_v63 }
 0x249   : > { %v2740_v9 = vcombine.high %v2736_v41, %v2736_v41  ;;  %v4514_v56 = vsel %vm4407_vm4, %v2737_v53, %v4194_v12  ;;  %v4517_v10 = vsel %vm4407_vm4, %v2736_v41, %v4206_v39  ;;  %v4518_v34 = vsel %vm4407_vm4, %v2738_v15, %v4210_v21  ;;  %v1372_v41 = vpop.permute.xlu0 %1371  ;;  %v786_v15 = vpop.f32.mrf.mxu0 }
 0x24a   : > { %v8138_v58 = vcombine.low %v4512_v0, %v4513_v17  ;;  %v2650_v20 = vrot.slane %v777_v52, %v9969_v8  ;;  %v4515_v1 = vsel %vm4407_vm4, %v2739_v50, %v4198_v31  ;;  %v8155_v42 = vcombine.low %v4516_v43, %v4517_v10 }
 0x24b   : > { %v4519_v49 = vsel %vm4407_vm4, %v2740_v9, %v4214_v5  ;;  %v2657_v19 = vrot.slane %v2643_v46, %v9969_v8  ;;  %v8139_v55 = vcombine.low %v4514_v56, %v4515_v1  ;;  %v1422_v52 = vsel %vm559_vm2, %v1406_v59, %v1310_v2 }
 0x24c   : > { %v8146_v63 = vrot.slane %v8138_v58, %v9994_v45  ;;  %v8156_v44 = vcombine.low %v4518_v34, %v4519_v49  ;;  %v2658_v12 = vcombine.high %v2650_v20, %v2650_v20  ;;  %v8163_v39 = vrot.slane %v8155_v42, %v9994_v45 }
 0x24d   : > { %v2659_v21 = vcombine.high %v2657_v19, %v2657_v19  ;;  %v2666_v37 = vrot.slane %v2650_v20, %v9969_v8  ;;  %v2673_v35 = vrot.slane %v2657_v19, %v9969_v8  ;;  %v8153_v31 = vrot.slane %v8139_v55, %v9994_v45 }
 0x24e   : > { %v8170_v5 = vrot.slane %v8156_v44, %v9994_v45  ;;  %v2680_v18 = vrot.slane %v2658_v12, %v9969_v8  ;;  %v792_v56 = vadd.f32 %v10620_v60, %v8888_v57  ;;  %v787_v10 = vadd.f32 %v10620_v60, %v786_v15 }
 0x24f   : > { %v2687_v51 = vrot.slane %v2659_v21, %v9969_v8  ;;  %v2688_v32 = vcombine.high %v2666_v37, %v2666_v37  ;;  %v2689_v24 = vcombine.high %v2673_v35, %v2673_v35  ;;  %v4504_v3 = vsel %vm4407_vm4, %v2666_v37, %v4154_v25 }
 0x250   : > { %v8154_v61 = vcombine.low %v8146_v63, %v8153_v31  ;;  %v8171_v16 = vcombine.low %v8163_v39, %v8170_v5  ;;  %v2690_v14 = vcombine.high %v2680_v18, %v2680_v18  ;;  %v4505_v26 = vsel %vm4407_vm4, %v2680_v18, %v4158_v48 }
 0x251   : > { %v2691_v7 = vcombine.high %v2687_v51, %v2687_v51  ;;  %v4506_v13 = vsel %vm4407_vm4, %v2688_v32, %v4162_v47  ;;  %v4508_v59 = vsel %vm4407_vm4, %v2673_v35, %v4170_v33  ;;  %v4509_v62 = vsel %vm4407_vm4, %v2687_v51, %v4174_v23  ;;  %v1206_v23 = vpop.f32.mrf.mxu1 }
 0x252   : > { %8490 = vst.msk [vmem:[%s10162_s6 + $0x190] sm:$0xff] %vm542_vm0, %v8154_v61  ;;  %8491 = vst.msk [vmem:[%s10162_s6 + $0x198] sm:$0xff] %vm542_vm0, %v8171_v16  ;;  %v4507_v25 = vsel %vm4407_vm4, %v2690_v14, %v4166_v6  ;;  %v4510_v22 = vsel %vm4407_vm4, %v2689_v24, %v4178_v4  ;;  %v8104_v27 = vcombine.low %v4504_v3, %v4505_v26 }
 0x253   : > { %v8121_v40 = vcombine.low %v4508_v59, %v4509_v62  ;;  %v4511_v48 = vsel %vm4407_vm4, %v2691_v7, %v4182_v29  ;;  %v8105_v53 = vcombine.low %v4506_v13, %v4507_v25  ;;  %v1842_v47 = vsel %vm576_vm1, %v11100_v36, %v1778_v11 }
 0x254   : > { %v1212_v33 = vadd.f32 %v10620_v60, %v8916_v54  ;;  %v8112_v0 = vrot.slane %v8104_v27, %v9994_v45  ;;  %v8122_v43 = vcombine.low %v4510_v22, %v4511_v48  ;;  %8971 = vmatmul.mubr.msk.f32.gmra.mxu1 %vm601_vm3, %v1842_v47  ;;  %v1438_v4 = vsel %vm576_vm1, %v1422_v52, %v1374_v28 }
 0x255   : > { %v8129_v6 = vrot.slane %v8121_v40, %v9994_v45  ;;  %v8119_v46 = vrot.slane %v8105_v53, %v9994_v45  ;;  %v1437_v36 = vsel %vm576_vm1, %v11110_v30, %v1372_v41  ;;  %v1207_v17 = vadd.f32 %v10620_v60, %v1206_v23  ;;  %v8951_v53 = vpop.f32.mrf.mxu1 }
 0x256   : > { %v3718_v29 = vcombine.high %v1212_v33, %v1212_v33  ;;  %v3725_v50 = vrot.slane %v1212_v33, %v9969_v8  ;;  %v8136_v9 = vrot.slane %v8122_v43, %v9994_v45  ;;  %8942 = vmatprep.mubr.msk.f32.mxu0 %vm601_vm3, %v1437_v36  ;;  %v2790_v19 = vcombine.high %v792_v56, %v792_v56  ;;  %v11253_v36 = vld [vmem:[%s12203_s2] ss:$0 sm:$0xff] }
 0x257   : > { %v8120_v34 = vcombine.low %v8112_v0, %v8119_v46  ;;  %8943 = vmatmul.mubr.msk.f32.gmra.mxu0 %vm601_vm3, %v1438_v4  ;;  %v3669_v49 = vcombine.high %v1207_v17, %v1207_v17  ;;  %v3676_v42 = vrot.slane %v1207_v17, %v9969_v8  ;;  %v2797_v59 = vrot.slane %v792_v56, %v9969_v8 }
 0x258   : > { %v3732_v58 = vrot.slane %v3718_v29, %v9969_v8  ;;  %v3733_v20 = vcombine.high %v3725_v50, %v3725_v50  ;;  %v3741_v1 = vrot.slane %v3725_v50, %v9969_v8  ;;  %v8137_v30 = vcombine.low %v8129_v6, %v8136_v9 }
 0x259   : > { %8488 = vst.msk [vmem:[%s10162_s6 + $0x180] sm:$0xff] %vm542_vm0, %v8120_v34  ;;  %v3683_v12 = vrot.slane %v3669_v49, %v9969_v8  ;;  %v3684_v11 = vcombine.high %v3676_v42, %v3676_v42  ;;  %v11203_v39 = vrot.slane %v3676_v42, %v9969_v8  ;;  %v2804_v41 = vrot.slane %v2790_v19, %v9969_v8 }
 0x25a   : > { %v3734_v2 = vcombine.high %v3732_v58, %v3732_v58  ;;  %v3748_v55 = vrot.slane %v3732_v58, %v9969_v8  ;;  %v3755_v60 = vrot.slane %v3733_v20, %v9969_v8  ;;  %v3763_v63 = vcombine.high %v3741_v1, %v3741_v1  ;;  %8489 = vst.msk [vmem:[%s10162_s6 + $0x188] sm:$0xff] %vm542_vm0, %v8137_v30 }
 0x25b   : > { %v4250_v44 = vrot.slane %v3741_v1, %v9982_v38  ;;  %v3685_v52 = vcombine.high %v3683_v12, %v3683_v12  ;;  %v11210_v51 = vrot.slane %v3683_v12, %v9969_v8  ;;  %v11216_v57 = vrot.slane %v3684_v11, %v9969_v8 }
 0x25c   : > { %v3762_v21 = vrot.slane %v3734_v2, %v9969_v8  ;;  %v3764_v37 = vcombine.high %v3748_v55, %v3748_v55  ;;  %v3765_v35 = vcombine.high %v3755_v60, %v3755_v60  ;;  %v4254_v31 = vrot.slane %v3755_v60, %v9982_v38 }
 0x25d   : > { %v4258_v5 = vrot.slane %v3763_v63, %v9982_v38  ;;  %v4266_v18 = vrot.slane %v3748_v55, %v9982_v38  ;;  %v11219_v61 = vrot.slane %v3685_v52, %v9969_v8  ;;  %v3714_v16 = vcombine.high %v11203_v39, %v11203_v39 }
 0x25e   : > { %v3766_v32 = vcombine.high %v3762_v21, %v3762_v21  ;;  %v4262_v24 = vrot.slane %v3765_v35, %v9982_v38  ;;  %v4270_v3 = vrot.slane %v3762_v21, %v9982_v38  ;;  %v4274_v54 = vrot.slane %v3764_v37, %v9982_v38 }
 0x25f   : > { %v3715_v14 = vcombine.high %v11210_v51, %v11210_v51  ;;  %v4218_v7 = vrot.slane %v11203_v39, %v9982_v38  ;;  %v4234_v13 = vrot.slane %v11210_v51, %v9982_v38  ;;  %v3716_v62 = vcombine.high %v11216_v57, %v11216_v57 }
 0x260   : > { %v4278_v26 = vrot.slane %v3766_v32, %v9982_v38  ;;  %v3717_v28 = vcombine.high %v11219_v61, %v11219_v61  ;;  %v4222_v25 = vrot.slane %v11216_v57, %v9982_v38  ;;  %v4226_v22 = vrot.slane %v3714_v16, %v9982_v38 }
 0x261   : > { %v4238_v27 = vrot.slane %v11219_v61, %v9982_v38  ;;  %v4242_v40 = vrot.slane %v3715_v14, %v9982_v38  ;;  %v2805_v48 = vcombine.high %v2797_v59, %v2797_v59  ;;  %v4230_v47 = vrot.slane %v3716_v62, %v9982_v38  ;;  %v8923_v62 = vpop.f32.mrf.mxu0 }
 0x262   : > { %v4246_v33 = vrot.slane %v3717_v28, %v9982_v38  ;;  %v2813_v23 = vrot.slane %v2797_v59, %v9969_v8  ;;  %v2741_v15 = vcombine.high %v787_v10, %v787_v10  ;;  %v2806_v0 = vcombine.high %v2804_v41, %v2804_v41  ;;  %v1960_v59 = vpop.f32.mrf.mxu1 }
 0x263   : > { %v2820_v43 = vrot.slane %v2804_v41, %v9969_v8  ;;  %v2827_v6 = vrot.slane %v2805_v48, %v9969_v8  ;;  %v2748_v4 = vrot.slane %v787_v10, %v9969_v8  ;;  %v1966_v9 = vadd.f32 %v11253_v36, %v8951_v53 }
 0x264   : > { %v2835_v46 = vcombine.high %v2813_v23, %v2813_v23  ;;  %v4528_v29 = vsel %vm4407_vm4, %v2813_v23, %v4250_v44  ;;  %v2755_v50 = vrot.slane %v2741_v15, %v9969_v8  ;;  %v2834_v17 = vrot.slane %v2806_v0, %v9969_v8 }
 0x265   : > { %v2836_v56 = vcombine.high %v2820_v43, %v2820_v43  ;;  %v2837_v34 = vcombine.high %v2827_v6, %v2827_v6  ;;  %v4529_v58 = vsel %vm4407_vm4, %v2827_v6, %v4254_v31  ;;  %v4532_v20 = vsel %vm4407_vm4, %v2820_v43, %v4266_v18 }
 0x266   : > { %v4530_v10 = vsel %vm4407_vm4, %v2835_v46, %v4258_v5  ;;  %v8274_v1 = vcombine.low %v4528_v29, %v4529_v58  ;;  %v2756_v30 = vcombine.high %v2748_v4, %v2748_v4  ;;  %v2838_v49 = vcombine.high %v2834_v17, %v2834_v17 }
 0x267   : > { %v4531_v42 = vsel %vm4407_vm4, %v2837_v34, %v4262_v24  ;;  %v4533_v19 = vsel %vm4407_vm4, %v2834_v17, %v4270_v3  ;;  %v4534_v2 = vsel %vm4407_vm4, %v2836_v56, %v4274_v54  ;;  %v2757_v44 = vcombine.high %v2755_v50, %v2755_v50 }
 0x268   : > { %v8275_v55 = vcombine.low %v4530_v10, %v4531_v42  ;;  %v8282_v60 = vrot.slane %v8274_v1, %v9994_v45  ;;  %v8291_v63 = vcombine.low %v4532_v20, %v4533_v19  ;;  %v4535_v12 = vsel %vm4407_vm4, %v2838_v49, %v4278_v26 }
 0x269   : > { %v2764_v11 = vrot.slane %v2748_v4, %v9969_v8  ;;  %v2771_v39 = vrot.slane %v2755_v50, %v9969_v8  ;;  %v2778_v21 = vrot.slane %v2756_v30, %v9969_v8  ;;  %v8292_v35 = vcombine.low %v4534_v2, %v4535_v12 }
 0x26a   : > { %v8289_v37 = vrot.slane %v8275_v55, %v9994_v45  ;;  %v8299_v31 = vrot.slane %v8291_v63, %v9994_v45  ;;  %v2785_v5 = vrot.slane %v2757_v44, %v9969_v8  ;;  %v1562_v15 = vadd.f32 %v11253_v36, %v8923_v62 }
 0x26b   : > { %v2786_v18 = vcombine.high %v2764_v11, %v2764_v11  ;;  %v2787_v52 = vcombine.high %v2771_v39, %v2771_v39  ;;  %v2788_v51 = vcombine.high %v2778_v21, %v2778_v21  ;;  %v4520_v32 = vsel %vm4407_vm4, %v2764_v11, %v4218_v7 }
 0x26c   : > { %v8290_v24 = vcombine.low %v8282_v60, %v8289_v37  ;;  %v8306_v3 = vrot.slane %v8292_v35, %v9994_v45  ;;  %v2789_v54 = vcombine.high %v2785_v5, %v2785_v5  ;;  %v4521_v57 = vsel %vm4407_vm4, %v2778_v21, %v4222_v25 }
 0x26d   : > { %v4522_v61 = vsel %vm4407_vm4, %v2786_v18, %v4226_v22  ;;  %v4523_v16 = vsel %vm4407_vm4, %v2788_v51, %v4230_v47  ;;  %v4524_v14 = vsel %vm4407_vm4, %v2771_v39, %v4234_v13  ;;  %v4525_v26 = vsel %vm4407_vm4, %v2785_v5, %v4238_v27  ;;  %v8954_v39 = vpop.f32.mrf.mxu1 }
 0x26e   : > { %v8307_v28 = vcombine.low %v8299_v31, %v8306_v3  ;;  %8498 = vst.msk [vmem:[%s10162_s6 + $0x1d0] sm:$0xff] %vm542_vm0, %v8290_v24  ;;  %v4526_v7 = vsel %vm4407_vm4, %v2787_v52, %v4242_v40  ;;  %v4527_v41 = vsel %vm4407_vm4, %v2789_v54, %v4246_v33  ;;  %v8240_v48 = vcombine.low %v4520_v32, %v4521_v57  ;;  %v1556_v32 = vpop.f32.mrf.mxu0 }
 0x26f   : > { %v8241_v25 = vcombine.low %v4522_v61, %v4523_v16  ;;  %v8257_v53 = vcombine.low %v4524_v14, %v4525_v26  ;;  %v8258_v23 = vcombine.low %v4526_v7, %v4527_v41  ;;  %v5529_v22 = vcombine.high %v1966_v9, %v1966_v9 }
 0x270   : > { %8499 = vst.msk [vmem:[%s10162_s6 + $0x1d8] sm:$0xff] %vm542_vm0, %v8307_v28  ;;  %v8248_v13 = vrot.slane %v8240_v48, %v9994_v45  ;;  %v5536_v27 = vrot.slane %v1966_v9, %v9969_v8  ;;  %v1961_v47 = vadd.f32 %v11253_v36, %v1960_v59  ;;  %v4601_v51 = vcombine.high %v1562_v15, %v1562_v15  ;;  %v1970_v59 = vpop.f32.mrf.mxu1  ;;  %v8926_v62 = vpop.f32.mrf.mxu0 }
 0x271   : > { %v8255_v0 = vrot.slane %v8241_v25, %v9994_v45  ;;  %v8265_v40 = vrot.slane %v8257_v53, %v9994_v45  ;;  %v8272_v33 = vrot.slane %v8258_v23, %v9994_v45  ;;  %v5543_v43 = vrot.slane %v5529_v22, %v9969_v8 }
 0x272   : > { %v5544_v6 = vcombine.high %v5536_v27, %v5536_v27  ;;  %v5552_v4 = vrot.slane %v5536_v27, %v9969_v8  ;;  %v5480_v46 = vcombine.high %v1961_v47, %v1961_v47  ;;  %v5487_v29 = vrot.slane %v1961_v47, %v9969_v8 }
 0x273   : > { %v8256_v50 = vcombine.low %v8248_v13, %v8255_v0  ;;  %v8273_v9 = vcombine.low %v8265_v40, %v8272_v33  ;;  %v5545_v17 = vcombine.high %v5543_v43, %v5543_v43  ;;  %v5559_v56 = vrot.slane %v5543_v43, %v9969_v8 }
 0x274   : > { %v5566_v34 = vrot.slane %v5544_v6, %v9969_v8  ;;  %v5574_v58 = vcombine.high %v5552_v4, %v5552_v4  ;;  %v6299_v10 = vrot.slane %v5552_v4, %v9982_v38  ;;  %v5494_v20 = vrot.slane %v5480_v46, %v9969_v8 }
 0x275   : > { %8496 = vst.msk [vmem:[%s10162_s6 + $0x1c0] sm:$0xff] %vm542_vm0, %v8256_v50  ;;  %8497 = vst.msk [vmem:[%s10162_s6 + $0x1c8] sm:$0xff] %vm542_vm0, %v8273_v9  ;;  %v5573_v1 = vrot.slane %v5545_v17, %v9969_v8  ;;  %v5575_v30 = vcombine.high %v5559_v56, %v5559_v56  ;;  %v6315_v49 = vrot.slane %v5559_v56, %v9982_v38 }
 0x276   : > { %v5495_v42 = vcombine.high %v5487_v29, %v5487_v29  ;;  %v5576_v19 = vcombine.high %v5566_v34, %v5566_v34  ;;  %v6303_v2 = vrot.slane %v5566_v34, %v9982_v38  ;;  %v6307_v55 = vrot.slane %v5574_v58, %v9982_v38 }
 0x277   : > { %v5496_v60 = vcombine.high %v5494_v20, %v5494_v20  ;;  %v5577_v63 = vcombine.high %v5573_v1, %v5573_v1  ;;  %v6319_v44 = vrot.slane %v5573_v1, %v9982_v38  ;;  %v6323_v12 = vrot.slane %v5575_v30, %v9982_v38 }
 0x278   : > { %v11309_v11 = vrot.slane %v5487_v29, %v9969_v8  ;;  %v6311_v21 = vrot.slane %v5576_v19, %v9982_v38  ;;  %v11313_v37 = vrot.slane %v5494_v20, %v9969_v8  ;;  %v11316_v35 = vrot.slane %v5495_v42, %v9969_v8 }
 0x279   : > { %v11319_v31 = vrot.slane %v5496_v60, %v9969_v8  ;;  %v6327_v5 = vrot.slane %v5577_v63, %v9982_v38  ;;  %v4608_v26 = vrot.slane %v1562_v15, %v9969_v8  ;;  %v4615_v48 = vrot.slane %v4601_v51, %v9969_v8 }
 0x27a   : > { %v5525_v18 = vcombine.high %v11309_v11, %v11309_v11  ;;  %v6267_v52 = vrot.slane %v11309_v11, %v9982_v38  ;;  %v5526_v24 = vcombine.high %v11313_v37, %v11313_v37  ;;  %v5527_v3 = vcombine.high %v11316_v35, %v11316_v35 }
 0x27b   : > { %v5528_v54 = vcombine.high %v11319_v31, %v11319_v31  ;;  %v6271_v57 = vrot.slane %v11316_v35, %v9982_v38  ;;  %v6283_v16 = vrot.slane %v11313_v37, %v9982_v38  ;;  %v6287_v14 = vrot.slane %v11319_v31, %v9982_v38 }
 0x27c   : > { %v6275_v61 = vrot.slane %v5525_v18, %v9982_v38  ;;  %v6279_v28 = vrot.slane %v5527_v3, %v9982_v38  ;;  %v6291_v7 = vrot.slane %v5526_v24, %v9982_v38  ;;  %v4616_v25 = vcombine.high %v4608_v26, %v4608_v26 }
 0x27d   : > { %v6295_v41 = vrot.slane %v5528_v54, %v9982_v38  ;;  %v4624_v53 = vrot.slane %v4608_v26, %v9969_v8  ;;  %v1557_v23 = vadd.f32 %v11253_v36, %v1556_v32  ;;  %v11347_v22 = vadd.f32 %v11253_v36, %v8954_v39 }
 0x27e   : > { %v4617_v13 = vcombine.high %v4615_v48, %v4615_v48  ;;  %v4631_v27 = vrot.slane %v4615_v48, %v9969_v8  ;;  %v11351_v47 = vadd.f32 %v11253_v36, %v1970_v59  ;;  %v11354_v15 = vadd.f32 %v11253_v36, %v8926_v62 }
 0x27f   : > { %v4638_v0 = vrot.slane %v4616_v25, %v9969_v8  ;;  %v4646_v40 = vcombine.high %v4624_v53, %v4624_v53  ;;  %v6912_v33 = vsel %vm4407_vm4, %v4624_v53, %v6299_v10  ;;  %v4552_v43 = vcombine.high %v1557_v23, %v1557_v23 }
 0x280   : > { %v4645_v6 = vrot.slane %v4617_v13, %v9969_v8  ;;  %v4647_v4 = vcombine.high %v4631_v27, %v4631_v27  ;;  %v6916_v46 = vsel %vm4407_vm4, %v4631_v27, %v6315_v49  ;;  %v4559_v29 = vrot.slane %v1557_v23, %v9969_v8 }
 0x281   : > { %v4648_v50 = vcombine.high %v4638_v0, %v4638_v0  ;;  %v6913_v9 = vsel %vm4407_vm4, %v4638_v0, %v6303_v2  ;;  %v6914_v17 = vsel %vm4407_vm4, %v4646_v40, %v6307_v55  ;;  %v4566_v56 = vrot.slane %v4552_v43, %v9969_v8 }
 0x282   : > { %v4649_v34 = vcombine.high %v4645_v6, %v4645_v6  ;;  %v6917_v58 = vsel %vm4407_vm4, %v4645_v6, %v6319_v44  ;;  %v6918_v10 = vsel %vm4407_vm4, %v4647_v4, %v6323_v12  ;;  %v7390_v20 = vcombine.low %v6912_v33, %v6913_v9  ;;  %v1566_v9 = vpop.f32.mrf.mxu0 }
 0x283   : > { %v6915_v1 = vsel %vm4407_vm4, %v4648_v50, %v6311_v21  ;;  %v7407_v30 = vcombine.low %v6916_v46, %v6917_v58  ;;  %v4567_v42 = vcombine.high %v4559_v29, %v4559_v29  ;;  %v4568_v49 = vcombine.high %v4566_v56, %v4566_v56 }
 0x284   : > { %v6919_v19 = vsel %vm4407_vm4, %v4649_v34, %v6327_v5  ;;  %v7391_v60 = vcombine.low %v6914_v17, %v6915_v1  ;;  %v7398_v2 = vrot.slane %v7390_v20, %v9994_v45  ;;  %v4575_v55 = vrot.slane %v4559_v29, %v9969_v8 }
 0x285   : > { %v7408_v63 = vcombine.low %v6918_v10, %v6919_v19  ;;  %v7415_v11 = vrot.slane %v7407_v30, %v9994_v45  ;;  %v4582_v44 = vrot.slane %v4566_v56, %v9969_v8  ;;  %v4589_v12 = vrot.slane %v4567_v42, %v9969_v8  ;;  %v8957_v42 = vpop.f32.mrf.mxu1 }
 0x286   : > { %v7405_v39 = vrot.slane %v7391_v60, %v9994_v45  ;;  %v4596_v21 = vrot.slane %v4568_v49, %v9969_v8  ;;  %v4597_v37 = vcombine.high %v4575_v55, %v4575_v55  ;;  %v6904_v35 = vsel %vm4407_vm4, %v4575_v55, %v6267_v52  ;;  %v8929_v49 = vpop.f32.mrf.mxu0 }
 0x287   : > { %v7422_v31 = vrot.slane %v7408_v63, %v9994_v45  ;;  %v4598_v5 = vcombine.high %v4582_v44, %v4582_v44  ;;  %v4599_v18 = vcombine.high %v4589_v12, %v4589_v12  ;;  %v6905_v51 = vsel %vm4407_vm4, %v4589_v12, %v6271_v57 }
 0x288   : > { %v7406_v32 = vcombine.low %v7398_v2, %v7405_v39  ;;  %v4600_v24 = vcombine.high %v4596_v21, %v4596_v21  ;;  %v6906_v3 = vsel %vm4407_vm4, %v4597_v37, %v6275_v61  ;;  %v6908_v54 = vsel %vm4407_vm4, %v4582_v44, %v6283_v16 }
 0x289   : > { %v7423_v26 = vcombine.low %v7415_v11, %v7422_v31  ;;  %v6907_v59 = vsel %vm4407_vm4, %v4599_v18, %v6279_v28  ;;  %v6909_v62 = vsel %vm4407_vm4, %v4596_v21, %v6287_v14  ;;  %v6910_v52 = vsel %vm4407_vm4, %v4598_v5, %v6291_v7 }
 0x28a   : > { %8446 = vst.msk [vmem:[%s10162_s6 + $0x30] sm:$0xff] %vm542_vm0, %v7406_v32  ;;  %v6911_v48 = vsel %vm4407_vm4, %v4600_v24, %v6295_v41  ;;  %v7356_v25 = vcombine.low %v6904_v35, %v6905_v51  ;;  %v7357_v53 = vcombine.low %v6906_v3, %v6907_v59  ;;  %v7373_v57 = vcombine.low %v6908_v54, %v6909_v62  ;;  %v1980_v32 = vpop.f32.mrf.mxu1  ;;  %v1576_v24 = vpop.f32.mrf.mxu0 }
 0x28b   : > { %8447 = vst.msk [vmem:[%s10162_s6 + $0x38] sm:$0xff] %vm542_vm0, %v7423_v26  ;;  %v7374_v23 = vcombine.low %v6910_v52, %v6911_v48  ;;  %v5627_v61 = vcombine.high %v11347_v22, %v11347_v22  ;;  %v5634_v16 = vrot.slane %v11347_v22, %v9969_v8  ;;  %v5578_v14 = vcombine.high %v11351_v47, %v11351_v47 }
 0x28c   : > { %v7364_v28 = vrot.slane %v7356_v25, %v9994_v45  ;;  %v7371_v7 = vrot.slane %v7357_v53, %v9994_v45  ;;  %v7381_v41 = vrot.slane %v7373_v57, %v9994_v45  ;;  %v5585_v13 = vrot.slane %v11351_v47, %v9969_v8 }
 0x28d   : > { %v7388_v27 = vrot.slane %v7374_v23, %v9994_v45  ;;  %v5641_v0 = vrot.slane %v5627_v61, %v9969_v8  ;;  %v5642_v40 = vcombine.high %v5634_v16, %v5634_v16  ;;  %v11402_v22 = vrot.slane %v5634_v16, %v9969_v8 }
 0x28e   : > { %v7372_v33 = vcombine.low %v7364_v28, %v7371_v7  ;;  %v5592_v43 = vrot.slane %v5578_v14, %v9969_v8  ;;  %v5593_v6 = vcombine.high %v5585_v13, %v5585_v13  ;;  %v11406_v4 = vrot.slane %v5585_v13, %v9969_v8 }
 0x28f   : > { %v7389_v46 = vcombine.low %v7381_v41, %v7388_v27  ;;  %v5643_v29 = vcombine.high %v5641_v0, %v5641_v0  ;;  %v11409_v47 = vrot.slane %v5641_v0, %v9969_v8  ;;  %v11412_v50 = vrot.slane %v5642_v40, %v9969_v8 }
 0x290   : > { %8444 = vst.msk [vmem:[%s10162_s6 + $0x20] sm:$0xff] %vm542_vm0, %v7372_v33  ;;  %v5672_v17 = vcombine.high %v11402_v22, %v11402_v22  ;;  %v6363_v56 = vrot.slane %v11402_v22, %v9982_v38  ;;  %v5594_v34 = vcombine.high %v5592_v43, %v5592_v43  ;;  %v11421_v58 = vrot.slane %v5592_v43, %v9969_v8 }
 0x291   : > { %8445 = vst.msk [vmem:[%s10162_s6 + $0x28] sm:$0xff] %vm542_vm0, %v7389_v46  ;;  %v11426_v10 = vrot.slane %v5643_v29, %v9969_v8  ;;  %v5673_v20 = vcombine.high %v11409_v47, %v11409_v47  ;;  %v5674_v1 = vcombine.high %v11412_v50, %v11412_v50  ;;  %v6367_v30 = vrot.slane %v11412_v50, %v9982_v38 }
 0x292   : > { %v6371_v19 = vrot.slane %v5672_v17, %v9982_v38  ;;  %v6379_v60 = vrot.slane %v11409_v47, %v9982_v38  ;;  %v11438_v2 = vrot.slane %v5593_v6, %v9969_v8  ;;  %v11441_v55 = vrot.slane %v5594_v34, %v9969_v8 }
 0x293   : > { %v5675_v63 = vcombine.high %v11426_v10, %v11426_v10  ;;  %v6375_v11 = vrot.slane %v5674_v1, %v9982_v38  ;;  %v6383_v44 = vrot.slane %v11426_v10, %v9982_v38  ;;  %v6387_v12 = vrot.slane %v5673_v20, %v9982_v38 }
 0x294   : > { %v5623_v39 = vcombine.high %v11406_v4, %v11406_v4  ;;  %v5624_v21 = vcombine.high %v11421_v58, %v11421_v58  ;;  %v5625_v37 = vcombine.high %v11438_v2, %v11438_v2  ;;  %v5626_v35 = vcombine.high %v11441_v55, %v11441_v55 }
 0x295   : > { %v6391_v31 = vrot.slane %v5675_v63, %v9982_v38  ;;  %v6331_v5 = vrot.slane %v11406_v4, %v9982_v38  ;;  %v6335_v18 = vrot.slane %v11438_v2, %v9982_v38  ;;  %v6347_v51 = vrot.slane %v11421_v58, %v9982_v38 }
 0x296   : > { %v6339_v3 = vrot.slane %v5623_v39, %v9982_v38  ;;  %v6343_v54 = vrot.slane %v5625_v37, %v9982_v38  ;;  %v6351_v26 = vrot.slane %v11441_v55, %v9982_v38  ;;  %v6355_v59 = vrot.slane %v5624_v21, %v9982_v38 }
 0x297   : > { %v6359_v62 = vrot.slane %v5626_v35, %v9982_v38  ;;  %v4699_v52 = vcombine.high %v11354_v15, %v11354_v15  ;;  %v4706_v48 = vrot.slane %v11354_v15, %v9969_v8  ;;  %v1567_v25 = vadd.f32 %v11253_v36, %v1566_v9 }
 0x298   : > { %v11476_v53 = vadd.f32 %v11253_v36, %v8957_v42  ;;  %v11479_v57 = vadd.f32 %v11253_v36, %v1980_v32  ;;  %v11482_v23 = vadd.f32 %v11253_v36, %v8929_v49  ;;  %v11485_v61 = vadd.f32 %v11253_v36, %v1576_v24 }
 0x299   : > { %v4713_v16 = vrot.slane %v4699_v52, %v9969_v8  ;;  %v4714_v14 = vcombine.high %v4706_v48, %v4706_v48  ;;  %v4722_v28 = vrot.slane %v4706_v48, %v9969_v8  ;;  %v4650_v15 = vcombine.high %v1567_v25, %v1567_v25 }
 0x29a   : > { %v4657_v7 = vrot.slane %v1567_v25, %v9969_v8  ;;  %v5725_v41 = vcombine.high %v11476_v53, %v11476_v53  ;;  %v11494_v13 = vrot.slane %v11476_v53, %v9969_v8  ;;  %v5676_v27 = vcombine.high %v11479_v57, %v11479_v57 }
 0x29b   : > { %v4715_v0 = vcombine.high %v4713_v16, %v4713_v16  ;;  %v4729_v40 = vrot.slane %v4713_v16, %v9969_v8  ;;  %v4736_v22 = vrot.slane %v4714_v14, %v9969_v8  ;;  %v4744_v33 = vcombine.high %v4722_v28, %v4722_v28 }
 0x29c   : > { %v6928_v43 = vsel %vm4407_vm4, %v4722_v28, %v6363_v56  ;;  %v4664_v6 = vrot.slane %v4650_v15, %v9969_v8  ;;  %v4665_v4 = vcombine.high %v4657_v7, %v4657_v7  ;;  %v4673_v46 = vrot.slane %v4657_v7, %v9969_v8 }
 0x29d   : > { %v4743_v29 = vrot.slane %v4715_v0, %v9969_v8  ;;  %v4745_v47 = vcombine.high %v4729_v40, %v4729_v40  ;;  %v4746_v50 = vcombine.high %v4736_v22, %v4736_v22  ;;  %v6929_v9 = vsel %vm4407_vm4, %v4736_v22, %v6367_v30 }
 0x29e   : > { %v6930_v17 = vsel %vm4407_vm4, %v4744_v33, %v6371_v19  ;;  %v6932_v34 = vsel %vm4407_vm4, %v4729_v40, %v6379_v60  ;;  %v7526_v10 = vcombine.low %v6928_v43, %v6929_v9  ;;  %v4666_v20 = vcombine.high %v4664_v6, %v4664_v6 }
 0x29f   : > { %v4747_v1 = vcombine.high %v4743_v29, %v4743_v29  ;;  %v6931_v56 = vsel %vm4407_vm4, %v4746_v50, %v6375_v11  ;;  %v6933_v42 = vsel %vm4407_vm4, %v4743_v29, %v6383_v44  ;;  %v6934_v49 = vsel %vm4407_vm4, %v4745_v47, %v6387_v12 }
 0x2a0   : > { %v7527_v2 = vcombine.low %v6930_v17, %v6931_v56  ;;  %v7534_v55 = vrot.slane %v7526_v10, %v9994_v45  ;;  %v7543_v63 = vcombine.low %v6932_v34, %v6933_v42  ;;  %v4680_v39 = vrot.slane %v4664_v6, %v9969_v8 }
 0x2a1   : > { %v6935_v30 = vsel %vm4407_vm4, %v4747_v1, %v6391_v31  ;;  %v4687_v19 = vrot.slane %v4665_v4, %v9969_v8  ;;  %v4694_v60 = vrot.slane %v4666_v20, %v9969_v8  ;;  %v4695_v21 = vcombine.high %v4673_v46, %v4673_v46 }
 0x2a2   : > { %v7541_v37 = vrot.slane %v7527_v2, %v9994_v45  ;;  %v7544_v11 = vcombine.low %v6934_v49, %v6935_v30  ;;  %v7551_v44 = vrot.slane %v7543_v63, %v9994_v45  ;;  %v4696_v12 = vcombine.high %v4680_v39, %v4680_v39 }
 0x2a3   : > { %v4697_v35 = vcombine.high %v4687_v19, %v4687_v19  ;;  %v4698_v32 = vcombine.high %v4694_v60, %v4694_v60  ;;  %v6920_v24 = vsel %vm4407_vm4, %v4673_v46, %v6331_v5  ;;  %v6921_v52 = vsel %vm4407_vm4, %v4687_v19, %v6335_v18 }
 0x2a4   : > { %v7542_v48 = vcombine.low %v7534_v55, %v7541_v37  ;;  %v7558_v31 = vrot.slane %v7544_v11, %v9994_v45  ;;  %v6922_v25 = vsel %vm4407_vm4, %v4695_v21, %v6339_v3  ;;  %v6924_v53 = vsel %vm4407_vm4, %v4680_v39, %v6347_v51 }
 0x2a5   : > { %v6923_v16 = vsel %vm4407_vm4, %v4697_v35, %v6343_v54  ;;  %v6925_v14 = vsel %vm4407_vm4, %v4694_v60, %v6351_v26  ;;  %v6926_v28 = vsel %vm4407_vm4, %v4696_v12, %v6355_v59  ;;  %v6927_v5 = vsel %vm4407_vm4, %v4698_v32, %v6359_v62 }
 0x2a6   : > { %v7559_v18 = vcombine.low %v7551_v44, %v7558_v31  ;;  %8454 = vst.msk [vmem:[%s10162_s6 + $0x70] sm:$0xff] %vm542_vm0, %v7542_v48  ;;  %v7492_v15 = vcombine.low %v6920_v24, %v6921_v52  ;;  %v7493_v7 = vcombine.low %v6922_v25, %v6923_v16  ;;  %v7509_v0 = vcombine.low %v6924_v53, %v6925_v14 }
 0x2a7   : > { %v7510_v3 = vcombine.low %v6926_v28, %v6927_v5  ;;  %v5739_v40 = vrot.slane %v5725_v41, %v9969_v8  ;;  %v5740_v58 = vcombine.high %v11494_v13, %v11494_v13  ;;  %v5748_v51 = vrot.slane %v11494_v13, %v9969_v8 }
 0x2a8   : > { %8455 = vst.msk [vmem:[%s10162_s6 + $0x78] sm:$0xff] %vm542_vm0, %v7559_v18  ;;  %v7500_v54 = vrot.slane %v7492_v15, %v9994_v45  ;;  %v7507_v26 = vrot.slane %v7493_v7, %v9994_v45  ;;  %v7517_v59 = vrot.slane %v7509_v0, %v9994_v45  ;;  %v5683_v62 = vrot.slane %v11479_v57, %v9969_v8 }
 0x2a9   : > { %v7524_v41 = vrot.slane %v7510_v3, %v9994_v45  ;;  %v5741_v22 = vcombine.high %v5739_v40, %v5739_v40  ;;  %v5755_v33 = vrot.slane %v5739_v40, %v9969_v8  ;;  %v5762_v13 = vrot.slane %v5740_v58, %v9969_v8 }
 0x2aa   : > { %v7508_v43 = vcombine.low %v7500_v54, %v7507_v26  ;;  %v5770_v6 = vcombine.high %v5748_v51, %v5748_v51  ;;  %v6427_v4 = vrot.slane %v5748_v51, %v9982_v38  ;;  %v5690_v46 = vrot.slane %v5676_v27, %v9969_v8 }
 0x2ab   : > { %v7525_v29 = vcombine.low %v7517_v59, %v7524_v41  ;;  %v5769_v47 = vrot.slane %v5741_v22, %v9969_v8  ;;  %v5771_v50 = vcombine.high %v5755_v33, %v5755_v33  ;;  %v5772_v9 = vcombine.high %v5762_v13, %v5762_v13 }
 0x2ac   : > { %8452 = vst.msk [vmem:[%s10162_s6 + $0x60] sm:$0xff] %vm542_vm0, %v7508_v43  ;;  %v6431_v17 = vrot.slane %v5762_v13, %v9982_v38  ;;  %v6435_v34 = vrot.slane %v5770_v6, %v9982_v38  ;;  %v6443_v10 = vrot.slane %v5755_v33, %v9982_v38  ;;  %v5691_v20 = vcombine.high %v5683_v62, %v5683_v62 }
 0x2ad   : > { %8453 = vst.msk [vmem:[%s10162_s6 + $0x68] sm:$0xff] %vm542_vm0, %v7525_v29  ;;  %v5773_v1 = vcombine.high %v5769_v47, %v5769_v47  ;;  %v6439_v57 = vrot.slane %v5772_v9, %v9982_v38  ;;  %v6447_v27 = vrot.slane %v5769_v47, %v9982_v38  ;;  %v6451_v56 = vrot.slane %v5771_v50, %v9982_v38  ;;  %v8960_v29 = vpop.f32.mrf.mxu1 }
 0x2ae   : > { %v5692_v42 = vcombine.high %v5690_v46, %v5690_v46  ;;  %v5699_v49 = vrot.slane %v5683_v62, %v9969_v8  ;;  %v11564_v2 = vrot.slane %v5690_v46, %v9969_v8  ;;  %v5713_v55 = vrot.slane %v5691_v20, %v9969_v8 }
 0x2af   : > { %v6455_v63 = vrot.slane %v5773_v1, %v9982_v38  ;;  %v4797_v39 = vcombine.high %v11482_v23, %v11482_v23  ;;  %v4804_v30 = vrot.slane %v11482_v23, %v9969_v8  ;;  %v4748_v19 = vcombine.high %v11485_v61, %v11485_v61 }
 0x2b0   : > { %v11575_v60 = vrot.slane %v5692_v42, %v9969_v8  ;;  %v5721_v21 = vcombine.high %v5699_v49, %v5699_v49  ;;  %v5722_v37 = vcombine.high %v11564_v2, %v11564_v2  ;;  %v5723_v11 = vcombine.high %v5713_v55, %v5713_v55 }
 0x2b1   : > { %v6395_v44 = vrot.slane %v5699_v49, %v9982_v38  ;;  %v6399_v12 = vrot.slane %v5713_v55, %v9982_v38  ;;  %v6411_v35 = vrot.slane %v11564_v2, %v9982_v38  ;;  %v4811_v23 = vrot.slane %v4797_v39, %v9969_v8 }
 0x2b2   : > { %v5724_v32 = vcombine.high %v11575_v60, %v11575_v60  ;;  %v6403_v24 = vrot.slane %v5721_v21, %v9982_v38  ;;  %v6407_v52 = vrot.slane %v5723_v11, %v9982_v38  ;;  %v6415_v48 = vrot.slane %v11575_v60, %v9982_v38 }
 0x2b3   : > { %v6419_v31 = vrot.slane %v5722_v37, %v9982_v38  ;;  %v4812_v25 = vcombine.high %v4804_v30, %v4804_v30  ;;  %v4813_v53 = vcombine.high %v4811_v23, %v4811_v23  ;;  %v4820_v16 = vrot.slane %v4804_v30, %v9969_v8  ;;  %v1990_v30 = vpop.f32.mrf.mxu1 }
 0x2b4   : > { %v6423_v14 = vrot.slane %v5724_v32, %v9982_v38  ;;  %v4827_v28 = vrot.slane %v4811_v23, %v9969_v8  ;;  %v4755_v5 = vrot.slane %v11485_v61, %v9969_v8  ;;  %v4762_v18 = vrot.slane %v4748_v19, %v9969_v8 }
 0x2b5   : > { %v4834_v15 = vrot.slane %v4812_v25, %v9969_v8  ;;  %v4841_v7 = vrot.slane %v4813_v53, %v9969_v8  ;;  %v4842_v0 = vcombine.high %v4820_v16, %v4820_v16  ;;  %v6944_v3 = vsel %vm4407_vm4, %v4820_v16, %v6427_v4 }
 0x2b6   : > { %v4843_v40 = vcombine.high %v4827_v28, %v4827_v28  ;;  %v6948_v58 = vsel %vm4407_vm4, %v4827_v28, %v6443_v10  ;;  %v4763_v51 = vcombine.high %v4755_v5, %v4755_v5  ;;  %v4764_v54 = vcombine.high %v4762_v18, %v4762_v18 }
 0x2b7   : > { %v4844_v26 = vcombine.high %v4834_v15, %v4834_v15  ;;  %v4845_v59 = vcombine.high %v4841_v7, %v4841_v7  ;;  %v6945_v62 = vsel %vm4407_vm4, %v4834_v15, %v6431_v17  ;;  %v6946_v61 = vsel %vm4407_vm4, %v4842_v0, %v6435_v34  ;;  %v8932_v34 = vpop.f32.mrf.mxu0 }
 0x2b8   : > { %v6949_v41 = vsel %vm4407_vm4, %v4841_v7, %v6447_v27  ;;  %v6950_v22 = vsel %vm4407_vm4, %v4843_v40, %v6451_v56  ;;  %v7662_v33 = vcombine.low %v6944_v3, %v6945_v62  ;;  %v4771_v13 = vrot.slane %v4755_v5, %v9969_v8 }
 0x2b9   : > { %v6947_v43 = vsel %vm4407_vm4, %v4844_v26, %v6439_v57  ;;  %v6951_v6 = vsel %vm4407_vm4, %v4845_v59, %v6455_v63  ;;  %v7679_v4 = vcombine.low %v6948_v58, %v6949_v41  ;;  %v4778_v46 = vrot.slane %v4762_v18, %v9969_v8  ;;  %v1586_v11 = vpop.f32.mrf.mxu0 }
 0x2ba   : > { %v7663_v47 = vcombine.low %v6946_v61, %v6947_v43  ;;  %v7670_v50 = vrot.slane %v7662_v33, %v9994_v45  ;;  %v7680_v9 = vcombine.low %v6950_v22, %v6951_v6  ;;  %v4785_v17 = vrot.slane %v4763_v51, %v9969_v8 }
 0x2bb   : > { %v7687_v10 = vrot.slane %v7679_v4, %v9994_v45  ;;  %v4792_v20 = vrot.slane %v4764_v54, %v9969_v8  ;;  %v4793_v1 = vcombine.high %v4771_v13, %v4771_v13  ;;  %v4794_v27 = vcombine.high %v4778_v46, %v4778_v46 }
 0x2bc   : > { %v7677_v57 = vrot.slane %v7663_v47, %v9994_v45  ;;  %v7694_v56 = vrot.slane %v7680_v9, %v9994_v45  ;;  %v4795_v42 = vcombine.high %v4785_v17, %v4785_v17  ;;  %v6936_v49 = vsel %vm4407_vm4, %v4771_v13, %v6395_v44 }
 0x2bd   : > { %v4796_v2 = vcombine.high %v4792_v20, %v4792_v20  ;;  %v6937_v55 = vsel %vm4407_vm4, %v4785_v17, %v6399_v12  ;;  %v6938_v63 = vsel %vm4407_vm4, %v4793_v1, %v6403_v24  ;;  %v6940_v39 = vsel %vm4407_vm4, %v4778_v46, %v6411_v35  ;;  %v8963_v17 = vpop.f32.mrf.mxu1 }
 0x2be   : > { %v7678_v19 = vcombine.low %v7670_v50, %v7677_v57  ;;  %v7695_v60 = vcombine.low %v7687_v10, %v7694_v56  ;;  %v6939_v21 = vsel %vm4407_vm4, %v4795_v42, %v6407_v52  ;;  %v6941_v37 = vsel %vm4407_vm4, %v4792_v20, %v6415_v48 }
 0x2bf   : > { %v6942_v23 = vsel %vm4407_vm4, %v4794_v27, %v6419_v31  ;;  %v6943_v44 = vsel %vm4407_vm4, %v4796_v2, %v6423_v14  ;;  %v7628_v32 = vcombine.low %v6936_v49, %v6937_v55  ;;  %v7629_v25 = vcombine.low %v6938_v63, %v6939_v21  ;;  %v2000_v21 = vpop.f32.mrf.mxu1 }
 0x2c0   : > { %8462 = vst.msk [vmem:[%s10162_s6 + $0xb0] sm:$0xff] %vm542_vm0, %v7678_v19  ;;  %8463 = vst.msk [vmem:[%s10162_s6 + $0xb8] sm:$0xff] %vm542_vm0, %v7695_v60  ;;  %v7645_v12 = vcombine.low %v6940_v39, %v6941_v37  ;;  %v7646_v35 = vcombine.low %v6942_v23, %v6943_v44  ;;  %v1996_v24 = vadd.f32 %v11253_v36, %v8960_v29  ;;  %v8935_v37 = vpop.f32.mrf.mxu0 }
 0x2c1   : > { %v1991_v53 = vadd.f32 %v11253_v36, %v1990_v30  ;;  %v7636_v52 = vrot.slane %v7628_v32, %v9994_v45  ;;  %v7643_v48 = vrot.slane %v7629_v25, %v9994_v45  ;;  %v1592_v31 = vadd.f32 %v11253_v36, %v8932_v34 }
 0x2c2   : > { %v11633_v16 = vadd.f32 %v11253_v36, %v1586_v11  ;;  %v7653_v14 = vrot.slane %v7645_v12, %v9994_v45  ;;  %v7660_v28 = vrot.slane %v7646_v35, %v9994_v45  ;;  %v5823_v5 = vcombine.high %v1996_v24, %v1996_v24 }
 0x2c3   : > { %v5830_v18 = vrot.slane %v1996_v24, %v9969_v8  ;;  %v7644_v15 = vcombine.low %v7636_v52, %v7643_v48  ;;  %v5774_v7 = vcombine.high %v1991_v53, %v1991_v53  ;;  %v5781_v0 = vrot.slane %v1991_v53, %v9969_v8 }
 0x2c4   : > { %v4895_v3 = vcombine.high %v1592_v31, %v1592_v31  ;;  %v7661_v40 = vcombine.low %v7653_v14, %v7660_v28  ;;  %v5837_v58 = vrot.slane %v5823_v5, %v9969_v8  ;;  %v4902_v61 = vrot.slane %v1592_v31, %v9969_v8 }
 0x2c5   : > { %v5838_v51 = vcombine.high %v5830_v18, %v5830_v18  ;;  %v5846_v54 = vrot.slane %v5830_v18, %v9969_v8  ;;  %8460 = vst.msk [vmem:[%s10162_s6 + $0xa0] sm:$0xff] %vm542_vm0, %v7644_v15  ;;  %v5788_v26 = vrot.slane %v5774_v7, %v9969_v8  ;;  %v5789_v59 = vcombine.high %v5781_v0, %v5781_v0 }
 0x2c6   : > { %v11645_v62 = vrot.slane %v5781_v0, %v9969_v8  ;;  %8461 = vst.msk [vmem:[%s10162_s6 + $0xa8] sm:$0xff] %vm542_vm0, %v7661_v40  ;;  %v5839_v41 = vcombine.high %v5837_v58, %v5837_v58  ;;  %v5853_v22 = vrot.slane %v5837_v58, %v9969_v8  ;;  %v4909_v25 = vrot.slane %v4895_v3, %v9969_v8 }
 0x2c7   : > { %v5860_v33 = vrot.slane %v5838_v51, %v9969_v8  ;;  %v5868_v13 = vcombine.high %v5846_v54, %v5846_v54  ;;  %v6491_v43 = vrot.slane %v5846_v54, %v9982_v38  ;;  %v5790_v6 = vcombine.high %v5788_v26, %v5788_v26 }
 0x2c8   : > { %v11654_v4 = vrot.slane %v5788_v26, %v9969_v8  ;;  %v11657_v46 = vrot.slane %v5789_v59, %v9969_v8  ;;  %v5867_v29 = vrot.slane %v5839_v41, %v9969_v8  ;;  %v5869_v47 = vcombine.high %v5853_v22, %v5853_v22 }
 0x2c9   : > { %v5870_v50 = vcombine.high %v5860_v33, %v5860_v33  ;;  %v6495_v9 = vrot.slane %v5860_v33, %v9982_v38  ;;  %v6499_v34 = vrot.slane %v5868_v13, %v9982_v38  ;;  %v6507_v10 = vrot.slane %v5853_v22, %v9982_v38 }
 0x2ca   : > { %v11664_v20 = vrot.slane %v5790_v6, %v9969_v8  ;;  %v5819_v1 = vcombine.high %v11645_v62, %v11645_v62  ;;  %v5871_v27 = vcombine.high %v5867_v29, %v5867_v29  ;;  %v6511_v56 = vrot.slane %v5867_v29, %v9982_v38 }
 0x2cb   : > { %v6503_v57 = vrot.slane %v5870_v50, %v9982_v38  ;;  %v6515_v42 = vrot.slane %v5869_v47, %v9982_v38  ;;  %v5820_v49 = vcombine.high %v11654_v4, %v11654_v4  ;;  %v5821_v2 = vcombine.high %v11657_v46, %v11657_v46 }
 0x2cc   : > { %v5822_v55 = vcombine.high %v11664_v20, %v11664_v20  ;;  %v6459_v63 = vrot.slane %v11645_v62, %v9982_v38  ;;  %v6519_v39 = vrot.slane %v5871_v27, %v9982_v38  ;;  %v6463_v30 = vrot.slane %v11657_v46, %v9982_v38 }
 0x2cd   : > { %v6467_v19 = vrot.slane %v5819_v1, %v9982_v38  ;;  %v6475_v60 = vrot.slane %v11654_v4, %v9982_v38  ;;  %v6471_v11 = vrot.slane %v5821_v2, %v9982_v38  ;;  %v6479_v23 = vrot.slane %v11664_v20, %v9982_v38 }
 0x2ce   : > { %v6483_v44 = vrot.slane %v5820_v49, %v9982_v38  ;;  %v6487_v32 = vrot.slane %v5822_v55, %v9982_v38  ;;  %v4910_v12 = vcombine.high %v4902_v61, %v4902_v61  ;;  %v4918_v35 = vrot.slane %v4902_v61, %v9969_v8 }
 0x2cf   : > { %v4846_v24 = vcombine.high %v11633_v16, %v11633_v16  ;;  %v4853_v53 = vrot.slane %v11633_v16, %v9969_v8  ;;  %v11697_v52 = vadd.f32 %v11253_v36, %v8963_v17  ;;  %v11700_v48 = vadd.f32 %v11253_v36, %v2000_v21 }
 0x2d0   : > { %v11703_v31 = vadd.f32 %v11253_v36, %v8935_v37  ;;  %v4911_v14 = vcombine.high %v4909_v25, %v4909_v25  ;;  %v4925_v28 = vrot.slane %v4909_v25, %v9969_v8  ;;  %v4932_v5 = vrot.slane %v4910_v12, %v9969_v8 }
 0x2d1   : > { %v4940_v18 = vcombine.high %v4918_v35, %v4918_v35  ;;  %v6960_v15 = vsel %vm4407_vm4, %v4918_v35, %v6491_v43  ;;  %v4860_v7 = vrot.slane %v4846_v24, %v9969_v8  ;;  %v4861_v16 = vcombine.high %v4853_v53, %v4853_v53 }
 0x2d2   : > { %v4869_v0 = vrot.slane %v4853_v53, %v9969_v8  ;;  %v4939_v3 = vrot.slane %v4911_v14, %v9969_v8  ;;  %v4941_v40 = vcombine.high %v4925_v28, %v4925_v28  ;;  %v4942_v58 = vcombine.high %v4932_v5, %v4932_v5 }
 0x2d3   : > { %v6961_v36 = vsel %vm4407_vm4, %v4932_v5, %v6495_v9  ;;  %v6962_v51 = vsel %vm4407_vm4, %v4940_v18, %v6499_v34  ;;  %v6964_v54 = vsel %vm4407_vm4, %v4925_v28, %v6507_v10  ;;  %v4862_v59 = vcombine.high %v4860_v7, %v4860_v7 }
 0x2d4   : > { %v7798_v26 = vcombine.low %v6960_v15, %v6961_v36  ;;  %v4943_v62 = vcombine.high %v4939_v3, %v4939_v3  ;;  %v6963_v61 = vsel %vm4407_vm4, %v4942_v58, %v6503_v57  ;;  %v6965_v41 = vsel %vm4407_vm4, %v4939_v3, %v6511_v56  ;;  %v1596_v3 = vpop.f32.mrf.mxu0 }
 0x2d5   : > { %v6966_v22 = vsel %vm4407_vm4, %v4941_v40, %v6515_v42  ;;  %v7799_v33 = vcombine.low %v6962_v51, %v6963_v61  ;;  %v7815_v43 = vcombine.low %v6964_v54, %v6965_v41  ;;  %v4876_v6 = vrot.slane %v4860_v7, %v9969_v8  ;;  %v8966_v61 = vpop.f32.mrf.mxu1 }
 0x2d6   : > { %v7806_v13 = vrot.slane %v7798_v26, %v9994_v45  ;;  %v6967_v4 = vsel %vm4407_vm4, %v4943_v62, %v6519_v39  ;;  %v4883_v46 = vrot.slane %v4861_v16, %v9969_v8  ;;  %v4890_v29 = vrot.slane %v4862_v59, %v9969_v8  ;;  %v8938_v41 = vpop.f32.mrf.mxu0 }
 0x2d7   : > { %v4891_v47 = vcombine.high %v4869_v0, %v4869_v0  ;;  %v7813_v50 = vrot.slane %v7799_v33, %v9994_v45  ;;  %v7816_v9 = vcombine.low %v6966_v22, %v6967_v4  ;;  %v7823_v17 = vrot.slane %v7815_v43, %v9994_v45 }
 0x2d8   : > { %v4892_v34 = vcombine.high %v4876_v6, %v4876_v6  ;;  %v4893_v10 = vcombine.high %v4883_v46, %v4883_v46  ;;  %v4894_v20 = vcombine.high %v4890_v29, %v4890_v29  ;;  %v6952_v1 = vsel %vm4407_vm4, %v4869_v0, %v6459_v63 }
 0x2d9   : > { %v6953_v27 = vsel %vm4407_vm4, %v4883_v46, %v6463_v30  ;;  %v7814_v57 = vcombine.low %v7806_v13, %v7813_v50  ;;  %v7830_v56 = vrot.slane %v7816_v9, %v9994_v45  ;;  %v6954_v42 = vsel %vm4407_vm4, %v4891_v47, %v6467_v19 }
 0x2da   : > { %v6956_v49 = vsel %vm4407_vm4, %v4876_v6, %v6475_v60  ;;  %v6955_v2 = vsel %vm4407_vm4, %v4893_v10, %v6471_v11  ;;  %v6957_v55 = vsel %vm4407_vm4, %v4890_v29, %v6479_v23  ;;  %v6958_v39 = vsel %vm4407_vm4, %v4892_v34, %v6483_v44 }
 0x2db   : > { %v6959_v21 = vsel %vm4407_vm4, %v4894_v20, %v6487_v32  ;;  %v7831_v37 = vcombine.low %v7823_v17, %v7830_v56  ;;  %8470 = vst.msk [vmem:[%s10162_s6 + $0xf0] sm:$0xff] %vm542_vm0, %v7814_v57  ;;  %v7764_v63 = vcombine.low %v6952_v1, %v6953_v27  ;;  %v7765_v30 = vcombine.low %v6954_v42, %v6955_v2  ;;  %v2010_v27 = vpop.f32.mrf.mxu1  ;;  %v1606_v57 = vpop.f32.mrf.mxu0 }
 0x2dc   : > { %v7781_v25 = vcombine.low %v6956_v49, %v6957_v55  ;;  %v7782_v12 = vcombine.low %v6958_v39, %v6959_v21  ;;  %v5921_v19 = vcombine.high %v11697_v52, %v11697_v52  ;;  %v5928_v60 = vrot.slane %v11697_v52, %v9969_v8 }
 0x2dd   : > { %v5872_v11 = vcombine.high %v11700_v48, %v11700_v48  ;;  %8471 = vst.msk [vmem:[%s10162_s6 + $0xf8] sm:$0xff] %vm542_vm0, %v7831_v37  ;;  %v7772_v23 = vrot.slane %v7764_v63, %v9994_v45  ;;  %v7779_v44 = vrot.slane %v7765_v30, %v9994_v45  ;;  %v5879_v35 = vrot.slane %v11700_v48, %v9969_v8  ;;  %v11826_v37 = vld [vmem:[%s12203_s2] ss:$0 sm:$0xff] }
 0x2de   : > { %v7789_v32 = vrot.slane %v7781_v25, %v9994_v45  ;;  %v7796_v24 = vrot.slane %v7782_v12, %v9994_v45  ;;  %v5935_v53 = vrot.slane %v5921_v19, %v9969_v8  ;;  %v5936_v52 = vcombine.high %v5928_v60, %v5928_v60 }
 0x2df   : > { %v11751_v14 = vrot.slane %v5928_v60, %v9969_v8  ;;  %v7780_v28 = vcombine.low %v7772_v23, %v7779_v44  ;;  %v5886_v5 = vrot.slane %v5872_v11, %v9969_v8  ;;  %v5887_v18 = vcombine.high %v5879_v35, %v5879_v35 }
 0x2e0   : > { %v11755_v15 = vrot.slane %v5879_v35, %v9969_v8  ;;  %v7797_v7 = vcombine.low %v7789_v32, %v7796_v24  ;;  %v5937_v16 = vcombine.high %v5935_v53, %v5935_v53  ;;  %v11758_v48 = vrot.slane %v5935_v53, %v9969_v8 }
 0x2e1   : > { %v11761_v0 = vrot.slane %v5936_v52, %v9969_v8  ;;  %8468 = vst.msk [vmem:[%s10162_s6 + $0xe0] sm:$0xff] %vm542_vm0, %v7780_v28  ;;  %v5966_v40 = vcombine.high %v11751_v14, %v11751_v14  ;;  %v6555_v58 = vrot.slane %v11751_v14, %v9982_v38  ;;  %v5888_v36 = vcombine.high %v5886_v5, %v5886_v5 }
 0x2e2   : > { %v11770_v51 = vrot.slane %v5886_v5, %v9969_v8  ;;  %8469 = vst.msk [vmem:[%s10162_s6 + $0xe8] sm:$0xff] %vm542_vm0, %v7797_v7  ;;  %v11775_v54 = vrot.slane %v5937_v16, %v9969_v8  ;;  %v5967_v26 = vcombine.high %v11758_v48, %v11758_v48  ;;  %v6571_v33 = vrot.slane %v11758_v48, %v9982_v38 }
 0x2e3   : > { %v5968_v59 = vcombine.high %v11761_v0, %v11761_v0  ;;  %v6559_v62 = vrot.slane %v11761_v0, %v9982_v38  ;;  %v6563_v22 = vrot.slane %v5966_v40, %v9982_v38  ;;  %v11787_v13 = vrot.slane %v5887_v18, %v9969_v8 }
 0x2e4   : > { %v11790_v43 = vrot.slane %v5888_v36, %v9969_v8  ;;  %v5969_v6 = vcombine.high %v11775_v54, %v11775_v54  ;;  %v6575_v46 = vrot.slane %v11775_v54, %v9982_v38  ;;  %v6579_v29 = vrot.slane %v5967_v26, %v9982_v38 }
 0x2e5   : > { %v6567_v4 = vrot.slane %v5968_v59, %v9982_v38  ;;  %v5917_v47 = vcombine.high %v11755_v15, %v11755_v15  ;;  %v5918_v50 = vcombine.high %v11770_v51, %v11770_v51  ;;  %v5919_v9 = vcombine.high %v11787_v13, %v11787_v13 }
 0x2e6   : > { %v5920_v17 = vcombine.high %v11790_v43, %v11790_v43  ;;  %v6583_v34 = vrot.slane %v5969_v6, %v9982_v38  ;;  %v6523_v10 = vrot.slane %v11755_v15, %v9982_v38  ;;  %v6527_v20 = vrot.slane %v11787_v13, %v9982_v38 }
 0x2e7   : > { %v6539_v1 = vrot.slane %v11770_v51, %v9982_v38  ;;  %v6531_v56 = vrot.slane %v5917_v47, %v9982_v38  ;;  %v6535_v42 = vrot.slane %v5919_v9, %v9982_v38  ;;  %v6543_v49 = vrot.slane %v11790_v43, %v9982_v38 }
 0x2e8   : > { %v6547_v2 = vrot.slane %v5918_v50, %v9982_v38  ;;  %v6551_v55 = vrot.slane %v5920_v17, %v9982_v38  ;;  %v4993_v39 = vcombine.high %v11703_v31, %v11703_v31  ;;  %v5000_v21 = vrot.slane %v11703_v31, %v9969_v8 }
 0x2e9   : > { %v1597_v63 = vadd.f32 %v11826_v37, %v1596_v3  ;;  %v11830_v30 = vadd.f32 %v11826_v37, %v8966_v61  ;;  %v11833_v25 = vadd.f32 %v11826_v37, %v2010_v27  ;;  %v11836_v12 = vadd.f32 %v11826_v37, %v8938_v41 }
 0x2ea   : > { %v11839_v19 = vadd.f32 %v11826_v37, %v1606_v57  ;;  %v5007_v31 = vrot.slane %v4993_v39, %v9969_v8  ;;  %v5008_v60 = vcombine.high %v5000_v21, %v5000_v21  ;;  %v5016_v11 = vrot.slane %v5000_v21, %v9969_v8 }
 0x2eb   : > { %v4944_v23 = vcombine.high %v1597_v63, %v1597_v63  ;;  %v4951_v44 = vrot.slane %v1597_v63, %v9969_v8  ;;  %v6019_v32 = vcombine.high %v11830_v30, %v11830_v30  ;;  %v11848_v35 = vrot.slane %v11830_v30, %v9969_v8 }
 0x2ec   : > { %v5970_v24 = vcombine.high %v11833_v25, %v11833_v25  ;;  %v5009_v53 = vcombine.high %v5007_v31, %v5007_v31  ;;  %v5023_v52 = vrot.slane %v5007_v31, %v9969_v8  ;;  %v5030_v14 = vrot.slane %v5008_v60, %v9969_v8 }
 0x2ed   : > { %v5038_v28 = vcombine.high %v5016_v11, %v5016_v11  ;;  %v6976_v5 = vsel %vm4407_vm4, %v5016_v11, %v6555_v58  ;;  %v4958_v18 = vrot.slane %v4944_v23, %v9969_v8  ;;  %v4959_v15 = vcombine.high %v4951_v44, %v4951_v44 }
 0x2ee   : > { %v4967_v7 = vrot.slane %v4951_v44, %v9969_v8  ;;  %v5037_v16 = vrot.slane %v5009_v53, %v9969_v8  ;;  %v5039_v48 = vcombine.high %v5023_v52, %v5023_v52  ;;  %v5040_v0 = vcombine.high %v5030_v14, %v5030_v14 }
 0x2ef   : > { %v6977_v3 = vsel %vm4407_vm4, %v5030_v14, %v6559_v62  ;;  %v6978_v40 = vsel %vm4407_vm4, %v5038_v28, %v6563_v22  ;;  %v6980_v36 = vsel %vm4407_vm4, %v5023_v52, %v6571_v33  ;;  %v4960_v26 = vcombine.high %v4958_v18, %v4958_v18 }
 0x2f0   : > { %v7934_v54 = vcombine.low %v6976_v5, %v6977_v3  ;;  %v5041_v59 = vcombine.high %v5037_v16, %v5037_v16  ;;  %v6979_v58 = vsel %vm4407_vm4, %v5040_v0, %v6567_v4  ;;  %v6981_v61 = vsel %vm4407_vm4, %v5037_v16, %v6575_v46 }
 0x2f1   : > { %v6982_v41 = vsel %vm4407_vm4, %v5039_v48, %v6579_v29  ;;  %v7935_v13 = vcombine.low %v6978_v40, %v6979_v58  ;;  %v7951_v6 = vcombine.low %v6980_v36, %v6981_v61  ;;  %v4974_v47 = vrot.slane %v4958_v18, %v9969_v8 }
 0x2f2   : > { %v7942_v43 = vrot.slane %v7934_v54, %v9994_v45  ;;  %v6983_v62 = vsel %vm4407_vm4, %v5041_v59, %v6583_v34  ;;  %v4981_v22 = vrot.slane %v4959_v15, %v9969_v8  ;;  %v4988_v33 = vrot.slane %v4960_v26, %v9969_v8 }
 0x2f3   : > { %v4989_v50 = vcombine.high %v4967_v7, %v4967_v7  ;;  %v7949_v9 = vrot.slane %v7935_v13, %v9994_v45  ;;  %v7952_v4 = vcombine.low %v6982_v41, %v6983_v62  ;;  %v7959_v46 = vrot.slane %v7951_v6, %v9994_v45 }
 0x2f4   : > { %v4990_v29 = vcombine.high %v4974_v47, %v4974_v47  ;;  %v4991_v17 = vcombine.high %v4981_v22, %v4981_v22  ;;  %v4992_v27 = vcombine.high %v4988_v33, %v4988_v33  ;;  %v6968_v57 = vsel %vm4407_vm4, %v4967_v7, %v6523_v10 }
 0x2f5   : > { %v6969_v39 = vsel %vm4407_vm4, %v4981_v22, %v6527_v20  ;;  %v7950_v21 = vcombine.low %v7942_v43, %v7949_v9  ;;  %v7966_v34 = vrot.slane %v7952_v4, %v9994_v45  ;;  %v6970_v63 = vsel %vm4407_vm4, %v4989_v50, %v6531_v56 }
 0x2f6   : > { %v6972_v30 = vsel %vm4407_vm4, %v4974_v47, %v6539_v1  ;;  %v6971_v31 = vsel %vm4407_vm4, %v4991_v17, %v6535_v42  ;;  %v6973_v60 = vsel %vm4407_vm4, %v4988_v33, %v6543_v49  ;;  %v6974_v11 = vsel %vm4407_vm4, %v4990_v29, %v6547_v2 }
 0x2f7   : > { %v6975_v10 = vsel %vm4407_vm4, %v4992_v27, %v6551_v55  ;;  %v7967_v20 = vcombine.low %v7959_v46, %v7966_v34  ;;  %8478 = vst.msk [vmem:[%s10162_s6 + $0x130] sm:$0xff] %vm542_vm0, %v7950_v21  ;;  %v7900_v23 = vcombine.low %v6968_v57, %v6969_v39  ;;  %v7901_v44 = vcombine.low %v6970_v63, %v6971_v31 }
 0x2f8   : > { %v7917_v53 = vcombine.low %v6972_v30, %v6973_v60  ;;  %v7918_v56 = vcombine.low %v6974_v11, %v6975_v10  ;;  %v6033_v52 = vrot.slane %v6019_v32, %v9969_v8  ;;  %v6034_v51 = vcombine.high %v11848_v35, %v11848_v35 }
 0x2f9   : > { %v6042_v1 = vrot.slane %v11848_v35, %v9969_v8  ;;  %8479 = vst.msk [vmem:[%s10162_s6 + $0x138] sm:$0xff] %vm542_vm0, %v7967_v20  ;;  %v7908_v42 = vrot.slane %v7900_v23, %v9994_v45  ;;  %v7915_v49 = vrot.slane %v7901_v44, %v9994_v45  ;;  %v5977_v55 = vrot.slane %v11833_v25, %v9969_v8 }
 0x2fa   : > { %v7925_v2 = vrot.slane %v7917_v53, %v9994_v45  ;;  %v7932_v32 = vrot.slane %v7918_v56, %v9994_v45  ;;  %v6035_v14 = vcombine.high %v6033_v52, %v6033_v52  ;;  %v6049_v28 = vrot.slane %v6033_v52, %v9969_v8 }
 0x2fb   : > { %v6056_v35 = vrot.slane %v6034_v51, %v9969_v8  ;;  %v7916_v5 = vcombine.low %v7908_v42, %v7915_v49  ;;  %v6064_v18 = vcombine.high %v6042_v1, %v6042_v1  ;;  %v6619_v15 = vrot.slane %v6042_v1, %v9982_v38 }
 0x2fc   : > { %v5984_v7 = vrot.slane %v5970_v24, %v9969_v8  ;;  %v7933_v16 = vcombine.low %v7925_v2, %v7932_v32  ;;  %v6063_v48 = vrot.slane %v6035_v14, %v9969_v8  ;;  %v6065_v0 = vcombine.high %v6049_v28, %v6049_v28 }
 0x2fd   : > { %v6066_v3 = vcombine.high %v6056_v35, %v6056_v35  ;;  %8476 = vst.msk [vmem:[%s10162_s6 + $0x120] sm:$0xff] %vm542_vm0, %v7916_v5  ;;  %v6623_v40 = vrot.slane %v6056_v35, %v9982_v38  ;;  %v6627_v36 = vrot.slane %v6064_v18, %v9982_v38  ;;  %v6635_v54 = vrot.slane %v6049_v28, %v9982_v38 }
 0x2fe   : > { %v5985_v26 = vcombine.high %v5977_v55, %v5977_v55  ;;  %8477 = vst.msk [vmem:[%s10162_s6 + $0x128] sm:$0xff] %vm542_vm0, %v7933_v16  ;;  %v6067_v59 = vcombine.high %v6063_v48, %v6063_v48  ;;  %v6639_v24 = vrot.slane %v6063_v48, %v9982_v38  ;;  %v6643_v58 = vrot.slane %v6065_v0, %v9982_v38  ;;  %v8969_v16 = vpop.f32.mrf.mxu1 }
 0x2ff   : > { %v6631_v25 = vrot.slane %v6066_v3, %v9982_v38  ;;  %v5986_v61 = vcombine.high %v5984_v7, %v5984_v7  ;;  %v5993_v41 = vrot.slane %v5977_v55, %v9969_v8  ;;  %v11918_v13 = vrot.slane %v5984_v7, %v9969_v8 }
 0x300   : > { %v6007_v43 = vrot.slane %v5985_v26, %v9969_v8  ;;  %v6647_v6 = vrot.slane %v6067_v59, %v9982_v38  ;;  %v5091_v47 = vcombine.high %v11836_v12, %v11836_v12  ;;  %v5098_v62 = vrot.slane %v11836_v12, %v9969_v8 }
 0x301   : > { %v5042_v22 = vcombine.high %v11839_v19, %v11839_v19  ;;  %v11929_v33 = vrot.slane %v5986_v61, %v9969_v8  ;;  %v6015_v50 = vcombine.high %v5993_v41, %v5993_v41  ;;  %v6016_v9 = vcombine.high %v11918_v13, %v11918_v13 }
 0x302   : > { %v6017_v4 = vcombine.high %v6007_v43, %v6007_v43  ;;  %v6587_v46 = vrot.slane %v5993_v41, %v9982_v38  ;;  %v6591_v29 = vrot.slane %v6007_v43, %v9982_v38  ;;  %v6603_v17 = vrot.slane %v11918_v13, %v9982_v38  ;;  %v8941_v41 = vpop.f32.mrf.mxu0 }
 0x303   : > { %v5105_v12 = vrot.slane %v5091_v47, %v9969_v8  ;;  %v6018_v27 = vcombine.high %v11929_v33, %v11929_v33  ;;  %v6595_v57 = vrot.slane %v6015_v50, %v9982_v38  ;;  %v6607_v21 = vrot.slane %v11929_v33, %v9982_v38 }
 0x304   : > { %v6599_v39 = vrot.slane %v6017_v4, %v9982_v38  ;;  %v6611_v34 = vrot.slane %v6016_v9, %v9982_v38  ;;  %v5106_v63 = vcombine.high %v5098_v62, %v5098_v62  ;;  %v5114_v31 = vrot.slane %v5098_v62, %v9969_v8  ;;  %v2020_v62 = vpop.f32.mrf.mxu1 }
 0x305   : > { %v5107_v30 = vcombine.high %v5105_v12, %v5105_v12  ;;  %v6615_v60 = vrot.slane %v6018_v27, %v9982_v38  ;;  %v5121_v11 = vrot.slane %v5105_v12, %v9969_v8  ;;  %v5049_v10 = vrot.slane %v11839_v19, %v9969_v8 }
 0x306   : > { %v5056_v20 = vrot.slane %v5042_v22, %v9969_v8  ;;  %v5128_v23 = vrot.slane %v5106_v63, %v9969_v8  ;;  %v5136_v53 = vcombine.high %v5114_v31, %v5114_v31  ;;  %v6992_v56 = vsel %vm4407_vm4, %v5114_v31, %v6619_v15 }
 0x307   : > { %v5135_v44 = vrot.slane %v5107_v30, %v9969_v8  ;;  %v5137_v52 = vcombine.high %v5121_v11, %v5121_v11  ;;  %v6996_v51 = vsel %vm4407_vm4, %v5121_v11, %v6635_v54  ;;  %v5057_v1 = vcombine.high %v5049_v10, %v5049_v10  ;;  %v1616_v30 = vpop.f32.mrf.mxu0 }
 0x308   : > { %v5058_v42 = vcombine.high %v5056_v20, %v5056_v20  ;;  %v5138_v49 = vcombine.high %v5128_v23, %v5128_v23  ;;  %v6993_v55 = vsel %vm4407_vm4, %v5128_v23, %v6623_v40  ;;  %v6994_v19 = vsel %vm4407_vm4, %v5136_v53, %v6627_v36 }
 0x309   : > { %v5139_v2 = vcombine.high %v5135_v44, %v5135_v44  ;;  %v6997_v32 = vsel %vm4407_vm4, %v5135_v44, %v6639_v24  ;;  %v6998_v14 = vsel %vm4407_vm4, %v5137_v52, %v6643_v58  ;;  %v8070_v28 = vcombine.low %v6992_v56, %v6993_v55 }
 0x30a   : > { %v5065_v35 = vrot.slane %v5049_v10, %v9969_v8  ;;  %v6995_v5 = vsel %vm4407_vm4, %v5138_v49, %v6631_v25  ;;  %v8087_v15 = vcombine.low %v6996_v51, %v6997_v32  ;;  %v5072_v7 = vrot.slane %v5056_v20, %v9969_v8 }
 0x30b   : > { %v6999_v18 = vsel %vm4407_vm4, %v5139_v2, %v6647_v6  ;;  %v8071_v48 = vcombine.low %v6994_v19, %v6995_v5  ;;  %v8078_v0 = vrot.slane %v8070_v28, %v9994_v45  ;;  %v5079_v40 = vrot.slane %v5057_v1, %v9969_v8 }
 0x30c   : > { %v8088_v3 = vcombine.low %v6998_v14, %v6999_v18  ;;  %v8095_v36 = vrot.slane %v8087_v15, %v9994_v45  ;;  %v5086_v54 = vrot.slane %v5058_v42, %v9969_v8  ;;  %v5087_v26 = vcombine.high %v5065_v35, %v5065_v35 }
 0x30d   : > { %v5088_v59 = vcombine.high %v5072_v7, %v5072_v7  ;;  %v8085_v25 = vrot.slane %v8071_v48, %v9994_v45  ;;  %v5089_v58 = vcombine.high %v5079_v40, %v5079_v40  ;;  %v6984_v61 = vsel %vm4407_vm4, %v5065_v35, %v6587_v46 }
 0x30e   : > { %v8102_v24 = vrot.slane %v8088_v3, %v9994_v45  ;;  %v5090_v13 = vcombine.high %v5086_v54, %v5086_v54  ;;  %v6985_v43 = vsel %vm4407_vm4, %v5079_v40, %v6591_v29  ;;  %v6986_v6 = vsel %vm4407_vm4, %v5087_v26, %v6595_v57 }
 0x30f   : > { %v6988_v47 = vsel %vm4407_vm4, %v5072_v7, %v6603_v17  ;;  %v8086_v22 = vcombine.low %v8078_v0, %v8085_v25  ;;  %v6987_v50 = vsel %vm4407_vm4, %v5089_v58, %v6599_v39  ;;  %v6989_v9 = vsel %vm4407_vm4, %v5086_v54, %v6607_v21 }
 0x310   : > { %v8103_v33 = vcombine.low %v8095_v36, %v8102_v24  ;;  %v6990_v4 = vsel %vm4407_vm4, %v5088_v59, %v6611_v34  ;;  %v6991_v46 = vsel %vm4407_vm4, %v5090_v13, %v6615_v60  ;;  %v8036_v12 = vcombine.low %v6984_v61, %v6985_v43 }
 0x311   : > { %v8037_v27 = vcombine.low %v6986_v6, %v6987_v50  ;;  %8486 = vst.msk [vmem:[%s10162_s6 + $0x170] sm:$0xff] %vm542_vm0, %v8086_v22  ;;  %v8053_v29 = vcombine.low %v6988_v47, %v6989_v9  ;;  %v8054_v57 = vcombine.low %v6990_v4, %v6991_v46  ;;  %v2026_v17 = vadd.f32 %v11826_v37, %v8969_v16 }
 0x312   : > { %8487 = vst.msk [vmem:[%s10162_s6 + $0x178] sm:$0xff] %vm542_vm0, %v8103_v33  ;;  %v2021_v63 = vadd.f32 %v11826_v37, %v2020_v62  ;;  %v8044_v39 = vrot.slane %v8036_v12, %v9994_v45  ;;  %v1622_v34 = vadd.f32 %v11826_v37, %v8941_v41  ;;  %v1617_v53 = vadd.f32 %v11826_v37, %v1616_v30 }
 0x313   : > { %v8051_v21 = vrot.slane %v8037_v27, %v9994_v45  ;;  %v8061_v31 = vrot.slane %v8053_v29, %v9994_v45  ;;  %v8068_v60 = vrot.slane %v8054_v57, %v9994_v45  ;;  %v6117_v11 = vcombine.high %v2026_v17, %v2026_v17 }
 0x314   : > { %v6124_v10 = vrot.slane %v2026_v17, %v9969_v8  ;;  %v6068_v23 = vcombine.high %v2021_v63, %v2021_v63  ;;  %v6075_v44 = vrot.slane %v2021_v63, %v9969_v8  ;;  %v5189_v55 = vcombine.high %v1622_v34, %v1622_v34  ;;  %v8972_v3 = vpop.f32.mrf.mxu1 }
 0x315   : > { %v8052_v20 = vcombine.low %v8044_v39, %v8051_v21  ;;  %v8069_v56 = vcombine.low %v8061_v31, %v8068_v60  ;;  %v6131_v52 = vrot.slane %v6117_v11, %v9969_v8  ;;  %v5196_v15 = vrot.slane %v1622_v34, %v9969_v8 }
 0x316   : > { %v6132_v51 = vcombine.high %v6124_v10, %v6124_v10  ;;  %v6140_v1 = vrot.slane %v6124_v10, %v9969_v8  ;;  %v6082_v42 = vrot.slane %v6068_v23, %v9969_v8  ;;  %v6083_v49 = vcombine.high %v6075_v44, %v6075_v44  ;;  %v2030_v33 = vpop.f32.mrf.mxu1 }
 0x317   : > { %8484 = vst.msk [vmem:[%s10162_s6 + $0x160] sm:$0xff] %vm542_vm0, %v8052_v20  ;;  %v11997_v2 = vrot.slane %v6075_v44, %v9969_v8  ;;  %8485 = vst.msk [vmem:[%s10162_s6 + $0x168] sm:$0xff] %vm542_vm0, %v8069_v56  ;;  %v6133_v19 = vcombine.high %v6131_v52, %v6131_v52  ;;  %v6147_v32 = vrot.slane %v6131_v52, %v9969_v8 }
 0x318   : > { %v6154_v14 = vrot.slane %v6132_v51, %v9969_v8  ;;  %v6162_v28 = vcombine.high %v6140_v1, %v6140_v1  ;;  %v6084_v35 = vcombine.high %v6082_v42, %v6082_v42  ;;  %v12004_v5 = vrot.slane %v6082_v42, %v9969_v8 }
 0x319   : > { %v12007_v18 = vrot.slane %v6083_v49, %v9969_v8  ;;  %v6161_v7 = vrot.slane %v6133_v19, %v9969_v8  ;;  %v6163_v16 = vcombine.high %v6147_v32, %v6147_v32  ;;  %v6683_v0 = vrot.slane %v6140_v1, %v9982_v38 }
 0x31a   : > { %v6164_v48 = vcombine.high %v6154_v14, %v6154_v14  ;;  %v6687_v40 = vrot.slane %v6154_v14, %v9982_v38  ;;  %v6691_v36 = vrot.slane %v6162_v28, %v9982_v38  ;;  %v12015_v54 = vrot.slane %v6084_v35, %v9969_v8 }
 0x31b   : > { %v6113_v26 = vcombine.high %v11997_v2, %v11997_v2  ;;  %v6165_v59 = vcombine.high %v6161_v7, %v6161_v7  ;;  %v6699_v24 = vrot.slane %v6147_v32, %v9982_v38  ;;  %v6703_v58 = vrot.slane %v6161_v7, %v9982_v38 }
 0x31c   : > { %v6695_v25 = vrot.slane %v6164_v48, %v9982_v38  ;;  %v6707_v61 = vrot.slane %v6163_v16, %v9982_v38  ;;  %v6114_v41 = vcombine.high %v12004_v5, %v12004_v5  ;;  %v6115_v13 = vcombine.high %v12007_v18, %v12007_v18 }
 0x31d   : > { %v6116_v43 = vcombine.high %v12015_v54, %v12015_v54  ;;  %v6711_v6 = vrot.slane %v6165_v59, %v9982_v38  ;;  %v6651_v47 = vrot.slane %v11997_v2, %v9982_v38  ;;  %v6655_v62 = vrot.slane %v12007_v18, %v9982_v38 }
 0x31e   : > { %v6659_v22 = vrot.slane %v6113_v26, %v9982_v38  ;;  %v6663_v50 = vrot.slane %v6115_v13, %v9982_v38  ;;  %v6667_v9 = vrot.slane %v12004_v5, %v9982_v38  ;;  %v6671_v4 = vrot.slane %v12015_v54, %v9982_v38 }
 0x31f   : > { %v6675_v46 = vrot.slane %v6114_v41, %v9982_v38  ;;  %v5203_v12 = vrot.slane %v5189_v55, %v9969_v8  ;;  %v5204_v27 = vcombine.high %v5196_v15, %v5196_v15  ;;  %v5212_v29 = vrot.slane %v5196_v15, %v9969_v8 }
 0x320   : > { %v5140_v57 = vcombine.high %v1617_v53, %v1617_v53  ;;  %v6679_v17 = vrot.slane %v6116_v43, %v9982_v38  ;;  %v5147_v63 = vrot.slane %v1617_v53, %v9969_v8  ;;  %v2036_v30 = vadd.f32 %v11826_v37, %v8972_v3 }
 0x321   : > { %v12047_v39 = vadd.f32 %v11826_v37, %v2030_v33  ;;  %v5205_v21 = vcombine.high %v5203_v12, %v5203_v12  ;;  %v5219_v34 = vrot.slane %v5203_v12, %v9969_v8  ;;  %v5226_v31 = vrot.slane %v5204_v27, %v9969_v8 }
 0x322   : > { %v5234_v60 = vcombine.high %v5212_v29, %v5212_v29  ;;  %v7008_v11 = vsel %vm4407_vm4, %v5212_v29, %v6683_v0  ;;  %v5154_v10 = vrot.slane %v5140_v57, %v9969_v8  ;;  %v5155_v20 = vcombine.high %v5147_v63, %v5147_v63 }
 0x323   : > { %v5163_v23 = vrot.slane %v5147_v63, %v9969_v8  ;;  %v5233_v44 = vrot.slane %v5205_v21, %v9969_v8  ;;  %v5235_v53 = vcombine.high %v5219_v34, %v5219_v34  ;;  %v5236_v56 = vcombine.high %v5226_v31, %v5226_v31 }
 0x324   : > { %v7009_v52 = vsel %vm4407_vm4, %v5226_v31, %v6687_v40  ;;  %v7010_v51 = vsel %vm4407_vm4, %v5234_v60, %v6691_v36  ;;  %v7012_v1 = vsel %vm4407_vm4, %v5219_v34, %v6699_v24  ;;  %v5156_v49 = vcombine.high %v5154_v10, %v5154_v10 }
 0x325   : > { %v8206_v42 = vcombine.low %v7008_v11, %v7009_v52  ;;  %v5237_v2 = vcombine.high %v5233_v44, %v5233_v44  ;;  %v7011_v55 = vsel %vm4407_vm4, %v5236_v56, %v6695_v25  ;;  %v7013_v19 = vsel %vm4407_vm4, %v5233_v44, %v6703_v58 }
 0x326   : > { %v7014_v32 = vsel %vm4407_vm4, %v5235_v53, %v6707_v61  ;;  %v8207_v14 = vcombine.low %v7010_v51, %v7011_v55  ;;  %v8223_v35 = vcombine.low %v7012_v1, %v7013_v19  ;;  %v5170_v5 = vrot.slane %v5154_v10, %v9969_v8  ;;  %v8944_v53 = vpop.f32.mrf.mxu0 }
 0x327   : > { %v8214_v28 = vrot.slane %v8206_v42, %v9994_v45  ;;  %v7015_v18 = vsel %vm4407_vm4, %v5237_v2, %v6711_v6  ;;  %v5177_v15 = vrot.slane %v5155_v20, %v9969_v8  ;;  %v5184_v7 = vrot.slane %v5156_v49, %v9969_v8 }
 0x328   : > { %v5185_v16 = vcombine.high %v5163_v23, %v5163_v23  ;;  %v8221_v48 = vrot.slane %v8207_v14, %v9994_v45  ;;  %v8224_v0 = vcombine.low %v7014_v32, %v7015_v18  ;;  %v8231_v3 = vrot.slane %v8223_v35, %v9994_v45 }
 0x329   : > { %v5186_v40 = vcombine.high %v5170_v5, %v5170_v5  ;;  %v5187_v36 = vcombine.high %v5177_v15, %v5177_v15  ;;  %v5188_v54 = vcombine.high %v5184_v7, %v5184_v7  ;;  %v7000_v26 = vsel %vm4407_vm4, %v5163_v23, %v6651_v47 }
 0x32a   : > { %v7001_v59 = vsel %vm4407_vm4, %v5177_v15, %v6655_v62  ;;  %v8222_v25 = vcombine.low %v8214_v28, %v8221_v48  ;;  %v8238_v24 = vrot.slane %v8224_v0, %v9994_v45  ;;  %v7002_v58 = vsel %vm4407_vm4, %v5185_v16, %v6659_v22 }
 0x32b   : > { %v7004_v61 = vsel %vm4407_vm4, %v5170_v5, %v6667_v9  ;;  %v7003_v41 = vsel %vm4407_vm4, %v5187_v36, %v6663_v50  ;;  %v7005_v13 = vsel %vm4407_vm4, %v5184_v7, %v6671_v4  ;;  %v7006_v43 = vsel %vm4407_vm4, %v5186_v40, %v6675_v46  ;;  %v1626_v5 = vpop.f32.mrf.mxu0 }
 0x32c   : > { %v7007_v6 = vsel %vm4407_vm4, %v5188_v54, %v6679_v17  ;;  %v8239_v33 = vcombine.low %v8231_v3, %v8238_v24  ;;  %8494 = vst.msk [vmem:[%s10162_s6 + $0x1b0] sm:$0xff] %vm542_vm0, %v8222_v25  ;;  %v8172_v47 = vcombine.low %v7000_v26, %v7001_v59  ;;  %v8173_v62 = vcombine.low %v7002_v58, %v7003_v41 }
 0x32d   : > { %v8189_v12 = vcombine.low %v7004_v61, %v7005_v13  ;;  %v8190_v27 = vcombine.low %v7006_v43, %v7007_v6  ;;  %v6215_v29 = vcombine.high %v2036_v30, %v2036_v30  ;;  %v6222_v22 = vrot.slane %v2036_v30, %v9969_v8 }
 0x32e   : > { %v6166_v9 = vcombine.high %v12047_v39, %v12047_v39  ;;  %8495 = vst.msk [vmem:[%s10162_s6 + $0x1b8] sm:$0xff] %vm542_vm0, %v8239_v33  ;;  %v8180_v50 = vrot.slane %v8172_v47, %v9994_v45  ;;  %v8187_v4 = vrot.slane %v8173_v62, %v9994_v45  ;;  %v6173_v57 = vrot.slane %v12047_v39, %v9969_v8 }
 0x32f   : > { %v8197_v46 = vrot.slane %v8189_v12, %v9994_v45  ;;  %v8204_v17 = vrot.slane %v8190_v27, %v9994_v45  ;;  %v6229_v63 = vrot.slane %v6215_v29, %v9969_v8  ;;  %v6230_v30 = vcombine.high %v6222_v22, %v6222_v22 }
 0x330   : > { %v6238_v21 = vrot.slane %v6222_v22, %v9969_v8  ;;  %v8188_v34 = vcombine.low %v8180_v50, %v8187_v4  ;;  %v6180_v31 = vrot.slane %v6166_v9, %v9969_v8  ;;  %v6181_v60 = vcombine.high %v6173_v57, %v6173_v57 }
 0x331   : > { %v8205_v11 = vcombine.low %v8197_v46, %v8204_v17  ;;  %v6231_v10 = vcombine.high %v6229_v63, %v6229_v63  ;;  %v6245_v20 = vrot.slane %v6229_v63, %v9969_v8  ;;  %v6252_v23 = vrot.slane %v6230_v30, %v9969_v8 }
 0x332   : > { %8492 = vst.msk [vmem:[%s10162_s6 + $0x1a0] sm:$0xff] %vm542_vm0, %v8188_v34  ;;  %v6182_v39 = vcombine.high %v6180_v31, %v6180_v31  ;;  %v12098_v44 = vrot.slane %v6173_v57, %v9969_v8  ;;  %v6260_v52 = vcombine.high %v6238_v21, %v6238_v21  ;;  %v12104_v42 = vrot.slane %v6180_v31, %v9969_v8 }
 0x333   : > { %8493 = vst.msk [vmem:[%s10162_s6 + $0x1a8] sm:$0xff] %vm542_vm0, %v8205_v11  ;;  %v6259_v56 = vrot.slane %v6231_v10, %v9969_v8  ;;  %v6262_v51 = vcombine.high %v6252_v23, %v6252_v23  ;;  %v6261_v1 = vcombine.high %v6245_v20, %v6245_v20  ;;  %v12107_v49 = vrot.slane %v6181_v60, %v9969_v8 }
 0x334   : > { %v12110_v2 = vrot.slane %v6182_v39, %v9969_v8  ;;  %v1632_v19 = vadd.f32 %v11826_v37, %v8944_v53  ;;  %v6747_v32 = vrot.slane %v6238_v21, %v9982_v38  ;;  %v6751_v14 = vrot.slane %v6252_v23, %v9982_v38 }
 0x335   : > { %v6263_v55 = vcombine.high %v6259_v56, %v6259_v56  ;;  %v6211_v28 = vcombine.high %v12098_v44, %v12098_v44  ;;  %v6213_v35 = vcombine.high %v12107_v49, %v12107_v49  ;;  %v6755_v18 = vrot.slane %v6260_v52, %v9982_v38 }
 0x336   : > { %v6759_v15 = vrot.slane %v6262_v51, %v9982_v38  ;;  %v6763_v7 = vrot.slane %v6245_v20, %v9982_v38  ;;  %v6767_v16 = vrot.slane %v6259_v56, %v9982_v38  ;;  %v6771_v48 = vrot.slane %v6261_v1, %v9982_v38 }
 0x337   : > { %v6775_v0 = vrot.slane %v6263_v55, %v9982_v38  ;;  %v6212_v3 = vcombine.high %v12104_v42, %v12104_v42  ;;  %v6214_v40 = vcombine.high %v12110_v2, %v12110_v2  ;;  %v6715_v36 = vrot.slane %v12098_v44, %v9982_v38 }
 0x338   : > { %v5287_v54 = vcombine.high %v1632_v19, %v1632_v19  ;;  %v5294_v26 = vrot.slane %v1632_v19, %v9969_v8  ;;  %v1627_v59 = vadd.f32 %v11826_v37, %v1626_v5  ;;  %v6719_v25 = vrot.slane %v12107_v49, %v9982_v38 }
 0x339   : > { %v6723_v24 = vrot.slane %v6211_v28, %v9982_v38  ;;  %v6727_v58 = vrot.slane %v6213_v35, %v9982_v38  ;;  %v6731_v61 = vrot.slane %v12104_v42, %v9982_v38  ;;  %v6735_v33 = vrot.slane %v12110_v2, %v9982_v38 }
 0x33a   : > { %v5301_v41 = vrot.slane %v5287_v54, %v9969_v8  ;;  %v5302_v13 = vcombine.high %v5294_v26, %v5294_v26  ;;  %v5310_v43 = vrot.slane %v5294_v26, %v9969_v8  ;;  %v5238_v6 = vcombine.high %v1627_v59, %v1627_v59 }
 0x33b   : > { %v6739_v37 = vrot.slane %v6212_v3, %v9982_v38  ;;  %v6743_v47 = vrot.slane %v6214_v40, %v9982_v38  ;;  %v5245_v62 = vrot.slane %v1627_v59, %v9969_v8 }
 0x33c   : > { %v5303_v12 = vcombine.high %v5301_v41, %v5301_v41  ;;  %v5317_v27 = vrot.slane %v5301_v41, %v9969_v8  ;;  %v5324_v29 = vrot.slane %v5302_v13, %v9969_v8  ;;  %v5332_v22 = vcombine.high %v5310_v43, %v5310_v43 }
 0x33d   : > { %v7024_v9 = vsel %vm4407_vm4, %v5310_v43, %v6747_v32  ;;  %v5252_v50 = vrot.slane %v5238_v6, %v9969_v8  ;;  %v5253_v4 = vcombine.high %v5245_v62, %v5245_v62  ;;  %v5261_v46 = vrot.slane %v5245_v62, %v9969_v8 }
 0x33e   : > { %v5331_v57 = vrot.slane %v5303_v12, %v9969_v8  ;;  %v5333_v17 = vcombine.high %v5317_v27, %v5317_v27  ;;  %v5334_v63 = vcombine.high %v5324_v29, %v5324_v29  ;;  %v7025_v38 = vsel %vm4407_vm4, %v5324_v29, %v6751_v14 }
 0x33f   : > { %v7026_v30 = vsel %vm4407_vm4, %v5332_v22, %v6755_v18  ;;  %v7028_v21 = vsel %vm4407_vm4, %v5317_v27, %v6763_v7  ;;  %v8342_v34 = vcombine.low %v7024_v9, %v7025_v38  ;;  %v5254_v31 = vcombine.high %v5252_v50, %v5252_v50 }
 0x340   : > { %v5335_v60 = vcombine.high %v5331_v57, %v5331_v57  ;;  %v7027_v11 = vsel %vm4407_vm4, %v5334_v63, %v6759_v15  ;;  %v7029_v10 = vsel %vm4407_vm4, %v5331_v57, %v6767_v16  ;;  %v7030_v20 = vsel %vm4407_vm4, %v5333_v17, %v6771_v48 }
 0x341   : > { %v8343_v23 = vcombine.low %v7026_v30, %v7027_v11  ;;  %v8350_v39 = vrot.slane %v8342_v34, %v9994_v45  ;;  %v8359_v44 = vcombine.low %v7028_v21, %v7029_v10  ;;  %v5268_v53 = vrot.slane %v5252_v50, %v9969_v8 }
 0x342   : > { %v7031_v56 = vsel %vm4407_vm4, %v5335_v60, %v6775_v0  ;;  %v5275_v52 = vrot.slane %v5253_v4, %v9969_v8  ;;  %v5282_v51 = vrot.slane %v5254_v31, %v9969_v8  ;;  %v5283_v1 = vcombine.high %v5261_v46, %v5261_v46 }
 0x343   : > { %v8357_v42 = vrot.slane %v8343_v23, %v9994_v45  ;;  %v8360_v49 = vcombine.low %v7030_v20, %v7031_v56  ;;  %v8367_v2 = vrot.slane %v8359_v44, %v9994_v45  ;;  %v5284_v55 = vcombine.high %v5268_v53, %v5268_v53 }
 0x344   : > { %v5285_v19 = vcombine.high %v5275_v52, %v5275_v52  ;;  %v5286_v32 = vcombine.high %v5282_v51, %v5282_v51  ;;  %v7016_v14 = vsel %vm4407_vm4, %v5261_v46, %v6715_v36  ;;  %v7017_v28 = vsel %vm4407_vm4, %v5275_v52, %v6719_v25 }
 0x345   : > { %v8358_v35 = vcombine.low %v8350_v39, %v8357_v42  ;;  %v8374_v5 = vrot.slane %v8360_v49, %v9994_v45  ;;  %v7018_v8 = vsel %vm4407_vm4, %v5283_v1, %v6723_v24  ;;  %v7020_v18 = vsel %vm4407_vm4, %v5268_v53, %v6731_v61 }
 0x346   : > { %v7019_v15 = vsel %vm4407_vm4, %v5285_v19, %v6727_v58  ;;  %v7021_v7 = vsel %vm4407_vm4, %v5282_v51, %v6735_v33  ;;  %v7022_v16 = vsel %vm4407_vm4, %v5284_v55, %v6739_v37  ;;  %v7023_v48 = vsel %vm4407_vm4, %v5286_v32, %v6743_v47 }
 0x347   : > { %v8375_v0 = vcombine.low %v8367_v2, %v8374_v5  ;;  %8502 = vst.msk [vmem:[%s10162_s6 + $0x1f0] sm:$0xff] %vm542_vm0, %v8358_v35  ;;  %v8308_v3 = vcombine.low %v7016_v14, %v7017_v28  ;;  %v8309_v40 = vcombine.low %v7018_v8, %v7019_v15  ;;  %v8325_v36 = vcombine.low %v7020_v18, %v7021_v7 }
 0x348   : > { %v8326_v54 = vcombine.low %v7022_v16, %v7023_v48 }
 0x349   : > { %8503 = vst.msk [vmem:[%s10162_s6 + $0x1f8] sm:$0xff] %vm542_vm0, %v8375_v0  ;;  %v8316_v26 = vrot.slane %v8308_v3, %v9994_v45  ;;  %v8323_v59 = vrot.slane %v8309_v40, %v9994_v45  ;;  %v8333_v25 = vrot.slane %v8325_v36, %v9994_v45 }
 0x34a   : > { %v8340_v24 = vrot.slane %v8326_v54, %v9994_v45 }
 0x34b   : > { %v8324_v58 = vcombine.low %v8316_v26, %v8323_v59 }
 0x34c   : > { %v8341_v61 = vcombine.low %v8333_v25, %v8340_v24 }
 0x34d   : > { %8500 = vst.msk [vmem:[%s10162_s6 + $0x1e0] sm:$0xff] %vm542_vm0, %v8324_v58 }
 0x34e   : > { %8501 = vst.msk [vmem:[%s10162_s6 + $0x1e8] sm:$0xff] %vm542_vm0, %v8341_v61 }
 0x34f PF: > { %s13_s16 = sadd.s32 1, %s9085_s16   ;;  %s12258_s12 = smov %s9077_s14 }
 0x350   : > { %p10_p7 = scmp.ge.s32.totalorder %s13_s16, 6   ;;  %s12259_s13 = smov %s9081_s15 }
 0x351   : > { %s12260_s14 = smov %s12263_s17  ;;  %s12261_s15 = smov %s12267_s18 }
 0x352   :  { %12 = sbr.rel (!%p10_p7) target bundleno = 3 (0x3), region = 68 }

</bundles_post_ra>
